<compile_context>
chip_gen: v7x
topology: tpu7x:2x2x1
jax: 0.10.0
libtpu: 0.0.40
codegen_flags: <defaults>
</compile_context>

<pallas_src>
import math

import jax
import jax.numpy as jnp
from jax.experimental import pallas as pl
from jax.experimental.pallas import tpu as pltpu

# Small problem sizes consistent with the module's forward.
B, S, T, D, H, HA = 2, 8, 8, 4, 32, 32   # batch, src len, trg len, feat(=output_dim), hidden, attn hidden


def _dot(a, b):
    return jnp.dot(a, b, preferred_element_type=jnp.float32)


def _gru_gates(gx, gh, h):
    """GRU update from packed gate pre-activations (PyTorch order r|z|n).

    gx, gh : (B, 3H).  One sigmoid over the first 2H lanes covers both r and z.
    """
    rz = jax.nn.sigmoid(gx[:, :2 * H] + gh[:, :2 * H])
    r, z = rz[:, :H], rz[:, H:]
    n = jnp.tanh(gx[:, 2 * H:] + r * gh[:, 2 * H:])
    return (1.0 - z) * n + z * h


def _attention(hp, enc, enc_proj, a_v_row, *, use_recip):
    """Additive attention; hp (hidden proj) and enc_proj are precomputed.

    Max-subtraction is intentionally dropped: energy is a tanh output, so
    |score| <= sum|a_v| (~5.7 at init scale) and exp() cannot overflow.  Keep
    the subtraction if a_v is allowed to grow under training.
    """
    energy = jnp.tanh(hp[:, None, :] + enc_proj)                 # (B, S, HA)
    scores = jnp.sum(energy * a_v_row[None, :, :], axis=-1)      # (B, S)
    w = jnp.exp(scores)
    denom = jnp.sum(w, axis=-1, keepdims=True)                   # (B, 1)
    inv = pl.reciprocal(denom, approx=True) if use_recip else 1.0 / denom
    w = w * inv
    return jnp.sum(w[:, :, None] * enc, axis=1)                  # (B, H)


def seq2seq_kernel(tf_ref, src_ref, trg_ref,
                   e_wih_ref, e_whh_ref, e_bih_ref, e_bhh_ref,
                   hpack_ref, a_we_ref, a_v_ref,
                   d_wihx_ref, d_wihc_ref, d_bih_ref, d_bhh_ref,
                   o_w_ref, o_b_ref,
                   out_ref, enc_ref):
    # ---------------- encoder phase -------------------------------------
    # Only encoder weights are live here (hoisting everything at entry would
    # spill the vreg file across the two fully-unrolled loops).
    src = src_ref[...]                                            # (B, S, D)
    e_whh, e_bhh = e_whh_ref[...], e_bhh_ref[...]

    # Input-side gates for ALL encoder steps in one batched matmul — off the
    # serial h-recurrence critical path.
    gx_all = (_dot(src.reshape(B * S, D), e_wih_ref[...]) + e_bih_ref[...]
              ).reshape(B, S, 3 * H)                              # (B, S, 3H)

    h = jnp.zeros((B, H), jnp.float32)
    for t in range(S):                                            # static unroll
        gh = _dot(h, e_whh) + e_bhh                               # (B, 3H)
        h = _gru_gates(gx_all[:, t, :], gh, h)
        enc_ref[:, t, :] = h                                      # VMEM scratch

    # ---------------- decoder phase -------------------------------------
    enc = enc_ref[...]                                            # (B, S, H)
    # Encoder-side attention projection hoisted out of the decoder loop.
    enc_proj = _dot(enc.reshape(B * S, H), a_we_ref[...]).reshape(B, S, HA)

    hpack = hpack_ref[...]             # (H, HA+3H) = [attn W_h | GRU W_hh]
    a_v = a_v_ref[...]                 # (1, HA)
    d_wihx, d_wihc = d_wihx_ref[...], d_wihc_ref[...]
    d_bih, d_bhh = d_bih_ref[...], d_bhh_ref[...]
    o_w, o_b = o_w_ref[...], o_b_ref[...]
    trg = trg_ref[...]                                            # (B, T, D)

    inp = src[:, S - 1, :]                                        # src[:, -1, :]
    for t in range(T):                                            # static unroll
        # One 128-lane matmul covers attention h-projection + GRU hidden gates.
        h_all = _dot(h, hpack)                                    # (B, HA + 3H)
        hp, gh = h_all[:, :HA], h_all[:, HA:] + d_bhh

        ctx = _attention(hp, enc, enc_proj, a_v, use_recip=True)  # (B, H)

        gx = _dot(inp, d_wihx) + _dot(ctx, d_wihc) + d_bih        # (B, 3H)
        h = _gru_gates(gx, gh, h)

        # fc_out over [hidden | context | input]: one packed matmul
        # (concat is 68 lanes -> one vreg; saves two MXU push/pop pairs).
        hcx = jnp.concatenate([h, ctx, inp], axis=-1)             # (B, 2H + D)
        out_t = _dot(hcx, o_w) + o_b                              # (B, D)
        out_ref[:, t, :] = out_t

        tf = (tf_ref[t] > 0).astype(jnp.float32)                  # SMEM scalar
        inp = tf * trg[:, t, :] + (1.0 - tf) * out_t              # teacher forcing


@jax.jit
def seq2seq_forward(packed, src, trg, tf_mask):
    """src: (B,S,D), trg: (B,T,D) batch-first; returns (B,T,D)."""
    vmem = pl.BlockSpec(memory_space=pltpu.MemorySpace.VMEM)
    smem = pl.BlockSpec(memory_space=pltpu.MemorySpace.SMEM)
    return pl.pallas_call(
        seq2seq_kernel,
        out_shape=jax.ShapeDtypeStruct((B, T, D), jnp.float32),
        in_specs=[smem, vmem, vmem] + [vmem] * len(packed),
        out_specs=vmem,
        scratch_shapes=[pltpu.VMEM((B, S, H), jnp.float32)],      # encoder outputs
    )(tf_mask, src, trg, *packed)


# ------------------------- host-side parameter handling -----------------------

def init_params(key):
    """Parameters in the original (PyTorch-like) layout."""
    ks = jax.random.split(key, 12)
    scale = 1.0 / math.sqrt(H)
    u = lambda k, shape: jax.random.uniform(k, shape, jnp.float32, -scale, scale)
    e_wih = u(ks[0], (3, D, H))
    e_whh = u(ks[1], (3, H, H))
    e_bih = u(ks[2], (3, 1, H))
    e_bhh = u(ks[3], (3, 1, H))
    a_w = u(ks[4], (2 * H, HA))
    a_v = u(ks[5], (HA, 1))
    d_wih = u(ks[6], (3, D + H, H))
    d_whh = u(ks[7], (3, H, H))
    d_bih = u(ks[8], (3, 1, H))
    d_bhh = u(ks[9], (3, 1, H))
    o_w = u(ks[10], (2 * H + D, D))
    o_b = u(ks[11], (1, D))
    return (e_wih, e_whh, e_bih, e_bhh, a_w, a_v,
            d_wih, d_whh, d_bih, d_bhh, o_w, o_b)


def pack_params(params):
    """Host-side repack: fuse GRU gates along lanes, fuse h-dependent matmuls."""
    (e_wih, e_whh, e_bih, e_bhh, a_w, a_v,
     d_wih, d_whh, d_bih, d_bhh, o_w, o_b) = params
    cat3 = lambda w: jnp.concatenate([w[0], w[1], w[2]], axis=-1)   # (3,X,H) -> (X,3H)
    e_wih_p, e_whh_p = cat3(e_wih), cat3(e_whh)
    e_bih_p, e_bhh_p = cat3(e_bih), cat3(e_bhh)                      # (1, 3H)
    a_wh, a_we = a_w[:H], a_w[H:]                                    # (H, HA) each
    a_v_row = a_v.T                                                  # (1, HA)
    d_wih_p = cat3(d_wih)                                            # (D+H, 3H)
    d_wihx, d_wihc = d_wih_p[:D], d_wih_p[D:]
    d_whh_p, d_bih_p, d_bhh_p = cat3(d_whh), cat3(d_bih), cat3(d_bhh)
    # Fused h-dependent matmul: attention projection + decoder hidden gates.
    hpack = jnp.concatenate([a_wh, d_whh_p], axis=1)                 # (H, HA + 3H) = (32, 128)
    return (e_wih_p, e_whh_p, e_bih_p, e_bhh_p, hpack, a_we, a_v_row,
            d_wihx, d_wihc, d_bih_p, d_bhh_p, o_w, o_b)


# ------------------------------- pure-JAX reference ----------------------------

def seq2seq_reference(packed, src, trg, tf_mask):
    (e_wih, e_whh, e_bih, e_bhh, hpack, a_we, a_v,
     d_wihx, d_wihc, d_bih, d_bhh, o_w, o_b) = packed
    a_wh, d_whh = hpack[:, :HA], hpack[:, HA:]

    h = jnp.zeros((B, H), jnp.float32)
    enc_steps = []
    for t in range(S):
        gx = _dot(src[:, t, :], e_wih) + e_bih
        gh = _dot(h, e_whh) + e_bhh
        h = _gru_gates(gx, gh, h)
        enc_steps.append(h)
    enc = jnp.stack(enc_steps, axis=1)                               # (B, S, H)
    enc_proj = _dot(enc, a_we)                                       # (B, S, HA)

    inp = src[:, -1, :]
    outs = []
    for t in range(T):
        hp = _dot(h, a_wh)
        ctx = _attention(hp, enc, enc_proj, a_v, use_recip=False)
        gx = _dot(inp, d_wihx) + _dot(ctx, d_wihc) + d_bih
        gh = _dot(h, d_whh) + d_bhh
        h = _gru_gates(gx, gh, h)
        out_t = _dot(jnp.concatenate([h, ctx, inp], axis=-1), o_w) + o_b
        outs.append(out_t)
        tf = (tf_mask[t] > 0).astype(jnp.float32)
        inp = tf * trg[:, t, :] + (1.0 - tf) * out_t
    return jnp.stack(outs, axis=1)                                   # (B, T, D)


if __name__ == "__main__":
    root = jax.random.PRNGKey(0)
    k_param, k_src, k_trg, k_tf = jax.random.split(root, 4)

    params = init_params(k_param)
    packed = pack_params(params)
    src = jax.random.normal(k_src, (B, S, D), jnp.float32)
    trg = jax.random.normal(k_trg, (B, T, D), jnp.float32)
    # teacher_force = random.random() < 0.5, one coin flip per decoder step,
    # drawn on the host (PyTorch draws them in Python too).
    tf_mask = (jax.random.uniform(k_tf, (T,)) < 0.5).astype(jnp.int32)

    out = seq2seq_forward(packed, src, trg, tf_mask)
    out = jax.block_until_ready(out)

    ref = seq2seq_reference(packed, src, trg, tf_mask)
    assert out.shape == (B, T, D)
    assert bool(jnp.all(jnp.isfinite(out)))
    assert bool(jnp.allclose(out, ref, rtol=1e-2, atol=1e-2))

    print("KERNEL_OK")
</pallas_src>

<mosaic_0001>
module attributes {stable_mosaic.version = 11 : i64} {
  func.func @seq2seq_kernel(%arg0: memref<8xi32, #tpu.memory_space<smem>>, %arg1: memref<2x8x4xf32, #tpu.memory_space<vmem>>, %arg2: memref<2x8x4xf32, #tpu.memory_space<vmem>>, %arg3: memref<4x96xf32, #tpu.memory_space<vmem>>, %arg4: memref<32x96xf32, #tpu.memory_space<vmem>>, %arg5: memref<1x96xf32, #tpu.memory_space<vmem>>, %arg6: memref<1x96xf32, #tpu.memory_space<vmem>>, %arg7: memref<32x128xf32, #tpu.memory_space<vmem>>, %arg8: memref<32x32xf32, #tpu.memory_space<vmem>>, %arg9: memref<1x32xf32, #tpu.memory_space<vmem>>, %arg10: memref<4x96xf32, #tpu.memory_space<vmem>>, %arg11: memref<32x96xf32, #tpu.memory_space<vmem>>, %arg12: memref<1x96xf32, #tpu.memory_space<vmem>>, %arg13: memref<1x96xf32, #tpu.memory_space<vmem>>, %arg14: memref<68x4xf32, #tpu.memory_space<vmem>>, %arg15: memref<1x4xf32, #tpu.memory_space<vmem>>, %arg16: memref<2x8x4xf32, #tpu.memory_space<vmem>>, %arg17: memref<2x8x32xf32, #tpu.memory_space<vmem>>) attributes {dimension_semantics = [], scalar_prefetch = 0 : i64, scratch_operands = 1 : i64, tpu.core_type = #tpu.core_type<tc>} {
    %c0 = arith.constant 0 : index
    %c0_0 = arith.constant 0 : index
    %c0_1 = arith.constant 0 : index
    %0 = vector.load %arg1[%c0, %c0_0, %c0_1] : memref<2x8x4xf32, #tpu.memory_space<vmem>>, vector<2x8x4xf32>
    %c0_2 = arith.constant 0 : index
    %c0_3 = arith.constant 0 : index
    %1 = vector.load %arg4[%c0_2, %c0_3] : memref<32x96xf32, #tpu.memory_space<vmem>>, vector<32x96xf32>
    %c0_4 = arith.constant 0 : index
    %c0_5 = arith.constant 0 : index
    %2 = vector.load %arg6[%c0_4, %c0_5] : memref<1x96xf32, #tpu.memory_space<vmem>>, vector<1x96xf32>
    %3 = vector.shape_cast %0 : vector<2x8x4xf32> to vector<16x4xf32>
    %c0_6 = arith.constant 0 : index
    %c0_7 = arith.constant 0 : index
    %4 = vector.load %arg3[%c0_6, %c0_7] : memref<4x96xf32, #tpu.memory_space<vmem>>, vector<4x96xf32>
    %cst = arith.constant dense<0.000000e+00> : vector<16x96xf32>
    %5 = tpu.matmul %3, %4, %cst {dimension_numbers = #tpu.dot_dimension_numbers<[1], [0], [0], [1], [0, 0, 1, 1], [], []>} : vector<16x4xf32>, vector<4x96xf32>, vector<16x96xf32> -> vector<16x96xf32>
    %c0_8 = arith.constant 0 : index
    %c0_9 = arith.constant 0 : index
    %6 = vector.load %arg5[%c0_8, %c0_9] : memref<1x96xf32, #tpu.memory_space<vmem>>, vector<1x96xf32>
    %7 = vector.broadcast %6 : vector<1x96xf32> to vector<16x96xf32>
    %8 = arith.addf %5, %7 : vector<16x96xf32>
    %9 = vector.shape_cast %8 : vector<16x96xf32> to vector<2x8x96xf32>
    %cst_10 = arith.constant 0.000000e+00 : f32
    %10 = vector.broadcast %cst_10 : f32 to vector<2x32xf32>
    %cst_11 = arith.constant dense<0.000000e+00> : vector<2x96xf32>
    %11 = tpu.matmul %10, %1, %cst_11 {dimension_numbers = #tpu.dot_dimension_numbers<[1], [0], [0], [1], [0, 0, 1, 1], [], []>} : vector<2x32xf32>, vector<32x96xf32>, vector<2x96xf32> -> vector<2x96xf32>
    %12 = vector.broadcast %2 : vector<1x96xf32> to vector<2x96xf32>
    %13 = arith.addf %11, %12 : vector<2x96xf32>
    %14 = vector.extract_strided_slice %9 {offsets = [0, 0, 0], sizes = [2, 1, 96], strides = [1, 1, 1]} : vector<2x8x96xf32> to vector<2x1x96xf32>
    %15 = vector.shape_cast %14 : vector<2x1x96xf32> to vector<2x96xf32>
    %16 = vector.extract_strided_slice %15 {offsets = [0, 0], sizes = [2, 64], strides = [1, 1]} : vector<2x96xf32> to vector<2x64xf32>
    %17 = vector.extract_strided_slice %13 {offsets = [0, 0], sizes = [2, 64], strides = [1, 1]} : vector<2x96xf32> to vector<2x64xf32>
    %18 = arith.addf %16, %17 : vector<2x64xf32>
    %19 = arith.negf %18 : vector<2x64xf32>
    %20 = math.exp %19 : vector<2x64xf32>
    %cst_12 = arith.constant 1.000000e+00 : f32
    %21 = vector.broadcast %cst_12 : f32 to vector<2x64xf32>
    %22 = arith.addf %21, %20 : vector<2x64xf32>
    %23 = arith.divf %21, %22 : vector<2x64xf32>
    %24 = vector.extract_strided_slice %23 {offsets = [0, 0], sizes = [2, 32], strides = [1, 1]} : vector<2x64xf32> to vector<2x32xf32>
    %25 = vector.extract_strided_slice %23 {offsets = [0, 32], sizes = [2, 32], strides = [1, 1]} : vector<2x64xf32> to vector<2x32xf32>
    %26 = vector.extract_strided_slice %15 {offsets = [0, 64], sizes = [2, 32], strides = [1, 1]} : vector<2x96xf32> to vector<2x32xf32>
    %27 = vector.extract_strided_slice %13 {offsets = [0, 64], sizes = [2, 32], strides = [1, 1]} : vector<2x96xf32> to vector<2x32xf32>
    %28 = arith.mulf %24, %27 : vector<2x32xf32>
    %29 = arith.addf %26, %28 : vector<2x32xf32>
    %30 = math.tanh %29 : vector<2x32xf32>
    %cst_13 = arith.constant 1.000000e+00 : f32
    %31 = vector.broadcast %cst_13 : f32 to vector<2x32xf32>
    %32 = arith.subf %31, %25 : vector<2x32xf32>
    %33 = arith.mulf %32, %30 : vector<2x32xf32>
    %34 = arith.mulf %25, %10 : vector<2x32xf32>
    %35 = arith.addf %33, %34 : vector<2x32xf32>
    %c0_14 = arith.constant 0 : index
    %c0_15 = arith.constant 0 : index
    %c0_16 = arith.constant 0 : index
    %36 = vector.load %arg17[%c0_14, %c0_15, %c0_16] : memref<2x8x32xf32, #tpu.memory_space<vmem>>, vector<2x1x32xf32>
    %37 = vector.shape_cast %36 : vector<2x1x32xf32> to vector<2x32xf32>
    %38 = vector.shape_cast %35 : vector<2x32xf32> to vector<2x1x32xf32>
    tpu.vector_store %arg17[%c0_14, %c0_15, %c0_16], %38 {strides = array<i32>} : memref<2x8x32xf32, #tpu.memory_space<vmem>>, vector<2x1x32xf32>,
    %cst_17 = arith.constant dense<0.000000e+00> : vector<2x96xf32>
    %39 = tpu.matmul %35, %1, %cst_17 {dimension_numbers = #tpu.dot_dimension_numbers<[1], [0], [0], [1], [0, 0, 1, 1], [], []>} : vector<2x32xf32>, vector<32x96xf32>, vector<2x96xf32> -> vector<2x96xf32>
    %40 = vector.broadcast %2 : vector<1x96xf32> to vector<2x96xf32>
    %41 = arith.addf %39, %40 : vector<2x96xf32>
    %42 = vector.extract_strided_slice %9 {offsets = [0, 1, 0], sizes = [2, 1, 96], strides = [1, 1, 1]} : vector<2x8x96xf32> to vector<2x1x96xf32>
    %43 = vector.shape_cast %42 : vector<2x1x96xf32> to vector<2x96xf32>
    %44 = vector.extract_strided_slice %43 {offsets = [0, 0], sizes = [2, 64], strides = [1, 1]} : vector<2x96xf32> to vector<2x64xf32>
    %45 = vector.extract_strided_slice %41 {offsets = [0, 0], sizes = [2, 64], strides = [1, 1]} : vector<2x96xf32> to vector<2x64xf32>
    %46 = arith.addf %44, %45 : vector<2x64xf32>
    %47 = arith.negf %46 : vector<2x64xf32>
    %48 = math.exp %47 : vector<2x64xf32>
    %cst_18 = arith.constant 1.000000e+00 : f32
    %49 = vector.broadcast %cst_18 : f32 to vector<2x64xf32>
    %50 = arith.addf %49, %48 : vector<2x64xf32>
    %51 = arith.divf %49, %50 : vector<2x64xf32>
    %52 = vector.extract_strided_slice %51 {offsets = [0, 0], sizes = [2, 32], strides = [1, 1]} : vector<2x64xf32> to vector<2x32xf32>
    %53 = vector.extract_strided_slice %51 {offsets = [0, 32], sizes = [2, 32], strides = [1, 1]} : vector<2x64xf32> to vector<2x32xf32>
    %54 = vector.extract_strided_slice %43 {offsets = [0, 64], sizes = [2, 32], strides = [1, 1]} : vector<2x96xf32> to vector<2x32xf32>
    %55 = vector.extract_strided_slice %41 {offsets = [0, 64], sizes = [2, 32], strides = [1, 1]} : vector<2x96xf32> to vector<2x32xf32>
    %56 = arith.mulf %52, %55 : vector<2x32xf32>
    %57 = arith.addf %54, %56 : vector<2x32xf32>
    %58 = math.tanh %57 : vector<2x32xf32>
    %cst_19 = arith.constant 1.000000e+00 : f32
    %59 = vector.broadcast %cst_19 : f32 to vector<2x32xf32>
    %60 = arith.subf %59, %53 : vector<2x32xf32>
    %61 = arith.mulf %60, %58 : vector<2x32xf32>
    %62 = arith.mulf %53, %35 : vector<2x32xf32>
    %63 = arith.addf %61, %62 : vector<2x32xf32>
    %c0_20 = arith.constant 0 : index
    %c1 = arith.constant 1 : index
    %c0_21 = arith.constant 0 : index
    %64 = vector.load %arg17[%c0_20, %c1, %c0_21] : memref<2x8x32xf32, #tpu.memory_space<vmem>>, vector<2x1x32xf32>
    %65 = vector.shape_cast %64 : vector<2x1x32xf32> to vector<2x32xf32>
    %66 = vector.shape_cast %63 : vector<2x32xf32> to vector<2x1x32xf32>
    tpu.vector_store %arg17[%c0_20, %c1, %c0_21], %66 {strides = array<i32>} : memref<2x8x32xf32, #tpu.memory_space<vmem>>, vector<2x1x32xf32>,
    %cst_22 = arith.constant dense<0.000000e+00> : vector<2x96xf32>
    %67 = tpu.matmul %63, %1, %cst_22 {dimension_numbers = #tpu.dot_dimension_numbers<[1], [0], [0], [1], [0, 0, 1, 1], [], []>} : vector<2x32xf32>, vector<32x96xf32>, vector<2x96xf32> -> vector<2x96xf32>
    %68 = vector.broadcast %2 : vector<1x96xf32> to vector<2x96xf32>
    %69 = arith.addf %67, %68 : vector<2x96xf32>
    %70 = vector.extract_strided_slice %9 {offsets = [0, 2, 0], sizes = [2, 1, 96], strides = [1, 1, 1]} : vector<2x8x96xf32> to vector<2x1x96xf32>
    %71 = vector.shape_cast %70 : vector<2x1x96xf32> to vector<2x96xf32>
    %72 = vector.extract_strided_slice %71 {offsets = [0, 0], sizes = [2, 64], strides = [1, 1]} : vector<2x96xf32> to vector<2x64xf32>
    %73 = vector.extract_strided_slice %69 {offsets = [0, 0], sizes = [2, 64], strides = [1, 1]} : vector<2x96xf32> to vector<2x64xf32>
    %74 = arith.addf %72, %73 : vector<2x64xf32>
    %75 = arith.negf %74 : vector<2x64xf32>
    %76 = math.exp %75 : vector<2x64xf32>
    %cst_23 = arith.constant 1.000000e+00 : f32
    %77 = vector.broadcast %cst_23 : f32 to vector<2x64xf32>
    %78 = arith.addf %77, %76 : vector<2x64xf32>
    %79 = arith.divf %77, %78 : vector<2x64xf32>
    %80 = vector.extract_strided_slice %79 {offsets = [0, 0], sizes = [2, 32], strides = [1, 1]} : vector<2x64xf32> to vector<2x32xf32>
    %81 = vector.extract_strided_slice %79 {offsets = [0, 32], sizes = [2, 32], strides = [1, 1]} : vector<2x64xf32> to vector<2x32xf32>
    %82 = vector.extract_strided_slice %71 {offsets = [0, 64], sizes = [2, 32], strides = [1, 1]} : vector<2x96xf32> to vector<2x32xf32>
    %83 = vector.extract_strided_slice %69 {offsets = [0, 64], sizes = [2, 32], strides = [1, 1]} : vector<2x96xf32> to vector<2x32xf32>
    %84 = arith.mulf %80, %83 : vector<2x32xf32>
    %85 = arith.addf %82, %84 : vector<2x32xf32>
    %86 = math.tanh %85 : vector<2x32xf32>
    %cst_24 = arith.constant 1.000000e+00 : f32
    %87 = vector.broadcast %cst_24 : f32 to vector<2x32xf32>
    %88 = arith.subf %87, %81 : vector<2x32xf32>
    %89 = arith.mulf %88, %86 : vector<2x32xf32>
    %90 = arith.mulf %81, %63 : vector<2x32xf32>
    %91 = arith.addf %89, %90 : vector<2x32xf32>
    %c0_25 = arith.constant 0 : index
    %c2 = arith.constant 2 : index
    %c0_26 = arith.constant 0 : index
    %92 = vector.load %arg17[%c0_25, %c2, %c0_26] : memref<2x8x32xf32, #tpu.memory_space<vmem>>, vector<2x1x32xf32>
    %93 = vector.shape_cast %92 : vector<2x1x32xf32> to vector<2x32xf32>
    %94 = vector.shape_cast %91 : vector<2x32xf32> to vector<2x1x32xf32>
    tpu.vector_store %arg17[%c0_25, %c2, %c0_26], %94 {strides = array<i32>} : memref<2x8x32xf32, #tpu.memory_space<vmem>>, vector<2x1x32xf32>,
    %cst_27 = arith.constant dense<0.000000e+00> : vector<2x96xf32>
    %95 = tpu.matmul %91, %1, %cst_27 {dimension_numbers = #tpu.dot_dimension_numbers<[1], [0], [0], [1], [0, 0, 1, 1], [], []>} : vector<2x32xf32>, vector<32x96xf32>, vector<2x96xf32> -> vector<2x96xf32>
    %96 = vector.broadcast %2 : vector<1x96xf32> to vector<2x96xf32>
    %97 = arith.addf %95, %96 : vector<2x96xf32>
    %98 = vector.extract_strided_slice %9 {offsets = [0, 3, 0], sizes = [2, 1, 96], strides = [1, 1, 1]} : vector<2x8x96xf32> to vector<2x1x96xf32>
    %99 = vector.shape_cast %98 : vector<2x1x96xf32> to vector<2x96xf32>
    %100 = vector.extract_strided_slice %99 {offsets = [0, 0], sizes = [2, 64], strides = [1, 1]} : vector<2x96xf32> to vector<2x64xf32>
    %101 = vector.extract_strided_slice %97 {offsets = [0, 0], sizes = [2, 64], strides = [1, 1]} : vector<2x96xf32> to vector<2x64xf32>
    %102 = arith.addf %100, %101 : vector<2x64xf32>
    %103 = arith.negf %102 : vector<2x64xf32>
    %104 = math.exp %103 : vector<2x64xf32>
    %cst_28 = arith.constant 1.000000e+00 : f32
    %105 = vector.broadcast %cst_28 : f32 to vector<2x64xf32>
    %106 = arith.addf %105, %104 : vector<2x64xf32>
    %107 = arith.divf %105, %106 : vector<2x64xf32>
    %108 = vector.extract_strided_slice %107 {offsets = [0, 0], sizes = [2, 32], strides = [1, 1]} : vector<2x64xf32> to vector<2x32xf32>
    %109 = vector.extract_strided_slice %107 {offsets = [0, 32], sizes = [2, 32], strides = [1, 1]} : vector<2x64xf32> to vector<2x32xf32>
    %110 = vector.extract_strided_slice %99 {offsets = [0, 64], sizes = [2, 32], strides = [1, 1]} : vector<2x96xf32> to vector<2x32xf32>
    %111 = vector.extract_strided_slice %97 {offsets = [0, 64], sizes = [2, 32], strides = [1, 1]} : vector<2x96xf32> to vector<2x32xf32>
    %112 = arith.mulf %108, %111 : vector<2x32xf32>
    %113 = arith.addf %110, %112 : vector<2x32xf32>
    %114 = math.tanh %113 : vector<2x32xf32>
    %cst_29 = arith.constant 1.000000e+00 : f32
    %115 = vector.broadcast %cst_29 : f32 to vector<2x32xf32>
    %116 = arith.subf %115, %109 : vector<2x32xf32>
    %117 = arith.mulf %116, %114 : vector<2x32xf32>
    %118 = arith.mulf %109, %91 : vector<2x32xf32>
    %119 = arith.addf %117, %118 : vector<2x32xf32>
    %c0_30 = arith.constant 0 : index
    %c3 = arith.constant 3 : index
    %c0_31 = arith.constant 0 : index
    %120 = vector.load %arg17[%c0_30, %c3, %c0_31] : memref<2x8x32xf32, #tpu.memory_space<vmem>>, vector<2x1x32xf32>
    %121 = vector.shape_cast %120 : vector<2x1x32xf32> to vector<2x32xf32>
    %122 = vector.shape_cast %119 : vector<2x32xf32> to vector<2x1x32xf32>
    tpu.vector_store %arg17[%c0_30, %c3, %c0_31], %122 {strides = array<i32>} : memref<2x8x32xf32, #tpu.memory_space<vmem>>, vector<2x1x32xf32>,
    %cst_32 = arith.constant dense<0.000000e+00> : vector<2x96xf32>
    %123 = tpu.matmul %119, %1, %cst_32 {dimension_numbers = #tpu.dot_dimension_numbers<[1], [0], [0], [1], [0, 0, 1, 1], [], []>} : vector<2x32xf32>, vector<32x96xf32>, vector<2x96xf32> -> vector<2x96xf32>
    %124 = vector.broadcast %2 : vector<1x96xf32> to vector<2x96xf32>
    %125 = arith.addf %123, %124 : vector<2x96xf32>
    %126 = vector.extract_strided_slice %9 {offsets = [0, 4, 0], sizes = [2, 1, 96], strides = [1, 1, 1]} : vector<2x8x96xf32> to vector<2x1x96xf32>
    %127 = vector.shape_cast %126 : vector<2x1x96xf32> to vector<2x96xf32>
    %128 = vector.extract_strided_slice %127 {offsets = [0, 0], sizes = [2, 64], strides = [1, 1]} : vector<2x96xf32> to vector<2x64xf32>
    %129 = vector.extract_strided_slice %125 {offsets = [0, 0], sizes = [2, 64], strides = [1, 1]} : vector<2x96xf32> to vector<2x64xf32>
    %130 = arith.addf %128, %129 : vector<2x64xf32>
    %131 = arith.negf %130 : vector<2x64xf32>
    %132 = math.exp %131 : vector<2x64xf32>
    %cst_33 = arith.constant 1.000000e+00 : f32
    %133 = vector.broadcast %cst_33 : f32 to vector<2x64xf32>
    %134 = arith.addf %133, %132 : vector<2x64xf32>
    %135 = arith.divf %133, %134 : vector<2x64xf32>
    %136 = vector.extract_strided_slice %135 {offsets = [0, 0], sizes = [2, 32], strides = [1, 1]} : vector<2x64xf32> to vector<2x32xf32>
    %137 = vector.extract_strided_slice %135 {offsets = [0, 32], sizes = [2, 32], strides = [1, 1]} : vector<2x64xf32> to vector<2x32xf32>
    %138 = vector.extract_strided_slice %127 {offsets = [0, 64], sizes = [2, 32], strides = [1, 1]} : vector<2x96xf32> to vector<2x32xf32>
    %139 = vector.extract_strided_slice %125 {offsets = [0, 64], sizes = [2, 32], strides = [1, 1]} : vector<2x96xf32> to vector<2x32xf32>
    %140 = arith.mulf %136, %139 : vector<2x32xf32>
    %141 = arith.addf %138, %140 : vector<2x32xf32>
    %142 = math.tanh %141 : vector<2x32xf32>
    %cst_34 = arith.constant 1.000000e+00 : f32
    %143 = vector.broadcast %cst_34 : f32 to vector<2x32xf32>
    %144 = arith.subf %143, %137 : vector<2x32xf32>
    %145 = arith.mulf %144, %142 : vector<2x32xf32>
    %146 = arith.mulf %137, %119 : vector<2x32xf32>
    %147 = arith.addf %145, %146 : vector<2x32xf32>
    %c0_35 = arith.constant 0 : index
    %c4 = arith.constant 4 : index
    %c0_36 = arith.constant 0 : index
    %148 = vector.load %arg17[%c0_35, %c4, %c0_36] : memref<2x8x32xf32, #tpu.memory_space<vmem>>, vector<2x1x32xf32>
    %149 = vector.shape_cast %148 : vector<2x1x32xf32> to vector<2x32xf32>
    %150 = vector.shape_cast %147 : vector<2x32xf32> to vector<2x1x32xf32>
    tpu.vector_store %arg17[%c0_35, %c4, %c0_36], %150 {strides = array<i32>} : memref<2x8x32xf32, #tpu.memory_space<vmem>>, vector<2x1x32xf32>,
    %cst_37 = arith.constant dense<0.000000e+00> : vector<2x96xf32>
    %151 = tpu.matmul %147, %1, %cst_37 {dimension_numbers = #tpu.dot_dimension_numbers<[1], [0], [0], [1], [0, 0, 1, 1], [], []>} : vector<2x32xf32>, vector<32x96xf32>, vector<2x96xf32> -> vector<2x96xf32>
    %152 = vector.broadcast %2 : vector<1x96xf32> to vector<2x96xf32>
    %153 = arith.addf %151, %152 : vector<2x96xf32>
    %154 = vector.extract_strided_slice %9 {offsets = [0, 5, 0], sizes = [2, 1, 96], strides = [1, 1, 1]} : vector<2x8x96xf32> to vector<2x1x96xf32>
    %155 = vector.shape_cast %154 : vector<2x1x96xf32> to vector<2x96xf32>
    %156 = vector.extract_strided_slice %155 {offsets = [0, 0], sizes = [2, 64], strides = [1, 1]} : vector<2x96xf32> to vector<2x64xf32>
    %157 = vector.extract_strided_slice %153 {offsets = [0, 0], sizes = [2, 64], strides = [1, 1]} : vector<2x96xf32> to vector<2x64xf32>
    %158 = arith.addf %156, %157 : vector<2x64xf32>
    %159 = arith.negf %158 : vector<2x64xf32>
    %160 = math.exp %159 : vector<2x64xf32>
    %cst_38 = arith.constant 1.000000e+00 : f32
    %161 = vector.broadcast %cst_38 : f32 to vector<2x64xf32>
    %162 = arith.addf %161, %160 : vector<2x64xf32>
    %163 = arith.divf %161, %162 : vector<2x64xf32>
    %164 = vector.extract_strided_slice %163 {offsets = [0, 0], sizes = [2, 32], strides = [1, 1]} : vector<2x64xf32> to vector<2x32xf32>
    %165 = vector.extract_strided_slice %163 {offsets = [0, 32], sizes = [2, 32], strides = [1, 1]} : vector<2x64xf32> to vector<2x32xf32>
    %166 = vector.extract_strided_slice %155 {offsets = [0, 64], sizes = [2, 32], strides = [1, 1]} : vector<2x96xf32> to vector<2x32xf32>
    %167 = vector.extract_strided_slice %153 {offsets = [0, 64], sizes = [2, 32], strides = [1, 1]} : vector<2x96xf32> to vector<2x32xf32>
    %168 = arith.mulf %164, %167 : vector<2x32xf32>
    %169 = arith.addf %166, %168 : vector<2x32xf32>
    %170 = math.tanh %169 : vector<2x32xf32>
    %cst_39 = arith.constant 1.000000e+00 : f32
    %171 = vector.broadcast %cst_39 : f32 to vector<2x32xf32>
    %172 = arith.subf %171, %165 : vector<2x32xf32>
    %173 = arith.mulf %172, %170 : vector<2x32xf32>
    %174 = arith.mulf %165, %147 : vector<2x32xf32>
    %175 = arith.addf %173, %174 : vector<2x32xf32>
    %c0_40 = arith.constant 0 : index
    %c5 = arith.constant 5 : index
    %c0_41 = arith.constant 0 : index
    %176 = vector.load %arg17[%c0_40, %c5, %c0_41] : memref<2x8x32xf32, #tpu.memory_space<vmem>>, vector<2x1x32xf32>
    %177 = vector.shape_cast %176 : vector<2x1x32xf32> to vector<2x32xf32>
    %178 = vector.shape_cast %175 : vector<2x32xf32> to vector<2x1x32xf32>
    tpu.vector_store %arg17[%c0_40, %c5, %c0_41], %178 {strides = array<i32>} : memref<2x8x32xf32, #tpu.memory_space<vmem>>, vector<2x1x32xf32>,
    %cst_42 = arith.constant dense<0.000000e+00> : vector<2x96xf32>
    %179 = tpu.matmul %175, %1, %cst_42 {dimension_numbers = #tpu.dot_dimension_numbers<[1], [0], [0], [1], [0, 0, 1, 1], [], []>} : vector<2x32xf32>, vector<32x96xf32>, vector<2x96xf32> -> vector<2x96xf32>
    %180 = vector.broadcast %2 : vector<1x96xf32> to vector<2x96xf32>
    %181 = arith.addf %179, %180 : vector<2x96xf32>
    %182 = vector.extract_strided_slice %9 {offsets = [0, 6, 0], sizes = [2, 1, 96], strides = [1, 1, 1]} : vector<2x8x96xf32> to vector<2x1x96xf32>
    %183 = vector.shape_cast %182 : vector<2x1x96xf32> to vector<2x96xf32>
    %184 = vector.extract_strided_slice %183 {offsets = [0, 0], sizes = [2, 64], strides = [1, 1]} : vector<2x96xf32> to vector<2x64xf32>
    %185 = vector.extract_strided_slice %181 {offsets = [0, 0], sizes = [2, 64], strides = [1, 1]} : vector<2x96xf32> to vector<2x64xf32>
    %186 = arith.addf %184, %185 : vector<2x64xf32>
    %187 = arith.negf %186 : vector<2x64xf32>
    %188 = math.exp %187 : vector<2x64xf32>
    %cst_43 = arith.constant 1.000000e+00 : f32
    %189 = vector.broadcast %cst_43 : f32 to vector<2x64xf32>
    %190 = arith.addf %189, %188 : vector<2x64xf32>
    %191 = arith.divf %189, %190 : vector<2x64xf32>
    %192 = vector.extract_strided_slice %191 {offsets = [0, 0], sizes = [2, 32], strides = [1, 1]} : vector<2x64xf32> to vector<2x32xf32>
    %193 = vector.extract_strided_slice %191 {offsets = [0, 32], sizes = [2, 32], strides = [1, 1]} : vector<2x64xf32> to vector<2x32xf32>
    %194 = vector.extract_strided_slice %183 {offsets = [0, 64], sizes = [2, 32], strides = [1, 1]} : vector<2x96xf32> to vector<2x32xf32>
    %195 = vector.extract_strided_slice %181 {offsets = [0, 64], sizes = [2, 32], strides = [1, 1]} : vector<2x96xf32> to vector<2x32xf32>
    %196 = arith.mulf %192, %195 : vector<2x32xf32>
    %197 = arith.addf %194, %196 : vector<2x32xf32>
    %198 = math.tanh %197 : vector<2x32xf32>
    %cst_44 = arith.constant 1.000000e+00 : f32
    %199 = vector.broadcast %cst_44 : f32 to vector<2x32xf32>
    %200 = arith.subf %199, %193 : vector<2x32xf32>
    %201 = arith.mulf %200, %198 : vector<2x32xf32>
    %202 = arith.mulf %193, %175 : vector<2x32xf32>
    %203 = arith.addf %201, %202 : vector<2x32xf32>
    %c0_45 = arith.constant 0 : index
    %c6 = arith.constant 6 : index
    %c0_46 = arith.constant 0 : index
    %204 = vector.load %arg17[%c0_45, %c6, %c0_46] : memref<2x8x32xf32, #tpu.memory_space<vmem>>, vector<2x1x32xf32>
    %205 = vector.shape_cast %204 : vector<2x1x32xf32> to vector<2x32xf32>
    %206 = vector.shape_cast %203 : vector<2x32xf32> to vector<2x1x32xf32>
    tpu.vector_store %arg17[%c0_45, %c6, %c0_46], %206 {strides = array<i32>} : memref<2x8x32xf32, #tpu.memory_space<vmem>>, vector<2x1x32xf32>,
    %cst_47 = arith.constant dense<0.000000e+00> : vector<2x96xf32>
    %207 = tpu.matmul %203, %1, %cst_47 {dimension_numbers = #tpu.dot_dimension_numbers<[1], [0], [0], [1], [0, 0, 1, 1], [], []>} : vector<2x32xf32>, vector<32x96xf32>, vector<2x96xf32> -> vector<2x96xf32>
    %208 = vector.broadcast %2 : vector<1x96xf32> to vector<2x96xf32>
    %209 = arith.addf %207, %208 : vector<2x96xf32>
    %210 = vector.extract_strided_slice %9 {offsets = [0, 7, 0], sizes = [2, 1, 96], strides = [1, 1, 1]} : vector<2x8x96xf32> to vector<2x1x96xf32>
    %211 = vector.shape_cast %210 : vector<2x1x96xf32> to vector<2x96xf32>
    %212 = vector.extract_strided_slice %211 {offsets = [0, 0], sizes = [2, 64], strides = [1, 1]} : vector<2x96xf32> to vector<2x64xf32>
    %213 = vector.extract_strided_slice %209 {offsets = [0, 0], sizes = [2, 64], strides = [1, 1]} : vector<2x96xf32> to vector<2x64xf32>
    %214 = arith.addf %212, %213 : vector<2x64xf32>
    %215 = arith.negf %214 : vector<2x64xf32>
    %216 = math.exp %215 : vector<2x64xf32>
    %cst_48 = arith.constant 1.000000e+00 : f32
    %217 = vector.broadcast %cst_48 : f32 to vector<2x64xf32>
    %218 = arith.addf %217, %216 : vector<2x64xf32>
    %219 = arith.divf %217, %218 : vector<2x64xf32>
    %220 = vector.extract_strided_slice %219 {offsets = [0, 0], sizes = [2, 32], strides = [1, 1]} : vector<2x64xf32> to vector<2x32xf32>
    %221 = vector.extract_strided_slice %219 {offsets = [0, 32], sizes = [2, 32], strides = [1, 1]} : vector<2x64xf32> to vector<2x32xf32>
    %222 = vector.extract_strided_slice %211 {offsets = [0, 64], sizes = [2, 32], strides = [1, 1]} : vector<2x96xf32> to vector<2x32xf32>
    %223 = vector.extract_strided_slice %209 {offsets = [0, 64], sizes = [2, 32], strides = [1, 1]} : vector<2x96xf32> to vector<2x32xf32>
    %224 = arith.mulf %220, %223 : vector<2x32xf32>
    %225 = arith.addf %222, %224 : vector<2x32xf32>
    %226 = math.tanh %225 : vector<2x32xf32>
    %cst_49 = arith.constant 1.000000e+00 : f32
    %227 = vector.broadcast %cst_49 : f32 to vector<2x32xf32>
    %228 = arith.subf %227, %221 : vector<2x32xf32>
    %229 = arith.mulf %228, %226 : vector<2x32xf32>
    %230 = arith.mulf %221, %203 : vector<2x32xf32>
    %231 = arith.addf %229, %230 : vector<2x32xf32>
    %c0_50 = arith.constant 0 : index
    %c7 = arith.constant 7 : index
    %c0_51 = arith.constant 0 : index
    %232 = vector.load %arg17[%c0_50, %c7, %c0_51] : memref<2x8x32xf32, #tpu.memory_space<vmem>>, vector<2x1x32xf32>
    %233 = vector.shape_cast %232 : vector<2x1x32xf32> to vector<2x32xf32>
    %234 = vector.shape_cast %231 : vector<2x32xf32> to vector<2x1x32xf32>
    tpu.vector_store %arg17[%c0_50, %c7, %c0_51], %234 {strides = array<i32>} : memref<2x8x32xf32, #tpu.memory_space<vmem>>, vector<2x1x32xf32>,
    %c0_52 = arith.constant 0 : index
    %c0_53 = arith.constant 0 : index
    %c0_54 = arith.constant 0 : index
    %235 = vector.load %arg17[%c0_52, %c0_53, %c0_54] : memref<2x8x32xf32, #tpu.memory_space<vmem>>, vector<2x8x32xf32>
    %236 = vector.shape_cast %235 : vector<2x8x32xf32> to vector<16x32xf32>
    %c0_55 = arith.constant 0 : index
    %c0_56 = arith.constant 0 : index
    %237 = vector.load %arg8[%c0_55, %c0_56] : memref<32x32xf32, #tpu.memory_space<vmem>>, vector<32x32xf32>
    %cst_57 = arith.constant dense<0.000000e+00> : vector<16x32xf32>
    %238 = tpu.matmul %236, %237, %cst_57 {dimension_numbers = #tpu.dot_dimension_numbers<[1], [0], [0], [1], [0, 0, 1, 1], [], []>} : vector<16x32xf32>, vector<32x32xf32>, vector<16x32xf32> -> vector<16x32xf32>
    %239 = vector.shape_cast %238 : vector<16x32xf32> to vector<2x8x32xf32>
    %c0_58 = arith.constant 0 : index
    %c0_59 = arith.constant 0 : index
    %240 = vector.load %arg7[%c0_58, %c0_59] : memref<32x128xf32, #tpu.memory_space<vmem>>, vector<32x128xf32>
    %c0_60 = arith.constant 0 : index
    %c0_61 = arith.constant 0 : index
    %241 = vector.load %arg9[%c0_60, %c0_61] : memref<1x32xf32, #tpu.memory_space<vmem>>, vector<1x32xf32>
    %c0_62 = arith.constant 0 : index
    %c0_63 = arith.constant 0 : index
    %242 = vector.load %arg10[%c0_62, %c0_63] : memref<4x96xf32, #tpu.memory_space<vmem>>, vector<4x96xf32>
    %c0_64 = arith.constant 0 : index
    %c0_65 = arith.constant 0 : index
    %243 = vector.load %arg11[%c0_64, %c0_65] : memref<32x96xf32, #tpu.memory_space<vmem>>, vector<32x96xf32>
    %c0_66 = arith.constant 0 : index
    %c0_67 = arith.constant 0 : index
    %244 = vector.load %arg12[%c0_66, %c0_67] : memref<1x96xf32, #tpu.memory_space<vmem>>, vector<1x96xf32>
    %c0_68 = arith.constant 0 : index
    %c0_69 = arith.constant 0 : index
    %245 = vector.load %arg13[%c0_68, %c0_69] : memref<1x96xf32, #tpu.memory_space<vmem>>, vector<1x96xf32>
    %c0_70 = arith.constant 0 : index
    %c0_71 = arith.constant 0 : index
    %246 = vector.load %arg14[%c0_70, %c0_71] : memref<68x4xf32, #tpu.memory_space<vmem>>, vector<68x4xf32>
    %c0_72 = arith.constant 0 : index
    %c0_73 = arith.constant 0 : index
    %247 = vector.load %arg15[%c0_72, %c0_73] : memref<1x4xf32, #tpu.memory_space<vmem>>, vector<1x4xf32>
    %c0_74 = arith.constant 0 : index
    %c0_75 = arith.constant 0 : index
    %c0_76 = arith.constant 0 : index
    %248 = vector.load %arg2[%c0_74, %c0_75, %c0_76] : memref<2x8x4xf32, #tpu.memory_space<vmem>>, vector<2x8x4xf32>
    %249 = vector.extract_strided_slice %0 {offsets = [0, 7, 0], sizes = [2, 1, 4], strides = [1, 1, 1]} : vector<2x8x4xf32> to vector<2x1x4xf32>
    %250 = vector.shape_cast %249 : vector<2x1x4xf32> to vector<2x4xf32>
    %cst_77 = arith.constant dense<0.000000e+00> : vector<2x128xf32>
    %251 = tpu.matmul %231, %240, %cst_77 {dimension_numbers = #tpu.dot_dimension_numbers<[1], [0], [0], [1], [0, 0, 1, 1], [], []>} : vector<2x32xf32>, vector<32x128xf32>, vector<2x128xf32> -> vector<2x128xf32>
    %252 = vector.extract_strided_slice %251 {offsets = [0, 0], sizes = [2, 32], strides = [1, 1]} : vector<2x128xf32> to vector<2x32xf32>
    %253 = vector.extract_strided_slice %251 {offsets = [0, 32], sizes = [2, 96], strides = [1, 1]} : vector<2x128xf32> to vector<2x96xf32>
    %254 = vector.broadcast %245 : vector<1x96xf32> to vector<2x96xf32>
    %255 = arith.addf %253, %254 : vector<2x96xf32>
    %256 = vector.shape_cast %252 : vector<2x32xf32> to vector<2x1x32xf32>
    %257 = vector.broadcast %256 : vector<2x1x32xf32> to vector<2x8x32xf32>
    %258 = arith.addf %257, %239 : vector<2x8x32xf32>
    %259 = math.tanh %258 : vector<2x8x32xf32>
    %260 = vector.shape_cast %241 : vector<1x32xf32> to vector<1x1x32xf32>
    %261 = vector.broadcast %260 : vector<1x1x32xf32> to vector<2x8x32xf32>
    %262 = arith.mulf %259, %261 : vector<2x8x32xf32>
    %cst_78 = arith.constant dense<0.000000e+00> : vector<2x8xf32>
    %263 = vector.multi_reduction <add>, %262, %cst_78 [2] : vector<2x8x32xf32> to vector<2x8xf32>
    %264 = math.exp %263 : vector<2x8xf32>
    %cst_79 = arith.constant dense<0.000000e+00> : vector<2xf32>
    %265 = vector.multi_reduction <add>, %264, %cst_79 [1] : vector<2x8xf32> to vector<2xf32>
    %266 = vector.shape_cast %265 : vector<2xf32> to vector<2x1xf32>
    %267 = tpu.reciprocal %266 {approx = true} : vector<2x1xf32> -> vector<2x1xf32>
    %268 = vector.broadcast %267 : vector<2x1xf32> to vector<2x8xf32>
    %269 = arith.mulf %264, %268 : vector<2x8xf32>
    %270 = vector.shape_cast %269 : vector<2x8xf32> to vector<2x8x1xf32>
    %271 = vector.broadcast %270 : vector<2x8x1xf32> to vector<2x8x32xf32>
    %272 = arith.mulf %271, %235 : vector<2x8x32xf32>
    %cst_80 = arith.constant dense<0.000000e+00> : vector<2x32xf32>
    %273 = vector.multi_reduction <add>, %272, %cst_80 [1] : vector<2x8x32xf32> to vector<2x32xf32>
    %cst_81 = arith.constant dense<0.000000e+00> : vector<2x96xf32>
    %274 = tpu.matmul %250, %242, %cst_81 {dimension_numbers = #tpu.dot_dimension_numbers<[1], [0], [0], [1], [0, 0, 1, 1], [], []>} : vector<2x4xf32>, vector<4x96xf32>, vector<2x96xf32> -> vector<2x96xf32>
    %cst_82 = arith.constant dense<0.000000e+00> : vector<2x96xf32>
    %275 = tpu.matmul %273, %243, %cst_82 {dimension_numbers = #tpu.dot_dimension_numbers<[1], [0], [0], [1], [0, 0, 1, 1], [], []>} : vector<2x32xf32>, vector<32x96xf32>, vector<2x96xf32> -> vector<2x96xf32>
    %276 = arith.addf %274, %275 : vector<2x96xf32>
    %277 = vector.broadcast %244 : vector<1x96xf32> to vector<2x96xf32>
    %278 = arith.addf %276, %277 : vector<2x96xf32>
    %279 = vector.extract_strided_slice %278 {offsets = [0, 0], sizes = [2, 64], strides = [1, 1]} : vector<2x96xf32> to vector<2x64xf32>
    %280 = vector.extract_strided_slice %255 {offsets = [0, 0], sizes = [2, 64], strides = [1, 1]} : vector<2x96xf32> to vector<2x64xf32>
    %281 = arith.addf %279, %280 : vector<2x64xf32>
    %282 = arith.negf %281 : vector<2x64xf32>
    %283 = math.exp %282 : vector<2x64xf32>
    %cst_83 = arith.constant 1.000000e+00 : f32
    %284 = vector.broadcast %cst_83 : f32 to vector<2x64xf32>
    %285 = arith.addf %284, %283 : vector<2x64xf32>
    %286 = arith.divf %284, %285 : vector<2x64xf32>
    %287 = vector.extract_strided_slice %286 {offsets = [0, 0], sizes = [2, 32], strides = [1, 1]} : vector<2x64xf32> to vector<2x32xf32>
    %288 = vector.extract_strided_slice %286 {offsets = [0, 32], sizes = [2, 32], strides = [1, 1]} : vector<2x64xf32> to vector<2x32xf32>
    %289 = vector.extract_strided_slice %278 {offsets = [0, 64], sizes = [2, 32], strides = [1, 1]} : vector<2x96xf32> to vector<2x32xf32>
    %290 = vector.extract_strided_slice %255 {offsets = [0, 64], sizes = [2, 32], strides = [1, 1]} : vector<2x96xf32> to vector<2x32xf32>
    %291 = arith.mulf %287, %290 : vector<2x32xf32>
    %292 = arith.addf %289, %291 : vector<2x32xf32>
    %293 = math.tanh %292 : vector<2x32xf32>
    %cst_84 = arith.constant 1.000000e+00 : f32
    %294 = vector.broadcast %cst_84 : f32 to vector<2x32xf32>
    %295 = arith.subf %294, %288 : vector<2x32xf32>
    %296 = arith.mulf %295, %293 : vector<2x32xf32>
    %297 = arith.mulf %288, %231 : vector<2x32xf32>
    %298 = arith.addf %296, %297 : vector<2x32xf32>
    %299 = tpu.concatenate %298, %273, %250 in 1 : vector<2x32xf32>, vector<2x32xf32>, vector<2x4xf32> -> vector<2x68xf32>
    %cst_85 = arith.constant dense<0.000000e+00> : vector<2x4xf32>
    %300 = tpu.matmul %299, %246, %cst_85 {dimension_numbers = #tpu.dot_dimension_numbers<[1], [0], [0], [1], [0, 0, 1, 1], [], []>} : vector<2x68xf32>, vector<68x4xf32>, vector<2x4xf32> -> vector<2x4xf32>
    %301 = vector.broadcast %247 : vector<1x4xf32> to vector<2x4xf32>
    %302 = arith.addf %300, %301 : vector<2x4xf32>
    %c0_86 = arith.constant 0 : index
    %c0_87 = arith.constant 0 : index
    %c0_88 = arith.constant 0 : index
    %303 = vector.load %arg16[%c0_86, %c0_87, %c0_88] : memref<2x8x4xf32, #tpu.memory_space<vmem>>, vector<2x1x4xf32>
    %304 = vector.shape_cast %303 : vector<2x1x4xf32> to vector<2x4xf32>
    %305 = vector.shape_cast %302 : vector<2x4xf32> to vector<2x1x4xf32>
    tpu.vector_store %arg16[%c0_86, %c0_87, %c0_88], %305 {strides = array<i32>} : memref<2x8x4xf32, #tpu.memory_space<vmem>>, vector<2x1x4xf32>,
    %c0_89 = arith.constant 0 : index
    %306 = memref.load %arg0[%c0_89] : memref<8xi32, #tpu.memory_space<smem>>
    %c0_i32 = arith.constant 0 : i32
    %307 = arith.cmpi sgt, %306, %c0_i32 : i32
    %308 = arith.extui %307 : i1 to i32
    %309 = arith.sitofp %308 : i32 to f32
    %310 = vector.extract_strided_slice %248 {offsets = [0, 0, 0], sizes = [2, 1, 4], strides = [1, 1, 1]} : vector<2x8x4xf32> to vector<2x1x4xf32>
    %311 = vector.shape_cast %310 : vector<2x1x4xf32> to vector<2x4xf32>
    %312 = vector.broadcast %309 : f32 to vector<2x4xf32>
    %313 = arith.mulf %312, %311 : vector<2x4xf32>
    %cst_90 = arith.constant 1.000000e+00 : f32
    %314 = arith.subf %cst_90, %309 : f32
    %315 = vector.broadcast %314 : f32 to vector<2x4xf32>
    %316 = arith.mulf %315, %302 : vector<2x4xf32>
    %317 = arith.addf %313, %316 : vector<2x4xf32>
    %cst_91 = arith.constant dense<0.000000e+00> : vector<2x128xf32>
    %318 = tpu.matmul %298, %240, %cst_91 {dimension_numbers = #tpu.dot_dimension_numbers<[1], [0], [0], [1], [0, 0, 1, 1], [], []>} : vector<2x32xf32>, vector<32x128xf32>, vector<2x128xf32> -> vector<2x128xf32>
    %319 = vector.extract_strided_slice %318 {offsets = [0, 0], sizes = [2, 32], strides = [1, 1]} : vector<2x128xf32> to vector<2x32xf32>
    %320 = vector.extract_strided_slice %318 {offsets = [0, 32], sizes = [2, 96], strides = [1, 1]} : vector<2x128xf32> to vector<2x96xf32>
    %321 = vector.broadcast %245 : vector<1x96xf32> to vector<2x96xf32>
    %322 = arith.addf %320, %321 : vector<2x96xf32>
    %323 = vector.shape_cast %319 : vector<2x32xf32> to vector<2x1x32xf32>
    %324 = vector.broadcast %323 : vector<2x1x32xf32> to vector<2x8x32xf32>
    %325 = arith.addf %324, %239 : vector<2x8x32xf32>
    %326 = math.tanh %325 : vector<2x8x32xf32>
    %327 = vector.shape_cast %241 : vector<1x32xf32> to vector<1x1x32xf32>
    %328 = vector.broadcast %327 : vector<1x1x32xf32> to vector<2x8x32xf32>
    %329 = arith.mulf %326, %328 : vector<2x8x32xf32>
    %cst_92 = arith.constant dense<0.000000e+00> : vector<2x8xf32>
    %330 = vector.multi_reduction <add>, %329, %cst_92 [2] : vector<2x8x32xf32> to vector<2x8xf32>
    %331 = math.exp %330 : vector<2x8xf32>
    %cst_93 = arith.constant dense<0.000000e+00> : vector<2xf32>
    %332 = vector.multi_reduction <add>, %331, %cst_93 [1] : vector<2x8xf32> to vector<2xf32>
    %333 = vector.shape_cast %332 : vector<2xf32> to vector<2x1xf32>
    %334 = tpu.reciprocal %333 {approx = true} : vector<2x1xf32> -> vector<2x1xf32>
    %335 = vector.broadcast %334 : vector<2x1xf32> to vector<2x8xf32>
    %336 = arith.mulf %331, %335 : vector<2x8xf32>
    %337 = vector.shape_cast %336 : vector<2x8xf32> to vector<2x8x1xf32>
    %338 = vector.broadcast %337 : vector<2x8x1xf32> to vector<2x8x32xf32>
    %339 = arith.mulf %338, %235 : vector<2x8x32xf32>
    %cst_94 = arith.constant dense<0.000000e+00> : vector<2x32xf32>
    %340 = vector.multi_reduction <add>, %339, %cst_94 [1] : vector<2x8x32xf32> to vector<2x32xf32>
    %cst_95 = arith.constant dense<0.000000e+00> : vector<2x96xf32>
    %341 = tpu.matmul %317, %242, %cst_95 {dimension_numbers = #tpu.dot_dimension_numbers<[1], [0], [0], [1], [0, 0, 1, 1], [], []>} : vector<2x4xf32>, vector<4x96xf32>, vector<2x96xf32> -> vector<2x96xf32>
    %cst_96 = arith.constant dense<0.000000e+00> : vector<2x96xf32>
    %342 = tpu.matmul %340, %243, %cst_96 {dimension_numbers = #tpu.dot_dimension_numbers<[1], [0], [0], [1], [0, 0, 1, 1], [], []>} : vector<2x32xf32>, vector<32x96xf32>, vector<2x96xf32> -> vector<2x96xf32>
    %343 = arith.addf %341, %342 : vector<2x96xf32>
    %344 = vector.broadcast %244 : vector<1x96xf32> to vector<2x96xf32>
    %345 = arith.addf %343, %344 : vector<2x96xf32>
    %346 = vector.extract_strided_slice %345 {offsets = [0, 0], sizes = [2, 64], strides = [1, 1]} : vector<2x96xf32> to vector<2x64xf32>
    %347 = vector.extract_strided_slice %322 {offsets = [0, 0], sizes = [2, 64], strides = [1, 1]} : vector<2x96xf32> to vector<2x64xf32>
    %348 = arith.addf %346, %347 : vector<2x64xf32>
    %349 = arith.negf %348 : vector<2x64xf32>
    %350 = math.exp %349 : vector<2x64xf32>
    %cst_97 = arith.constant 1.000000e+00 : f32
    %351 = vector.broadcast %cst_97 : f32 to vector<2x64xf32>
    %352 = arith.addf %351, %350 : vector<2x64xf32>
    %353 = arith.divf %351, %352 : vector<2x64xf32>
    %354 = vector.extract_strided_slice %353 {offsets = [0, 0], sizes = [2, 32], strides = [1, 1]} : vector<2x64xf32> to vector<2x32xf32>
    %355 = vector.extract_strided_slice %353 {offsets = [0, 32], sizes = [2, 32], strides = [1, 1]} : vector<2x64xf32> to vector<2x32xf32>
    %356 = vector.extract_strided_slice %345 {offsets = [0, 64], sizes = [2, 32], strides = [1, 1]} : vector<2x96xf32> to vector<2x32xf32>
    %357 = vector.extract_strided_slice %322 {offsets = [0, 64], sizes = [2, 32], strides = [1, 1]} : vector<2x96xf32> to vector<2x32xf32>
    %358 = arith.mulf %354, %357 : vector<2x32xf32>
    %359 = arith.addf %356, %358 : vector<2x32xf32>
    %360 = math.tanh %359 : vector<2x32xf32>
    %cst_98 = arith.constant 1.000000e+00 : f32
    %361 = vector.broadcast %cst_98 : f32 to vector<2x32xf32>
    %362 = arith.subf %361, %355 : vector<2x32xf32>
    %363 = arith.mulf %362, %360 : vector<2x32xf32>
    %364 = arith.mulf %355, %298 : vector<2x32xf32>
    %365 = arith.addf %363, %364 : vector<2x32xf32>
    %366 = tpu.concatenate %365, %340, %317 in 1 : vector<2x32xf32>, vector<2x32xf32>, vector<2x4xf32> -> vector<2x68xf32>
    %cst_99 = arith.constant dense<0.000000e+00> : vector<2x4xf32>
    %367 = tpu.matmul %366, %246, %cst_99 {dimension_numbers = #tpu.dot_dimension_numbers<[1], [0], [0], [1], [0, 0, 1, 1], [], []>} : vector<2x68xf32>, vector<68x4xf32>, vector<2x4xf32> -> vector<2x4xf32>
    %368 = vector.broadcast %247 : vector<1x4xf32> to vector<2x4xf32>
    %369 = arith.addf %367, %368 : vector<2x4xf32>
    %c0_100 = arith.constant 0 : index
    %c1_101 = arith.constant 1 : index
    %c0_102 = arith.constant 0 : index
    %370 = vector.load %arg16[%c0_100, %c1_101, %c0_102] : memref<2x8x4xf32, #tpu.memory_space<vmem>>, vector<2x1x4xf32>
    %371 = vector.shape_cast %370 : vector<2x1x4xf32> to vector<2x4xf32>
    %372 = vector.shape_cast %369 : vector<2x4xf32> to vector<2x1x4xf32>
    tpu.vector_store %arg16[%c0_100, %c1_101, %c0_102], %372 {strides = array<i32>} : memref<2x8x4xf32, #tpu.memory_space<vmem>>, vector<2x1x4xf32>,
    %c1_103 = arith.constant 1 : index
    %373 = memref.load %arg0[%c1_103] : memref<8xi32, #tpu.memory_space<smem>>
    %c0_i32_104 = arith.constant 0 : i32
    %374 = arith.cmpi sgt, %373, %c0_i32_104 : i32
    %375 = arith.extui %374 : i1 to i32
    %376 = arith.sitofp %375 : i32 to f32
    %377 = vector.extract_strided_slice %248 {offsets = [0, 1, 0], sizes = [2, 1, 4], strides = [1, 1, 1]} : vector<2x8x4xf32> to vector<2x1x4xf32>
    %378 = vector.shape_cast %377 : vector<2x1x4xf32> to vector<2x4xf32>
    %379 = vector.broadcast %376 : f32 to vector<2x4xf32>
    %380 = arith.mulf %379, %378 : vector<2x4xf32>
    %cst_105 = arith.constant 1.000000e+00 : f32
    %381 = arith.subf %cst_105, %376 : f32
    %382 = vector.broadcast %381 : f32 to vector<2x4xf32>
    %383 = arith.mulf %382, %369 : vector<2x4xf32>
    %384 = arith.addf %380, %383 : vector<2x4xf32>
    %cst_106 = arith.constant dense<0.000000e+00> : vector<2x128xf32>
    %385 = tpu.matmul %365, %240, %cst_106 {dimension_numbers = #tpu.dot_dimension_numbers<[1], [0], [0], [1], [0, 0, 1, 1], [], []>} : vector<2x32xf32>, vector<32x128xf32>, vector<2x128xf32> -> vector<2x128xf32>
    %386 = vector.extract_strided_slice %385 {offsets = [0, 0], sizes = [2, 32], strides = [1, 1]} : vector<2x128xf32> to vector<2x32xf32>
    %387 = vector.extract_strided_slice %385 {offsets = [0, 32], sizes = [2, 96], strides = [1, 1]} : vector<2x128xf32> to vector<2x96xf32>
    %388 = vector.broadcast %245 : vector<1x96xf32> to vector<2x96xf32>
    %389 = arith.addf %387, %388 : vector<2x96xf32>
    %390 = vector.shape_cast %386 : vector<2x32xf32> to vector<2x1x32xf32>
    %391 = vector.broadcast %390 : vector<2x1x32xf32> to vector<2x8x32xf32>
    %392 = arith.addf %391, %239 : vector<2x8x32xf32>
    %393 = math.tanh %392 : vector<2x8x32xf32>
    %394 = vector.shape_cast %241 : vector<1x32xf32> to vector<1x1x32xf32>
    %395 = vector.broadcast %394 : vector<1x1x32xf32> to vector<2x8x32xf32>
    %396 = arith.mulf %393, %395 : vector<2x8x32xf32>
    %cst_107 = arith.constant dense<0.000000e+00> : vector<2x8xf32>
    %397 = vector.multi_reduction <add>, %396, %cst_107 [2] : vector<2x8x32xf32> to vector<2x8xf32>
    %398 = math.exp %397 : vector<2x8xf32>
    %cst_108 = arith.constant dense<0.000000e+00> : vector<2xf32>
    %399 = vector.multi_reduction <add>, %398, %cst_108 [1] : vector<2x8xf32> to vector<2xf32>
    %400 = vector.shape_cast %399 : vector<2xf32> to vector<2x1xf32>
    %401 = tpu.reciprocal %400 {approx = true} : vector<2x1xf32> -> vector<2x1xf32>
    %402 = vector.broadcast %401 : vector<2x1xf32> to vector<2x8xf32>
    %403 = arith.mulf %398, %402 : vector<2x8xf32>
    %404 = vector.shape_cast %403 : vector<2x8xf32> to vector<2x8x1xf32>
    %405 = vector.broadcast %404 : vector<2x8x1xf32> to vector<2x8x32xf32>
    %406 = arith.mulf %405, %235 : vector<2x8x32xf32>
    %cst_109 = arith.constant dense<0.000000e+00> : vector<2x32xf32>
    %407 = vector.multi_reduction <add>, %406, %cst_109 [1] : vector<2x8x32xf32> to vector<2x32xf32>
    %cst_110 = arith.constant dense<0.000000e+00> : vector<2x96xf32>
    %408 = tpu.matmul %384, %242, %cst_110 {dimension_numbers = #tpu.dot_dimension_numbers<[1], [0], [0], [1], [0, 0, 1, 1], [], []>} : vector<2x4xf32>, vector<4x96xf32>, vector<2x96xf32> -> vector<2x96xf32>
    %cst_111 = arith.constant dense<0.000000e+00> : vector<2x96xf32>
    %409 = tpu.matmul %407, %243, %cst_111 {dimension_numbers = #tpu.dot_dimension_numbers<[1], [0], [0], [1], [0, 0, 1, 1], [], []>} : vector<2x32xf32>, vector<32x96xf32>, vector<2x96xf32> -> vector<2x96xf32>
    %410 = arith.addf %408, %409 : vector<2x96xf32>
    %411 = vector.broadcast %244 : vector<1x96xf32> to vector<2x96xf32>
    %412 = arith.addf %410, %411 : vector<2x96xf32>
    %413 = vector.extract_strided_slice %412 {offsets = [0, 0], sizes = [2, 64], strides = [1, 1]} : vector<2x96xf32> to vector<2x64xf32>
    %414 = vector.extract_strided_slice %389 {offsets = [0, 0], sizes = [2, 64], strides = [1, 1]} : vector<2x96xf32> to vector<2x64xf32>
    %415 = arith.addf %413, %414 : vector<2x64xf32>
    %416 = arith.negf %415 : vector<2x64xf32>
    %417 = math.exp %416 : vector<2x64xf32>
    %cst_112 = arith.constant 1.000000e+00 : f32
    %418 = vector.broadcast %cst_112 : f32 to vector<2x64xf32>
    %419 = arith.addf %418, %417 : vector<2x64xf32>
    %420 = arith.divf %418, %419 : vector<2x64xf32>
    %421 = vector.extract_strided_slice %420 {offsets = [0, 0], sizes = [2, 32], strides = [1, 1]} : vector<2x64xf32> to vector<2x32xf32>
    %422 = vector.extract_strided_slice %420 {offsets = [0, 32], sizes = [2, 32], strides = [1, 1]} : vector<2x64xf32> to vector<2x32xf32>
    %423 = vector.extract_strided_slice %412 {offsets = [0, 64], sizes = [2, 32], strides = [1, 1]} : vector<2x96xf32> to vector<2x32xf32>
    %424 = vector.extract_strided_slice %389 {offsets = [0, 64], sizes = [2, 32], strides = [1, 1]} : vector<2x96xf32> to vector<2x32xf32>
    %425 = arith.mulf %421, %424 : vector<2x32xf32>
    %426 = arith.addf %423, %425 : vector<2x32xf32>
    %427 = math.tanh %426 : vector<2x32xf32>
    %cst_113 = arith.constant 1.000000e+00 : f32
    %428 = vector.broadcast %cst_113 : f32 to vector<2x32xf32>
    %429 = arith.subf %428, %422 : vector<2x32xf32>
    %430 = arith.mulf %429, %427 : vector<2x32xf32>
    %431 = arith.mulf %422, %365 : vector<2x32xf32>
    %432 = arith.addf %430, %431 : vector<2x32xf32>
    %433 = tpu.concatenate %432, %407, %384 in 1 : vector<2x32xf32>, vector<2x32xf32>, vector<2x4xf32> -> vector<2x68xf32>
    %cst_114 = arith.constant dense<0.000000e+00> : vector<2x4xf32>
    %434 = tpu.matmul %433, %246, %cst_114 {dimension_numbers = #tpu.dot_dimension_numbers<[1], [0], [0], [1], [0, 0, 1, 1], [], []>} : vector<2x68xf32>, vector<68x4xf32>, vector<2x4xf32> -> vector<2x4xf32>
    %435 = vector.broadcast %247 : vector<1x4xf32> to vector<2x4xf32>
    %436 = arith.addf %434, %435 : vector<2x4xf32>
    %c0_115 = arith.constant 0 : index
    %c2_116 = arith.constant 2 : index
    %c0_117 = arith.constant 0 : index
    %437 = vector.load %arg16[%c0_115, %c2_116, %c0_117] : memref<2x8x4xf32, #tpu.memory_space<vmem>>, vector<2x1x4xf32>
    %438 = vector.shape_cast %437 : vector<2x1x4xf32> to vector<2x4xf32>
    %439 = vector.shape_cast %436 : vector<2x4xf32> to vector<2x1x4xf32>
    tpu.vector_store %arg16[%c0_115, %c2_116, %c0_117], %439 {strides = array<i32>} : memref<2x8x4xf32, #tpu.memory_space<vmem>>, vector<2x1x4xf32>,
    %c2_118 = arith.constant 2 : index
    %440 = memref.load %arg0[%c2_118] : memref<8xi32, #tpu.memory_space<smem>>
    %c0_i32_119 = arith.constant 0 : i32
    %441 = arith.cmpi sgt, %440, %c0_i32_119 : i32
    %442 = arith.extui %441 : i1 to i32
    %443 = arith.sitofp %442 : i32 to f32
    %444 = vector.extract_strided_slice %248 {offsets = [0, 2, 0], sizes = [2, 1, 4], strides = [1, 1, 1]} : vector<2x8x4xf32> to vector<2x1x4xf32>
    %445 = vector.shape_cast %444 : vector<2x1x4xf32> to vector<2x4xf32>
    %446 = vector.broadcast %443 : f32 to vector<2x4xf32>
    %447 = arith.mulf %446, %445 : vector<2x4xf32>
    %cst_120 = arith.constant 1.000000e+00 : f32
    %448 = arith.subf %cst_120, %443 : f32
    %449 = vector.broadcast %448 : f32 to vector<2x4xf32>
    %450 = arith.mulf %449, %436 : vector<2x4xf32>
    %451 = arith.addf %447, %450 : vector<2x4xf32>
    %cst_121 = arith.constant dense<0.000000e+00> : vector<2x128xf32>
    %452 = tpu.matmul %432, %240, %cst_121 {dimension_numbers = #tpu.dot_dimension_numbers<[1], [0], [0], [1], [0, 0, 1, 1], [], []>} : vector<2x32xf32>, vector<32x128xf32>, vector<2x128xf32> -> vector<2x128xf32>
    %453 = vector.extract_strided_slice %452 {offsets = [0, 0], sizes = [2, 32], strides = [1, 1]} : vector<2x128xf32> to vector<2x32xf32>
    %454 = vector.extract_strided_slice %452 {offsets = [0, 32], sizes = [2, 96], strides = [1, 1]} : vector<2x128xf32> to vector<2x96xf32>
    %455 = vector.broadcast %245 : vector<1x96xf32> to vector<2x96xf32>
    %456 = arith.addf %454, %455 : vector<2x96xf32>
    %457 = vector.shape_cast %453 : vector<2x32xf32> to vector<2x1x32xf32>
    %458 = vector.broadcast %457 : vector<2x1x32xf32> to vector<2x8x32xf32>
    %459 = arith.addf %458, %239 : vector<2x8x32xf32>
    %460 = math.tanh %459 : vector<2x8x32xf32>
    %461 = vector.shape_cast %241 : vector<1x32xf32> to vector<1x1x32xf32>
    %462 = vector.broadcast %461 : vector<1x1x32xf32> to vector<2x8x32xf32>
    %463 = arith.mulf %460, %462 : vector<2x8x32xf32>
    %cst_122 = arith.constant dense<0.000000e+00> : vector<2x8xf32>
    %464 = vector.multi_reduction <add>, %463, %cst_122 [2] : vector<2x8x32xf32> to vector<2x8xf32>
    %465 = math.exp %464 : vector<2x8xf32>
    %cst_123 = arith.constant dense<0.000000e+00> : vector<2xf32>
    %466 = vector.multi_reduction <add>, %465, %cst_123 [1] : vector<2x8xf32> to vector<2xf32>
    %467 = vector.shape_cast %466 : vector<2xf32> to vector<2x1xf32>
    %468 = tpu.reciprocal %467 {approx = true} : vector<2x1xf32> -> vector<2x1xf32>
    %469 = vector.broadcast %468 : vector<2x1xf32> to vector<2x8xf32>
    %470 = arith.mulf %465, %469 : vector<2x8xf32>
    %471 = vector.shape_cast %470 : vector<2x8xf32> to vector<2x8x1xf32>
    %472 = vector.broadcast %471 : vector<2x8x1xf32> to vector<2x8x32xf32>
    %473 = arith.mulf %472, %235 : vector<2x8x32xf32>
    %cst_124 = arith.constant dense<0.000000e+00> : vector<2x32xf32>
    %474 = vector.multi_reduction <add>, %473, %cst_124 [1] : vector<2x8x32xf32> to vector<2x32xf32>
    %cst_125 = arith.constant dense<0.000000e+00> : vector<2x96xf32>
    %475 = tpu.matmul %451, %242, %cst_125 {dimension_numbers = #tpu.dot_dimension_numbers<[1], [0], [0], [1], [0, 0, 1, 1], [], []>} : vector<2x4xf32>, vector<4x96xf32>, vector<2x96xf32> -> vector<2x96xf32>
    %cst_126 = arith.constant dense<0.000000e+00> : vector<2x96xf32>
    %476 = tpu.matmul %474, %243, %cst_126 {dimension_numbers = #tpu.dot_dimension_numbers<[1], [0], [0], [1], [0, 0, 1, 1], [], []>} : vector<2x32xf32>, vector<32x96xf32>, vector<2x96xf32> -> vector<2x96xf32>
    %477 = arith.addf %475, %476 : vector<2x96xf32>
    %478 = vector.broadcast %244 : vector<1x96xf32> to vector<2x96xf32>
    %479 = arith.addf %477, %478 : vector<2x96xf32>
    %480 = vector.extract_strided_slice %479 {offsets = [0, 0], sizes = [2, 64], strides = [1, 1]} : vector<2x96xf32> to vector<2x64xf32>
    %481 = vector.extract_strided_slice %456 {offsets = [0, 0], sizes = [2, 64], strides = [1, 1]} : vector<2x96xf32> to vector<2x64xf32>
    %482 = arith.addf %480, %481 : vector<2x64xf32>
    %483 = arith.negf %482 : vector<2x64xf32>
    %484 = math.exp %483 : vector<2x64xf32>
    %cst_127 = arith.constant 1.000000e+00 : f32
    %485 = vector.broadcast %cst_127 : f32 to vector<2x64xf32>
    %486 = arith.addf %485, %484 : vector<2x64xf32>
    %487 = arith.divf %485, %486 : vector<2x64xf32>
    %488 = vector.extract_strided_slice %487 {offsets = [0, 0], sizes = [2, 32], strides = [1, 1]} : vector<2x64xf32> to vector<2x32xf32>
    %489 = vector.extract_strided_slice %487 {offsets = [0, 32], sizes = [2, 32], strides = [1, 1]} : vector<2x64xf32> to vector<2x32xf32>
    %490 = vector.extract_strided_slice %479 {offsets = [0, 64], sizes = [2, 32], strides = [1, 1]} : vector<2x96xf32> to vector<2x32xf32>
    %491 = vector.extract_strided_slice %456 {offsets = [0, 64], sizes = [2, 32], strides = [1, 1]} : vector<2x96xf32> to vector<2x32xf32>
    %492 = arith.mulf %488, %491 : vector<2x32xf32>
    %493 = arith.addf %490, %492 : vector<2x32xf32>
    %494 = math.tanh %493 : vector<2x32xf32>
    %cst_128 = arith.constant 1.000000e+00 : f32
    %495 = vector.broadcast %cst_128 : f32 to vector<2x32xf32>
    %496 = arith.subf %495, %489 : vector<2x32xf32>
    %497 = arith.mulf %496, %494 : vector<2x32xf32>
    %498 = arith.mulf %489, %432 : vector<2x32xf32>
    %499 = arith.addf %497, %498 : vector<2x32xf32>
    %500 = tpu.concatenate %499, %474, %451 in 1 : vector<2x32xf32>, vector<2x32xf32>, vector<2x4xf32> -> vector<2x68xf32>
    %cst_129 = arith.constant dense<0.000000e+00> : vector<2x4xf32>
    %501 = tpu.matmul %500, %246, %cst_129 {dimension_numbers = #tpu.dot_dimension_numbers<[1], [0], [0], [1], [0, 0, 1, 1], [], []>} : vector<2x68xf32>, vector<68x4xf32>, vector<2x4xf32> -> vector<2x4xf32>
    %502 = vector.broadcast %247 : vector<1x4xf32> to vector<2x4xf32>
    %503 = arith.addf %501, %502 : vector<2x4xf32>
    %c0_130 = arith.constant 0 : index
    %c3_131 = arith.constant 3 : index
    %c0_132 = arith.constant 0 : index
    %504 = vector.load %arg16[%c0_130, %c3_131, %c0_132] : memref<2x8x4xf32, #tpu.memory_space<vmem>>, vector<2x1x4xf32>
    %505 = vector.shape_cast %504 : vector<2x1x4xf32> to vector<2x4xf32>
    %506 = vector.shape_cast %503 : vector<2x4xf32> to vector<2x1x4xf32>
    tpu.vector_store %arg16[%c0_130, %c3_131, %c0_132], %506 {strides = array<i32>} : memref<2x8x4xf32, #tpu.memory_space<vmem>>, vector<2x1x4xf32>,
    %c3_133 = arith.constant 3 : index
    %507 = memref.load %arg0[%c3_133] : memref<8xi32, #tpu.memory_space<smem>>
    %c0_i32_134 = arith.constant 0 : i32
    %508 = arith.cmpi sgt, %507, %c0_i32_134 : i32
    %509 = arith.extui %508 : i1 to i32
    %510 = arith.sitofp %509 : i32 to f32
    %511 = vector.extract_strided_slice %248 {offsets = [0, 3, 0], sizes = [2, 1, 4], strides = [1, 1, 1]} : vector<2x8x4xf32> to vector<2x1x4xf32>
    %512 = vector.shape_cast %511 : vector<2x1x4xf32> to vector<2x4xf32>
    %513 = vector.broadcast %510 : f32 to vector<2x4xf32>
    %514 = arith.mulf %513, %512 : vector<2x4xf32>
    %cst_135 = arith.constant 1.000000e+00 : f32
    %515 = arith.subf %cst_135, %510 : f32
    %516 = vector.broadcast %515 : f32 to vector<2x4xf32>
    %517 = arith.mulf %516, %503 : vector<2x4xf32>
    %518 = arith.addf %514, %517 : vector<2x4xf32>
    %cst_136 = arith.constant dense<0.000000e+00> : vector<2x128xf32>
    %519 = tpu.matmul %499, %240, %cst_136 {dimension_numbers = #tpu.dot_dimension_numbers<[1], [0], [0], [1], [0, 0, 1, 1], [], []>} : vector<2x32xf32>, vector<32x128xf32>, vector<2x128xf32> -> vector<2x128xf32>
    %520 = vector.extract_strided_slice %519 {offsets = [0, 0], sizes = [2, 32], strides = [1, 1]} : vector<2x128xf32> to vector<2x32xf32>
    %521 = vector.extract_strided_slice %519 {offsets = [0, 32], sizes = [2, 96], strides = [1, 1]} : vector<2x128xf32> to vector<2x96xf32>
    %522 = vector.broadcast %245 : vector<1x96xf32> to vector<2x96xf32>
    %523 = arith.addf %521, %522 : vector<2x96xf32>
    %524 = vector.shape_cast %520 : vector<2x32xf32> to vector<2x1x32xf32>
    %525 = vector.broadcast %524 : vector<2x1x32xf32> to vector<2x8x32xf32>
    %526 = arith.addf %525, %239 : vector<2x8x32xf32>
    %527 = math.tanh %526 : vector<2x8x32xf32>
    %528 = vector.shape_cast %241 : vector<1x32xf32> to vector<1x1x32xf32>
    %529 = vector.broadcast %528 : vector<1x1x32xf32> to vector<2x8x32xf32>
    %530 = arith.mulf %527, %529 : vector<2x8x32xf32>
    %cst_137 = arith.constant dense<0.000000e+00> : vector<2x8xf32>
    %531 = vector.multi_reduction <add>, %530, %cst_137 [2] : vector<2x8x32xf32> to vector<2x8xf32>
    %532 = math.exp %531 : vector<2x8xf32>
    %cst_138 = arith.constant dense<0.000000e+00> : vector<2xf32>
    %533 = vector.multi_reduction <add>, %532, %cst_138 [1] : vector<2x8xf32> to vector<2xf32>
    %534 = vector.shape_cast %533 : vector<2xf32> to vector<2x1xf32>
    %535 = tpu.reciprocal %534 {approx = true} : vector<2x1xf32> -> vector<2x1xf32>
    %536 = vector.broadcast %535 : vector<2x1xf32> to vector<2x8xf32>
    %537 = arith.mulf %532, %536 : vector<2x8xf32>
    %538 = vector.shape_cast %537 : vector<2x8xf32> to vector<2x8x1xf32>
    %539 = vector.broadcast %538 : vector<2x8x1xf32> to vector<2x8x32xf32>
    %540 = arith.mulf %539, %235 : vector<2x8x32xf32>
    %cst_139 = arith.constant dense<0.000000e+00> : vector<2x32xf32>
    %541 = vector.multi_reduction <add>, %540, %cst_139 [1] : vector<2x8x32xf32> to vector<2x32xf32>
    %cst_140 = arith.constant dense<0.000000e+00> : vector<2x96xf32>
    %542 = tpu.matmul %518, %242, %cst_140 {dimension_numbers = #tpu.dot_dimension_numbers<[1], [0], [0], [1], [0, 0, 1, 1], [], []>} : vector<2x4xf32>, vector<4x96xf32>, vector<2x96xf32> -> vector<2x96xf32>
    %cst_141 = arith.constant dense<0.000000e+00> : vector<2x96xf32>
    %543 = tpu.matmul %541, %243, %cst_141 {dimension_numbers = #tpu.dot_dimension_numbers<[1], [0], [0], [1], [0, 0, 1, 1], [], []>} : vector<2x32xf32>, vector<32x96xf32>, vector<2x96xf32> -> vector<2x96xf32>
    %544 = arith.addf %542, %543 : vector<2x96xf32>
    %545 = vector.broadcast %244 : vector<1x96xf32> to vector<2x96xf32>
    %546 = arith.addf %544, %545 : vector<2x96xf32>
    %547 = vector.extract_strided_slice %546 {offsets = [0, 0], sizes = [2, 64], strides = [1, 1]} : vector<2x96xf32> to vector<2x64xf32>
    %548 = vector.extract_strided_slice %523 {offsets = [0, 0], sizes = [2, 64], strides = [1, 1]} : vector<2x96xf32> to vector<2x64xf32>
    %549 = arith.addf %547, %548 : vector<2x64xf32>
    %550 = arith.negf %549 : vector<2x64xf32>
    %551 = math.exp %550 : vector<2x64xf32>
    %cst_142 = arith.constant 1.000000e+00 : f32
    %552 = vector.broadcast %cst_142 : f32 to vector<2x64xf32>
    %553 = arith.addf %552, %551 : vector<2x64xf32>
    %554 = arith.divf %552, %553 : vector<2x64xf32>
    %555 = vector.extract_strided_slice %554 {offsets = [0, 0], sizes = [2, 32], strides = [1, 1]} : vector<2x64xf32> to vector<2x32xf32>
    %556 = vector.extract_strided_slice %554 {offsets = [0, 32], sizes = [2, 32], strides = [1, 1]} : vector<2x64xf32> to vector<2x32xf32>
    %557 = vector.extract_strided_slice %546 {offsets = [0, 64], sizes = [2, 32], strides = [1, 1]} : vector<2x96xf32> to vector<2x32xf32>
    %558 = vector.extract_strided_slice %523 {offsets = [0, 64], sizes = [2, 32], strides = [1, 1]} : vector<2x96xf32> to vector<2x32xf32>
    %559 = arith.mulf %555, %558 : vector<2x32xf32>
    %560 = arith.addf %557, %559 : vector<2x32xf32>
    %561 = math.tanh %560 : vector<2x32xf32>
    %cst_143 = arith.constant 1.000000e+00 : f32
    %562 = vector.broadcast %cst_143 : f32 to vector<2x32xf32>
    %563 = arith.subf %562, %556 : vector<2x32xf32>
    %564 = arith.mulf %563, %561 : vector<2x32xf32>
    %565 = arith.mulf %556, %499 : vector<2x32xf32>
    %566 = arith.addf %564, %565 : vector<2x32xf32>
    %567 = tpu.concatenate %566, %541, %518 in 1 : vector<2x32xf32>, vector<2x32xf32>, vector<2x4xf32> -> vector<2x68xf32>
    %cst_144 = arith.constant dense<0.000000e+00> : vector<2x4xf32>
    %568 = tpu.matmul %567, %246, %cst_144 {dimension_numbers = #tpu.dot_dimension_numbers<[1], [0], [0], [1], [0, 0, 1, 1], [], []>} : vector<2x68xf32>, vector<68x4xf32>, vector<2x4xf32> -> vector<2x4xf32>
    %569 = vector.broadcast %247 : vector<1x4xf32> to vector<2x4xf32>
    %570 = arith.addf %568, %569 : vector<2x4xf32>
    %c0_145 = arith.constant 0 : index
    %c4_146 = arith.constant 4 : index
    %c0_147 = arith.constant 0 : index
    %571 = vector.load %arg16[%c0_145, %c4_146, %c0_147] : memref<2x8x4xf32, #tpu.memory_space<vmem>>, vector<2x1x4xf32>
    %572 = vector.shape_cast %571 : vector<2x1x4xf32> to vector<2x4xf32>
    %573 = vector.shape_cast %570 : vector<2x4xf32> to vector<2x1x4xf32>
    tpu.vector_store %arg16[%c0_145, %c4_146, %c0_147], %573 {strides = array<i32>} : memref<2x8x4xf32, #tpu.memory_space<vmem>>, vector<2x1x4xf32>,
    %c4_148 = arith.constant 4 : index
    %574 = memref.load %arg0[%c4_148] : memref<8xi32, #tpu.memory_space<smem>>
    %c0_i32_149 = arith.constant 0 : i32
    %575 = arith.cmpi sgt, %574, %c0_i32_149 : i32
    %576 = arith.extui %575 : i1 to i32
    %577 = arith.sitofp %576 : i32 to f32
    %578 = vector.extract_strided_slice %248 {offsets = [0, 4, 0], sizes = [2, 1, 4], strides = [1, 1, 1]} : vector<2x8x4xf32> to vector<2x1x4xf32>
    %579 = vector.shape_cast %578 : vector<2x1x4xf32> to vector<2x4xf32>
    %580 = vector.broadcast %577 : f32 to vector<2x4xf32>
    %581 = arith.mulf %580, %579 : vector<2x4xf32>
    %cst_150 = arith.constant 1.000000e+00 : f32
    %582 = arith.subf %cst_150, %577 : f32
    %583 = vector.broadcast %582 : f32 to vector<2x4xf32>
    %584 = arith.mulf %583, %570 : vector<2x4xf32>
    %585 = arith.addf %581, %584 : vector<2x4xf32>
    %cst_151 = arith.constant dense<0.000000e+00> : vector<2x128xf32>
    %586 = tpu.matmul %566, %240, %cst_151 {dimension_numbers = #tpu.dot_dimension_numbers<[1], [0], [0], [1], [0, 0, 1, 1], [], []>} : vector<2x32xf32>, vector<32x128xf32>, vector<2x128xf32> -> vector<2x128xf32>
    %587 = vector.extract_strided_slice %586 {offsets = [0, 0], sizes = [2, 32], strides = [1, 1]} : vector<2x128xf32> to vector<2x32xf32>
    %588 = vector.extract_strided_slice %586 {offsets = [0, 32], sizes = [2, 96], strides = [1, 1]} : vector<2x128xf32> to vector<2x96xf32>
    %589 = vector.broadcast %245 : vector<1x96xf32> to vector<2x96xf32>
    %590 = arith.addf %588, %589 : vector<2x96xf32>
    %591 = vector.shape_cast %587 : vector<2x32xf32> to vector<2x1x32xf32>
    %592 = vector.broadcast %591 : vector<2x1x32xf32> to vector<2x8x32xf32>
    %593 = arith.addf %592, %239 : vector<2x8x32xf32>
    %594 = math.tanh %593 : vector<2x8x32xf32>
    %595 = vector.shape_cast %241 : vector<1x32xf32> to vector<1x1x32xf32>
    %596 = vector.broadcast %595 : vector<1x1x32xf32> to vector<2x8x32xf32>
    %597 = arith.mulf %594, %596 : vector<2x8x32xf32>
    %cst_152 = arith.constant dense<0.000000e+00> : vector<2x8xf32>
    %598 = vector.multi_reduction <add>, %597, %cst_152 [2] : vector<2x8x32xf32> to vector<2x8xf32>
    %599 = math.exp %598 : vector<2x8xf32>
    %cst_153 = arith.constant dense<0.000000e+00> : vector<2xf32>
    %600 = vector.multi_reduction <add>, %599, %cst_153 [1] : vector<2x8xf32> to vector<2xf32>
    %601 = vector.shape_cast %600 : vector<2xf32> to vector<2x1xf32>
    %602 = tpu.reciprocal %601 {approx = true} : vector<2x1xf32> -> vector<2x1xf32>
    %603 = vector.broadcast %602 : vector<2x1xf32> to vector<2x8xf32>
    %604 = arith.mulf %599, %603 : vector<2x8xf32>
    %605 = vector.shape_cast %604 : vector<2x8xf32> to vector<2x8x1xf32>
    %606 = vector.broadcast %605 : vector<2x8x1xf32> to vector<2x8x32xf32>
    %607 = arith.mulf %606, %235 : vector<2x8x32xf32>
    %cst_154 = arith.constant dense<0.000000e+00> : vector<2x32xf32>
    %608 = vector.multi_reduction <add>, %607, %cst_154 [1] : vector<2x8x32xf32> to vector<2x32xf32>
    %cst_155 = arith.constant dense<0.000000e+00> : vector<2x96xf32>
    %609 = tpu.matmul %585, %242, %cst_155 {dimension_numbers = #tpu.dot_dimension_numbers<[1], [0], [0], [1], [0, 0, 1, 1], [], []>} : vector<2x4xf32>, vector<4x96xf32>, vector<2x96xf32> -> vector<2x96xf32>
    %cst_156 = arith.constant dense<0.000000e+00> : vector<2x96xf32>
    %610 = tpu.matmul %608, %243, %cst_156 {dimension_numbers = #tpu.dot_dimension_numbers<[1], [0], [0], [1], [0, 0, 1, 1], [], []>} : vector<2x32xf32>, vector<32x96xf32>, vector<2x96xf32> -> vector<2x96xf32>
    %611 = arith.addf %609, %610 : vector<2x96xf32>
    %612 = vector.broadcast %244 : vector<1x96xf32> to vector<2x96xf32>
    %613 = arith.addf %611, %612 : vector<2x96xf32>
    %614 = vector.extract_strided_slice %613 {offsets = [0, 0], sizes = [2, 64], strides = [1, 1]} : vector<2x96xf32> to vector<2x64xf32>
    %615 = vector.extract_strided_slice %590 {offsets = [0, 0], sizes = [2, 64], strides = [1, 1]} : vector<2x96xf32> to vector<2x64xf32>
    %616 = arith.addf %614, %615 : vector<2x64xf32>
    %617 = arith.negf %616 : vector<2x64xf32>
    %618 = math.exp %617 : vector<2x64xf32>
    %cst_157 = arith.constant 1.000000e+00 : f32
    %619 = vector.broadcast %cst_157 : f32 to vector<2x64xf32>
    %620 = arith.addf %619, %618 : vector<2x64xf32>
    %621 = arith.divf %619, %620 : vector<2x64xf32>
    %622 = vector.extract_strided_slice %621 {offsets = [0, 0], sizes = [2, 32], strides = [1, 1]} : vector<2x64xf32> to vector<2x32xf32>
    %623 = vector.extract_strided_slice %621 {offsets = [0, 32], sizes = [2, 32], strides = [1, 1]} : vector<2x64xf32> to vector<2x32xf32>
    %624 = vector.extract_strided_slice %613 {offsets = [0, 64], sizes = [2, 32], strides = [1, 1]} : vector<2x96xf32> to vector<2x32xf32>
    %625 = vector.extract_strided_slice %590 {offsets = [0, 64], sizes = [2, 32], strides = [1, 1]} : vector<2x96xf32> to vector<2x32xf32>
    %626 = arith.mulf %622, %625 : vector<2x32xf32>
    %627 = arith.addf %624, %626 : vector<2x32xf32>
    %628 = math.tanh %627 : vector<2x32xf32>
    %cst_158 = arith.constant 1.000000e+00 : f32
    %629 = vector.broadcast %cst_158 : f32 to vector<2x32xf32>
    %630 = arith.subf %629, %623 : vector<2x32xf32>
    %631 = arith.mulf %630, %628 : vector<2x32xf32>
    %632 = arith.mulf %623, %566 : vector<2x32xf32>
    %633 = arith.addf %631, %632 : vector<2x32xf32>
    %634 = tpu.concatenate %633, %608, %585 in 1 : vector<2x32xf32>, vector<2x32xf32>, vector<2x4xf32> -> vector<2x68xf32>
    %cst_159 = arith.constant dense<0.000000e+00> : vector<2x4xf32>
    %635 = tpu.matmul %634, %246, %cst_159 {dimension_numbers = #tpu.dot_dimension_numbers<[1], [0], [0], [1], [0, 0, 1, 1], [], []>} : vector<2x68xf32>, vector<68x4xf32>, vector<2x4xf32> -> vector<2x4xf32>
    %636 = vector.broadcast %247 : vector<1x4xf32> to vector<2x4xf32>
    %637 = arith.addf %635, %636 : vector<2x4xf32>
    %c0_160 = arith.constant 0 : index
    %c5_161 = arith.constant 5 : index
    %c0_162 = arith.constant 0 : index
    %638 = vector.load %arg16[%c0_160, %c5_161, %c0_162] : memref<2x8x4xf32, #tpu.memory_space<vmem>>, vector<2x1x4xf32>
    %639 = vector.shape_cast %638 : vector<2x1x4xf32> to vector<2x4xf32>
    %640 = vector.shape_cast %637 : vector<2x4xf32> to vector<2x1x4xf32>
    tpu.vector_store %arg16[%c0_160, %c5_161, %c0_162], %640 {strides = array<i32>} : memref<2x8x4xf32, #tpu.memory_space<vmem>>, vector<2x1x4xf32>,
    %c5_163 = arith.constant 5 : index
    %641 = memref.load %arg0[%c5_163] : memref<8xi32, #tpu.memory_space<smem>>
    %c0_i32_164 = arith.constant 0 : i32
    %642 = arith.cmpi sgt, %641, %c0_i32_164 : i32
    %643 = arith.extui %642 : i1 to i32
    %644 = arith.sitofp %643 : i32 to f32
    %645 = vector.extract_strided_slice %248 {offsets = [0, 5, 0], sizes = [2, 1, 4], strides = [1, 1, 1]} : vector<2x8x4xf32> to vector<2x1x4xf32>
    %646 = vector.shape_cast %645 : vector<2x1x4xf32> to vector<2x4xf32>
    %647 = vector.broadcast %644 : f32 to vector<2x4xf32>
    %648 = arith.mulf %647, %646 : vector<2x4xf32>
    %cst_165 = arith.constant 1.000000e+00 : f32
    %649 = arith.subf %cst_165, %644 : f32
    %650 = vector.broadcast %649 : f32 to vector<2x4xf32>
    %651 = arith.mulf %650, %637 : vector<2x4xf32>
    %652 = arith.addf %648, %651 : vector<2x4xf32>
    %cst_166 = arith.constant dense<0.000000e+00> : vector<2x128xf32>
    %653 = tpu.matmul %633, %240, %cst_166 {dimension_numbers = #tpu.dot_dimension_numbers<[1], [0], [0], [1], [0, 0, 1, 1], [], []>} : vector<2x32xf32>, vector<32x128xf32>, vector<2x128xf32> -> vector<2x128xf32>
    %654 = vector.extract_strided_slice %653 {offsets = [0, 0], sizes = [2, 32], strides = [1, 1]} : vector<2x128xf32> to vector<2x32xf32>
    %655 = vector.extract_strided_slice %653 {offsets = [0, 32], sizes = [2, 96], strides = [1, 1]} : vector<2x128xf32> to vector<2x96xf32>
    %656 = vector.broadcast %245 : vector<1x96xf32> to vector<2x96xf32>
    %657 = arith.addf %655, %656 : vector<2x96xf32>
    %658 = vector.shape_cast %654 : vector<2x32xf32> to vector<2x1x32xf32>
    %659 = vector.broadcast %658 : vector<2x1x32xf32> to vector<2x8x32xf32>
    %660 = arith.addf %659, %239 : vector<2x8x32xf32>
    %661 = math.tanh %660 : vector<2x8x32xf32>
    %662 = vector.shape_cast %241 : vector<1x32xf32> to vector<1x1x32xf32>
    %663 = vector.broadcast %662 : vector<1x1x32xf32> to vector<2x8x32xf32>
    %664 = arith.mulf %661, %663 : vector<2x8x32xf32>
    %cst_167 = arith.constant dense<0.000000e+00> : vector<2x8xf32>
    %665 = vector.multi_reduction <add>, %664, %cst_167 [2] : vector<2x8x32xf32> to vector<2x8xf32>
    %666 = math.exp %665 : vector<2x8xf32>
    %cst_168 = arith.constant dense<0.000000e+00> : vector<2xf32>
    %667 = vector.multi_reduction <add>, %666, %cst_168 [1] : vector<2x8xf32> to vector<2xf32>
    %668 = vector.shape_cast %667 : vector<2xf32> to vector<2x1xf32>
    %669 = tpu.reciprocal %668 {approx = true} : vector<2x1xf32> -> vector<2x1xf32>
    %670 = vector.broadcast %669 : vector<2x1xf32> to vector<2x8xf32>
    %671 = arith.mulf %666, %670 : vector<2x8xf32>
    %672 = vector.shape_cast %671 : vector<2x8xf32> to vector<2x8x1xf32>
    %673 = vector.broadcast %672 : vector<2x8x1xf32> to vector<2x8x32xf32>
    %674 = arith.mulf %673, %235 : vector<2x8x32xf32>
    %cst_169 = arith.constant dense<0.000000e+00> : vector<2x32xf32>
    %675 = vector.multi_reduction <add>, %674, %cst_169 [1] : vector<2x8x32xf32> to vector<2x32xf32>
    %cst_170 = arith.constant dense<0.000000e+00> : vector<2x96xf32>
    %676 = tpu.matmul %652, %242, %cst_170 {dimension_numbers = #tpu.dot_dimension_numbers<[1], [0], [0], [1], [0, 0, 1, 1], [], []>} : vector<2x4xf32>, vector<4x96xf32>, vector<2x96xf32> -> vector<2x96xf32>
    %cst_171 = arith.constant dense<0.000000e+00> : vector<2x96xf32>
    %677 = tpu.matmul %675, %243, %cst_171 {dimension_numbers = #tpu.dot_dimension_numbers<[1], [0], [0], [1], [0, 0, 1, 1], [], []>} : vector<2x32xf32>, vector<32x96xf32>, vector<2x96xf32> -> vector<2x96xf32>
    %678 = arith.addf %676, %677 : vector<2x96xf32>
    %679 = vector.broadcast %244 : vector<1x96xf32> to vector<2x96xf32>
    %680 = arith.addf %678, %679 : vector<2x96xf32>
    %681 = vector.extract_strided_slice %680 {offsets = [0, 0], sizes = [2, 64], strides = [1, 1]} : vector<2x96xf32> to vector<2x64xf32>
    %682 = vector.extract_strided_slice %657 {offsets = [0, 0], sizes = [2, 64], strides = [1, 1]} : vector<2x96xf32> to vector<2x64xf32>
    %683 = arith.addf %681, %682 : vector<2x64xf32>
    %684 = arith.negf %683 : vector<2x64xf32>
    %685 = math.exp %684 : vector<2x64xf32>
    %cst_172 = arith.constant 1.000000e+00 : f32
    %686 = vector.broadcast %cst_172 : f32 to vector<2x64xf32>
    %687 = arith.addf %686, %685 : vector<2x64xf32>
    %688 = arith.divf %686, %687 : vector<2x64xf32>
    %689 = vector.extract_strided_slice %688 {offsets = [0, 0], sizes = [2, 32], strides = [1, 1]} : vector<2x64xf32> to vector<2x32xf32>
    %690 = vector.extract_strided_slice %688 {offsets = [0, 32], sizes = [2, 32], strides = [1, 1]} : vector<2x64xf32> to vector<2x32xf32>
    %691 = vector.extract_strided_slice %680 {offsets = [0, 64], sizes = [2, 32], strides = [1, 1]} : vector<2x96xf32> to vector<2x32xf32>
    %692 = vector.extract_strided_slice %657 {offsets = [0, 64], sizes = [2, 32], strides = [1, 1]} : vector<2x96xf32> to vector<2x32xf32>
    %693 = arith.mulf %689, %692 : vector<2x32xf32>
    %694 = arith.addf %691, %693 : vector<2x32xf32>
    %695 = math.tanh %694 : vector<2x32xf32>
    %cst_173 = arith.constant 1.000000e+00 : f32
    %696 = vector.broadcast %cst_173 : f32 to vector<2x32xf32>
    %697 = arith.subf %696, %690 : vector<2x32xf32>
    %698 = arith.mulf %697, %695 : vector<2x32xf32>
    %699 = arith.mulf %690, %633 : vector<2x32xf32>
    %700 = arith.addf %698, %699 : vector<2x32xf32>
    %701 = tpu.concatenate %700, %675, %652 in 1 : vector<2x32xf32>, vector<2x32xf32>, vector<2x4xf32> -> vector<2x68xf32>
    %cst_174 = arith.constant dense<0.000000e+00> : vector<2x4xf32>
    %702 = tpu.matmul %701, %246, %cst_174 {dimension_numbers = #tpu.dot_dimension_numbers<[1], [0], [0], [1], [0, 0, 1, 1], [], []>} : vector<2x68xf32>, vector<68x4xf32>, vector<2x4xf32> -> vector<2x4xf32>
    %703 = vector.broadcast %247 : vector<1x4xf32> to vector<2x4xf32>
    %704 = arith.addf %702, %703 : vector<2x4xf32>
    %c0_175 = arith.constant 0 : index
    %c6_176 = arith.constant 6 : index
    %c0_177 = arith.constant 0 : index
    %705 = vector.load %arg16[%c0_175, %c6_176, %c0_177] : memref<2x8x4xf32, #tpu.memory_space<vmem>>, vector<2x1x4xf32>
    %706 = vector.shape_cast %705 : vector<2x1x4xf32> to vector<2x4xf32>
    %707 = vector.shape_cast %704 : vector<2x4xf32> to vector<2x1x4xf32>
    tpu.vector_store %arg16[%c0_175, %c6_176, %c0_177], %707 {strides = array<i32>} : memref<2x8x4xf32, #tpu.memory_space<vmem>>, vector<2x1x4xf32>,
    %c6_178 = arith.constant 6 : index
    %708 = memref.load %arg0[%c6_178] : memref<8xi32, #tpu.memory_space<smem>>
    %c0_i32_179 = arith.constant 0 : i32
    %709 = arith.cmpi sgt, %708, %c0_i32_179 : i32
    %710 = arith.extui %709 : i1 to i32
    %711 = arith.sitofp %710 : i32 to f32
    %712 = vector.extract_strided_slice %248 {offsets = [0, 6, 0], sizes = [2, 1, 4], strides = [1, 1, 1]} : vector<2x8x4xf32> to vector<2x1x4xf32>
    %713 = vector.shape_cast %712 : vector<2x1x4xf32> to vector<2x4xf32>
    %714 = vector.broadcast %711 : f32 to vector<2x4xf32>
    %715 = arith.mulf %714, %713 : vector<2x4xf32>
    %cst_180 = arith.constant 1.000000e+00 : f32
    %716 = arith.subf %cst_180, %711 : f32
    %717 = vector.broadcast %716 : f32 to vector<2x4xf32>
    %718 = arith.mulf %717, %704 : vector<2x4xf32>
    %719 = arith.addf %715, %718 : vector<2x4xf32>
    %cst_181 = arith.constant dense<0.000000e+00> : vector<2x128xf32>
    %720 = tpu.matmul %700, %240, %cst_181 {dimension_numbers = #tpu.dot_dimension_numbers<[1], [0], [0], [1], [0, 0, 1, 1], [], []>} : vector<2x32xf32>, vector<32x128xf32>, vector<2x128xf32> -> vector<2x128xf32>
    %721 = vector.extract_strided_slice %720 {offsets = [0, 0], sizes = [2, 32], strides = [1, 1]} : vector<2x128xf32> to vector<2x32xf32>
    %722 = vector.extract_strided_slice %720 {offsets = [0, 32], sizes = [2, 96], strides = [1, 1]} : vector<2x128xf32> to vector<2x96xf32>
    %723 = vector.broadcast %245 : vector<1x96xf32> to vector<2x96xf32>
    %724 = arith.addf %722, %723 : vector<2x96xf32>
    %725 = vector.shape_cast %721 : vector<2x32xf32> to vector<2x1x32xf32>
    %726 = vector.broadcast %725 : vector<2x1x32xf32> to vector<2x8x32xf32>
    %727 = arith.addf %726, %239 : vector<2x8x32xf32>
    %728 = math.tanh %727 : vector<2x8x32xf32>
    %729 = vector.shape_cast %241 : vector<1x32xf32> to vector<1x1x32xf32>
    %730 = vector.broadcast %729 : vector<1x1x32xf32> to vector<2x8x32xf32>
    %731 = arith.mulf %728, %730 : vector<2x8x32xf32>
    %cst_182 = arith.constant dense<0.000000e+00> : vector<2x8xf32>
    %732 = vector.multi_reduction <add>, %731, %cst_182 [2] : vector<2x8x32xf32> to vector<2x8xf32>
    %733 = math.exp %732 : vector<2x8xf32>
    %cst_183 = arith.constant dense<0.000000e+00> : vector<2xf32>
    %734 = vector.multi_reduction <add>, %733, %cst_183 [1] : vector<2x8xf32> to vector<2xf32>
    %735 = vector.shape_cast %734 : vector<2xf32> to vector<2x1xf32>
    %736 = tpu.reciprocal %735 {approx = true} : vector<2x1xf32> -> vector<2x1xf32>
    %737 = vector.broadcast %736 : vector<2x1xf32> to vector<2x8xf32>
    %738 = arith.mulf %733, %737 : vector<2x8xf32>
    %739 = vector.shape_cast %738 : vector<2x8xf32> to vector<2x8x1xf32>
    %740 = vector.broadcast %739 : vector<2x8x1xf32> to vector<2x8x32xf32>
    %741 = arith.mulf %740, %235 : vector<2x8x32xf32>
    %cst_184 = arith.constant dense<0.000000e+00> : vector<2x32xf32>
    %742 = vector.multi_reduction <add>, %741, %cst_184 [1] : vector<2x8x32xf32> to vector<2x32xf32>
    %cst_185 = arith.constant dense<0.000000e+00> : vector<2x96xf32>
    %743 = tpu.matmul %719, %242, %cst_185 {dimension_numbers = #tpu.dot_dimension_numbers<[1], [0], [0], [1], [0, 0, 1, 1], [], []>} : vector<2x4xf32>, vector<4x96xf32>, vector<2x96xf32> -> vector<2x96xf32>
    %cst_186 = arith.constant dense<0.000000e+00> : vector<2x96xf32>
    %744 = tpu.matmul %742, %243, %cst_186 {dimension_numbers = #tpu.dot_dimension_numbers<[1], [0], [0], [1], [0, 0, 1, 1], [], []>} : vector<2x32xf32>, vector<32x96xf32>, vector<2x96xf32> -> vector<2x96xf32>
    %745 = arith.addf %743, %744 : vector<2x96xf32>
    %746 = vector.broadcast %244 : vector<1x96xf32> to vector<2x96xf32>
    %747 = arith.addf %745, %746 : vector<2x96xf32>
    %748 = vector.extract_strided_slice %747 {offsets = [0, 0], sizes = [2, 64], strides = [1, 1]} : vector<2x96xf32> to vector<2x64xf32>
    %749 = vector.extract_strided_slice %724 {offsets = [0, 0], sizes = [2, 64], strides = [1, 1]} : vector<2x96xf32> to vector<2x64xf32>
    %750 = arith.addf %748, %749 : vector<2x64xf32>
    %751 = arith.negf %750 : vector<2x64xf32>
    %752 = math.exp %751 : vector<2x64xf32>
    %cst_187 = arith.constant 1.000000e+00 : f32
    %753 = vector.broadcast %cst_187 : f32 to vector<2x64xf32>
    %754 = arith.addf %753, %752 : vector<2x64xf32>
    %755 = arith.divf %753, %754 : vector<2x64xf32>
    %756 = vector.extract_strided_slice %755 {offsets = [0, 0], sizes = [2, 32], strides = [1, 1]} : vector<2x64xf32> to vector<2x32xf32>
    %757 = vector.extract_strided_slice %755 {offsets = [0, 32], sizes = [2, 32], strides = [1, 1]} : vector<2x64xf32> to vector<2x32xf32>
    %758 = vector.extract_strided_slice %747 {offsets = [0, 64], sizes = [2, 32], strides = [1, 1]} : vector<2x96xf32> to vector<2x32xf32>
    %759 = vector.extract_strided_slice %724 {offsets = [0, 64], sizes = [2, 32], strides = [1, 1]} : vector<2x96xf32> to vector<2x32xf32>
    %760 = arith.mulf %756, %759 : vector<2x32xf32>
    %761 = arith.addf %758, %760 : vector<2x32xf32>
    %762 = math.tanh %761 : vector<2x32xf32>
    %cst_188 = arith.constant 1.000000e+00 : f32
    %763 = vector.broadcast %cst_188 : f32 to vector<2x32xf32>
    %764 = arith.subf %763, %757 : vector<2x32xf32>
    %765 = arith.mulf %764, %762 : vector<2x32xf32>
    %766 = arith.mulf %757, %700 : vector<2x32xf32>
    %767 = arith.addf %765, %766 : vector<2x32xf32>
    %768 = tpu.concatenate %767, %742, %719 in 1 : vector<2x32xf32>, vector<2x32xf32>, vector<2x4xf32> -> vector<2x68xf32>
    %cst_189 = arith.constant dense<0.000000e+00> : vector<2x4xf32>
    %769 = tpu.matmul %768, %246, %cst_189 {dimension_numbers = #tpu.dot_dimension_numbers<[1], [0], [0], [1], [0, 0, 1, 1], [], []>} : vector<2x68xf32>, vector<68x4xf32>, vector<2x4xf32> -> vector<2x4xf32>
    %770 = vector.broadcast %247 : vector<1x4xf32> to vector<2x4xf32>
    %771 = arith.addf %769, %770 : vector<2x4xf32>
    %c0_190 = arith.constant 0 : index
    %c7_191 = arith.constant 7 : index
    %c0_192 = arith.constant 0 : index
    %772 = vector.load %arg16[%c0_190, %c7_191, %c0_192] : memref<2x8x4xf32, #tpu.memory_space<vmem>>, vector<2x1x4xf32>
    %773 = vector.shape_cast %772 : vector<2x1x4xf32> to vector<2x4xf32>
    %774 = vector.shape_cast %771 : vector<2x4xf32> to vector<2x1x4xf32>
    tpu.vector_store %arg16[%c0_190, %c7_191, %c0_192], %774 {strides = array<i32>} : memref<2x8x4xf32, #tpu.memory_space<vmem>>, vector<2x1x4xf32>,
    return
  }
}

</mosaic_0001>

<bundles_post_ra>
// kernel: seq2seq_forward.1
= control target key start
LH: loop header
LB: loop body
LE: loop exit
PB: predicated region body
PF: predicated region fallthrough
CT: control target
= control target key end

     0   :  { %s8158_s0 = inlined_call_operand.vmem [shape: s32[8], index: 0, kind: input, shape index: {}]   ;;  %s8159_s1 = inlined_call_operand.vmem [shape: f32[2,8,4], index: 1, kind: input, shape index: {}]   ;;  %s8160_s2 = inlined_call_operand.vmem [shape: f32[2,8,4], index: 2, kind: input, shape index: {}]   ;;  %s8161_s3 = inlined_call_operand.hbm [shape: f32[4,96], index: 3, kind: input, shape index: {}]   ;;  %s8162_s4 = inlined_call_operand.vmem [shape: f32[32,96], index: 4, kind: input, shape index: {}]   ;;  %s8163_s5 = inlined_call_operand.vmem [shape: f32[1,96], index: 5, kind: input, shape index: {}]   ;;  %s8164_s6 = inlined_call_operand.hbm [shape: f32[1,96], index: 6, kind: input, shape index: {}]   ;;  %s8165_s7 = inlined_call_operand.vmem [shape: f32[32,128], index: 7, kind: input, shape index: {}]   ;;  %s8166_s8 = inlined_call_operand.vmem [shape: f32[32,32], index: 8, kind: input, shape index: {}]   ;;  %s8167_s9 = inlined_call_operand.hbm [shape: f32[1,32], index: 9, kind: input, shape index: {}]   ;;  %s8168_s10 = inlined_call_operand.vmem [shape: f32[4,96], index: 10, kind: input, shape index: {}]   ;;  %s8169_s11 = inlined_call_operand.vmem [shape: f32[32,96], index: 11, kind: input, shape index: {}]   ;;  %s8170_s12 = inlined_call_operand.vmem [shape: f32[1,96], index: 12, kind: input, shape index: {}]   ;;  %s8171_s13 = inlined_call_operand.vmem [shape: f32[1,96], index: 13, kind: input, shape index: {}]   ;;  %s8172_s14 = inlined_call_operand.vmem [shape: f32[68,4], index: 14, kind: input, shape index: {}]   ;;  %s8173_s15 = inlined_call_operand.vmem [shape: f32[1,4], index: 15, kind: input, shape index: {}]   ;;  %s8174_s16 = inlined_call_operand.vmem [shape: f32[2,8,4], index: 16, kind: output, shape index: {}]  }
   0x1   :  { %8175 = sst [smem:[#allocation13_spill]] %s8158_s0 }
   0x2   :  { %21 = vsyncpa [#allocation5], 0 }
   0x3   :  { %22 = vsyncpa [#allocation4], 0 }
   0x4   :  { %23 = vsyncpa [#allocation8], 0  ;;  %s8176_s23 = sld [smem:[#allocation13_spill]]  ;;  %s6808_s25 = smov [#allocation7]  }
   0x5   :  { %s58_s26 = sshll.u32 %s6808_s25, 4  ;;  %s6724_s29 = scalar_lea.hbm %s8164_s6, 16  ;;  %s59_s26 = int_to_ptr.vmem [resolvable:$true] %s58_s26 }
   0x6   :  { %p6725_p0 = scmp.ne.s32.totalorder %s8164_s6, %s6724_s29  ;;  %p6728_p1 = scmp.lt.u32.totalorder %s6724_s29, %s8164_s6 }
   0x8   :  { %p6730_p2 = pnand %p6728_p1, %p6725_p0 }
   0xa   :  { %s30_s24 = sshll.u32 %s8176_s23, 4  ;;  %s31_s24 = int_to_ptr.vmem [resolvable:$true] %s30_s24 }
   0xb   :  { %6733 = shalt.err (!%p6730_p2)
}
   0xc   :  { %s6734_s19 = scalar_lea.vmem %s59_s26, 16  ;;  %s6738_s20 = scalar_lea.vmem %s59_s26, 32 }
   0xd   :  { %p6735_p3 = scmp.ne.s32.totalorder %s59_s26, %s6734_s19  ;;  %p6739_p4 = scmp.lt.s32.totalorder %s59_s26, %s59_s26 }
   0xe   :  { %p6740_p5 = scmp.lt.s32.totalorder %s6738_s20, %s6734_s19 }
  0x10   :  { %p6741_p6 = por %p6740_p5, %p6739_p4 }
  0x12   :  { %p6742_p7 = pnand %p6741_p6, %p6735_p3 }
  0x14   :  { %6745 = shalt.err (!%p6742_p7)
}
  0x15   :  { %61 = dma.hbm_to_vmem [thread:$0]  %s8164_s6, 16, %s59_s26, [#allocation8]  }
  0x16   :  { %s6746_s23 = scalar_lea.vmem %s31_s24, 16  ;;  %p6751_p9 = scmp.lt.s32.totalorder %s31_s24, %s31_s24 }
  0x17   :  { %p6747_p8 = scmp.ne.s32.totalorder %s31_s24, %s6746_s23  ;;  %p6752_p10 = scmp.lt.s32.totalorder %s6746_s23, %s6746_s23 }
  0x19   :  { %p6753_p11 = por %p6752_p10, %p6751_p9 }
  0x1b   :  { %p6754_p12 = pnand %p6753_p11, %p6747_p8 }
  0x1d   :  { %6757 = shalt.err (!%p6754_p12)
}
  0x1e   :  { %s6809_s25 = smov [#allocation3]   ;;  %s6810_s27 = smov [#allocation6]  }
  0x1f   :  { %33 = dma.vmem_to_smem %s31_s24, 16, %s6809_s25, [#allocation5]  }
  0x20   :  { %s44_s28 = sshll.u32 %s6810_s27, 4  ;;  %s6811_s29 = smov [#allocation9]   ;;  %s45_s28 = int_to_ptr.vmem [resolvable:$true] %s44_s28 }
  0x21   :  { %s72_s30 = sshll.u32 %s6811_s29, 4  ;;  %s6758_s18 = scalar_lea.hbm %s8161_s3, 64  ;;  %s73_s30 = int_to_ptr.vmem [resolvable:$true] %s72_s30 }
  0x22   :  { %p6759_p13 = scmp.ne.s32.totalorder %s8161_s3, %s6758_s18  ;;  %p6762_p0 = scmp.lt.u32.totalorder %s6758_s18, %s8161_s3 }
  0x24   :  { %p6764_p1 = pnand %p6762_p0, %p6759_p13 }
  0x26   :  { %6767 = shalt.err (!%p6764_p1)
}
  0x27   :  { %s6768_s24 = scalar_lea.vmem %s45_s28, 64  ;;  %p6773_p3 = scmp.lt.s32.totalorder %s45_s28, %s45_s28 }
  0x28   :  { %p6769_p2 = scmp.ne.s32.totalorder %s45_s28, %s6768_s24  ;;  %p6774_p4 = scmp.lt.s32.totalorder %s6768_s24, %s6768_s24 }
  0x2a   :  { %p6775_p5 = por %p6774_p4, %p6773_p3 }
  0x2c   :  { %p6776_p6 = pnand %p6775_p5, %p6769_p2 }
  0x2e   :  { %6779 = shalt.err (!%p6776_p6)
}
  0x2f   :  { %47 = dma.hbm_to_vmem [thread:$0]  %s8161_s3, 64, %s45_s28, [#allocation4]  }
  0x30   :  { %s6780_s27 = scalar_lea.hbm %s8167_s9, 16 }
  0x31   :  { %p6781_p7 = scmp.ne.s32.totalorder %s8167_s9, %s6780_s27  ;;  %p6784_p8 = scmp.lt.u32.totalorder %s6780_s27, %s8167_s9 }
  0x33   :  { %p6786_p9 = pnand %p6784_p8, %p6781_p7 }
  0x35   :  { %6789 = shalt.err (!%p6786_p9)
}
  0x36   :  { %s6790_s6 = scalar_lea.vmem %s73_s30, 16  ;;  %s6794_s26 = scalar_lea.vmem %s73_s30, 32 }
  0x37   :  { %p6791_p10 = scmp.ne.s32.totalorder %s73_s30, %s6790_s6  ;;  %p6795_p11 = scmp.lt.s32.totalorder %s73_s30, %s73_s30 }
  0x38   :  { %p6796_p12 = scmp.lt.s32.totalorder %s6794_s26, %s6790_s6 }
  0x3a   :  { %p6797_p13 = por %p6796_p12, %p6795_p11 }
  0x3c   :  { %p6798_p0 = pnand %p6797_p13, %p6791_p10 }
  0x3e   :  { %6801 = shalt.err (!%p6798_p0)
}
  0x3f   :  { %75 = dma.hbm_to_vmem [thread:$0]  %s8167_s9, 16, %s73_s30, [#allocation8]  }
  0x40   :  { %6802 = dma.done.wait [#allocation5], 16  }
  0x41   :  { %6803 = vsyncadd [#allocation5], 4294967280 }
  0x42   :  { %6804 = dma.done.wait [#allocation4], 64  }
  0x43   :  { %6805 = vsyncadd [#allocation4], 4294967232 }
  0x44   :  { %6806 = dma.done.wait [#allocation8], 32  }
  0x45   :  { %6807 = vsyncadd [#allocation8], 4294967264 }
  0x46   :  { %100 = sfence }
  0x47   :  { %v108_v0 = vld [vmem:[#allocation6] sm:$0xf]  ;;  %vm123_vm0 = vcmask 1043456   ;;  %v101_v1 = vld [vmem:[%s8159_s1] sm:$0xff]  ;;  %vm116_vm1 = vcmask 31744   ;;  %v102_v2 = vld [vmem:[%s8159_s1 + $0x8] sm:$0xff] }
  0x48   :  { %5737 = vmatprep.subr.msk.mxu0 %vm123_vm0, %v108_v0  ;;  %5739 = vmatprep.mubr.msk.f32.mxu0 %vm116_vm1, %v101_v1  ;;  %v103_v3 = vld [vmem:[%s8162_s4] sm:$0xff]  ;;  %v104_v4 = vld [vmem:[%s8162_s4 + $0x8] sm:$0xff]  ;;  %v105_v5 = vld [vmem:[%s8162_s4 + $0x10] sm:$0xff]  ;;  %v6812_v8 = vmov 0.0|0.0   ;;  %vm6813_vm2 = vmmov 0   ;;  %v6814_v10 = vmov 0.0  }
  0x49   :  { %5738 = vmatpush3.msk.msra.mxu0 %vm123_vm0, %v108_v0  ;;  %v6962_v6 = vpack.c.bf16 %v104_v4, %v103_v3  ;;  %v106_v7 = vld [vmem:[%s8162_s4 + $0x18] sm:$0xff]  ;;  %6237 = vmatprep.subr.bf16.mxu1 %v6812_v8  ;;  %v6991_v13 = vld [vmem:[#allocation7] ss:$0 sm:$0xff]  ;;  %s6815_s4 = smov 64   ;;  %v5416_v18 = vld [vmem:[%s8163_s5] ss:$0 sm:$0xff] }
  0x4a   :  { %5740 = vmatmul.mubr.msk.f32.vlgmr.msra.gmra.mrb[0].mxu0 %vm116_vm1, %v102_v2  ;;  %6225 = vmatprep.subr.bf16.mxu0 %v6812_v8  ;;  %v6971_v9 = vpack.c.bf16 %v106_v7, %v105_v5  ;;  %s6816_s5 = smov 96   ;;  %vm348_vm3 = vcmask 1041409   ;;  %vm208_vm4 = vcmask 261120   ;;  %vm489_vm5 = vcmask 254977   ;;  %s6819_s17 = smov 32  }
  0x4b   :  { %6227 = vmatpush3.bf16.msra.mxu0 %v6962_v6  ;;  %5750 = vmatprep.mubr.msk.f32.mxu0 %vm6813_vm2, %v6814_v10  ;;  %vm344_vm6 = vcmask 253952   ;;  %vm782_vm7 = vcmask 257027   ;;  %vm635_vm8 = vcmask 256002   ;;  %vm1076_vm9 = vcmask 259077   ;;  %s1997_s22 = sld [smem:[#allocation3]]  ;;  %s5464_s28 = sld [smem:[#allocation3 + $0x1]] }
  0x4c   :  { %6228 = vmatprep.subr.bf16.mxu0 %v6812_v8  ;;  %6239 = vmatpush3.bf16.msra.mxu1 %v6962_v6  ;;  %vm929_vm10 = vcmask 258052   ;;  %vm1223_vm11 = vcmask 260102   ;;  %vm1370_vm12 = vcmask 261127   ;;  %vm1639_vm13 = vcmask 58368   ;;  %s5480_s18 = sld [smem:[#allocation3 + $0x3]]  ;;  %s5496_s0 = sld [smem:[#allocation3 + $0x5]] }
  0x4d   :  { %6240 = vmatprep.subr.bf16.mxu1 %v6812_v8  ;;  %5772 = vmatprep.mubr.msk.f32.mxu1 %vm6813_vm2, %v6814_v10  ;;  %vm1884_vm14 = vcmask 523264   ;;  %vm1892_vm15 = vcmask 556032  }
  0x4f   :  { %6230 = vmatpush3.bf16.msra.mxu0 %v6971_v9 }
  0x50   :  { %6231 = vmatprep.subr.bf16.mxu0 %v6812_v8  ;;  %6242 = vmatpush3.bf16.msra.mxu1 %v6971_v9 }
  0x51   :  { %6249 = vmatprep.subr.bf16.mxu1 %v6812_v8  ;;  %p1998_p1 = scmp.gt.s32.totalorder %s1997_s22, 0  ;;  %p2484_p2 = scmp.gt.s32.totalorder %s5464_s28, 0 }
  0x52   :  { %5751 = vmatmul.mubr.f32.vlgmr.msra.gmra.mrb[2].mxu0 %v6814_v10  ;;  %s5472_s22 = sld [smem:[#allocation3 + $0x2]]  ;;  %p3458_p4 = scmp.gt.s32.totalorder %s5480_s18, 0 }
  0x53   :  { %6233 = vmatpush3.bf16.msra.mxu0 %v6962_v6  ;;  %5761 = vmatprep.mubr.msk.f32.mxu0 %vm6813_vm2, %v6814_v10  ;;  %s1999_s23 = scalar_select %p1998_p1, 1, 0 }
  0x54   :  { %6234 = vmatprep.subr.bf16.mxu0 %v6812_v8  ;;  %s2485_s19 = scalar_select %p2484_p2, 1, 0 }
  0x55   :  { %s3459_s6 = scalar_select %p3458_p4, 1, 0 }
  0x56   :  { %s2486_s20 = scvt.s32.f32 %s2485_s19  ;;  %p4434_p6 = scmp.gt.s32.totalorder %s5496_s0, 0 }
  0x57   :  { %6236 = vmatpush3.bf16.msra.mxu0 %v6971_v9  ;;  %s3460_s26 = scvt.s32.f32 %s3459_s6 }
  0x58   :  { %6243 = vmatprep.subr.bf16.mxu0 %v6812_v8  ;;  %p2970_p3 = scmp.gt.s32.totalorder %s5472_s22, 0 }
  0x59   :  { %s4435_s18 = scalar_select %p4434_p6, 1, 0 }
  0x5b   :  { %s4436_s6 = scvt.s32.f32 %s4435_s18 }
 0x11d   :  { %v5741_v11 = vpop.f32.mrb[0].mxu0 }
 0x11e   :  { %v193_v12 = vpop.f32.mrb[1].mxu0  ;;  %v6999_v19 = vadd.f32 %v5741_v11, %v5416_v18 }
 0x11f   :  { %v7002_v21 = vadd.f32 %v5416_v18, %v193_v12 }
 0x125   :  { %v278_v14 = vpop.f32.mrb[2].mxu0 }
 0x126   :  { %v279_v15 = vadd.f32 %v6991_v13, %v278_v14  ;;  %v5752_v16 = vpop.f32.mrb[3].mxu0 }
 0x128   :  { %v283_v17 = vrot.slane %v279_v15, 1  ;;  %v286_v22 = vadd.f32 %v279_v15, %v7002_v21 }
 0x12a   :  { %302 = vrot.lane.b32.xlu0 %v283_v17, %s6815_s4  ;;  %v287_v20 = vadd.f32 %v283_v17, %v6999_v19  ;;  %v5421_v24 = vmul.f32 -1.442695, %v286_v22 }
 0x12c   :  { %v5422_v23 = vmul.f32 -1.442695, %v287_v20 }
 0x12e   :  { %300 = vrot.lane.b32.xlu0 %v279_v15, %s6815_s4  ;;  %6487 = vpow2.f32 %v5422_v23 }
 0x12f   :  { %6489 = vpow2.f32 %v5421_v24 }
 0x138   :  { %v6488_v25 = vpop.eup %6487 }
 0x139   :  { %v295_v26 = vadd.f32 1.0, %v6488_v25  ;;  %v6490_v27 = vpop.eup %6489 }
 0x13a   :  { %v294_v28 = vadd.f32 1.0, %v6490_v27 }
 0x13b   :  { %6491 = vrcp.f32 %v295_v26 }
 0x13c   :  { %6493 = vrcp.f32 %v294_v28 }
 0x145   :  { %v6492_v29 = vpop.eup %6491 }
 0x146   :  { %v6494_v32 = vpop.eup %6493  ;;  %v321_v41 = vsub.f32 1.0, %v6492_v29  ;;  %v333_v43 = vmul.f32 0.0, %v6492_v29 }
 0x147   :  { %v320_v46 = vsub.f32 1.0, %v6494_v32  ;;  %v332_v48 = vmul.f32 0.0, %v6494_v32 }
 0x19c   :  { %v303_v30 = vpop.permute.xlu0 %302 }
 0x19d   :  { %v307_v31 = vmul.f32 %v6492_v29, %v303_v30 }
 0x19f   :  { %312 = vrot.lane.b32.xlu1 %v307_v31, %s6815_s4 }
 0x1a0   :  { %v301_v33 = vpop.permute.xlu0 %300 }
 0x1a1   :  { %v306_v34 = vmul.f32 %v6494_v32, %v301_v33 }
 0x1a3   :  { %310 = vrot.lane.b32.xlu1 %v306_v34, %s6815_s4 }
 0x211   :  { %v313_v35 = vpop.permute.xlu1 %312 }
 0x212   :  { %v317_v36 = vadd.f32 %v313_v35, %v6999_v19 }
 0x214   :  { %6495 = vtanh.f32 %v317_v36 }
 0x215   :  { %v311_v37 = vpop.permute.xlu1 %310 }
 0x216   :  { %v316_v38 = vadd.f32 %v311_v37, %v7002_v21 }
 0x218   :  { %6497 = vtanh.f32 %v316_v38 }
 0x21e   :  { %v6496_v39 = vpop.eup %6495 }
 0x21f   :  { %326 = vrot.lane.b32.xlu0 %v6496_v39, %s6816_s5 }
 0x222   :  { %v6498_v40 = vpop.eup %6497 }
 0x223   :  { %324 = vrot.lane.b32.xlu1 %v6498_v40, %s6816_s5 }
 0x291   :  { %v327_v42 = vpop.permute.xlu0 %326 }
 0x292   :  { %v331_v44 = vmul.f32 %v327_v42, %v321_v41 }
 0x294   :  { %v7011_v45 = vadd.f32 %v333_v43, %v331_v44 }
 0x295   :  { %v325_v47 = vpop.permute.xlu1 %324 }
 0x296   :  { %v330_v49 = vmul.f32 %v325_v47, %v320_v46  ;;  %v347_v50 = vrot.slane %v7011_v45, 7 }
 0x298   :  { %v7014_v51 = vadd.f32 %v332_v48, %v330_v49 }
 0x29a   :  { %v349_v52 = vsel %vm348_vm3, %v347_v50, %v7014_v51  ;;  %v474_v24 = vrot.slane %v7014_v51, 7 }
 0x29b   :  { %350 = vrot.lane.b32.xlu0 %v349_v52, %s6816_s5 }
 0x30d   :  { %v351_v53 = vpop.permute.xlu0 %350 }
 0x30e   :  { %5762 = vmatmul.mubr.msk.f32.vlgmr.msra.gmra.mrb[4].mxu0 %vm208_vm4, %v351_v53 }
 0x30f   :  { %6245 = vmatpush3.bf16.msra.mxu0 %v6962_v6  ;;  %5783 = vmatprep.mubr.msk.f32.mxu0 %vm6813_vm2, %v6814_v10 }
 0x310   :  { %6246 = vmatprep.subr.bf16.mxu0 %v6812_v8 }
 0x313   :  { %6248 = vmatpush3.bf16.msra.mxu0 %v6971_v9 }
 0x314   :  { %6255 = vmatprep.subr.bf16.mxu0 %v6812_v8 }
 0x3e1   :  { %v420_v54 = vpop.f32.mrb[4].mxu0 }
 0x3e2   :  { %v421_v55 = vadd.f32 %v6991_v13, %v420_v54  ;;  %v5763_v56 = vpop.f32.mrb[5].mxu0 }
 0x3e4   :  { %444 = vrot.lane.b32.xlu0 %v421_v55, %s6815_s4  ;;  %v425_v57 = vrot.slane %v421_v55, 7  ;;  %v429_v58 = vadd.f32 %v421_v55, %v6999_v19 }
 0x3e6   :  { %442 = vrot.lane.b32.xlu1 %v425_v57, %s6815_s4  ;;  %v428_v59 = vadd.f32 %v425_v57, %v7002_v21  ;;  %v5425_v60 = vmul.f32 -1.442695, %v429_v58 }
 0x3e8   :  { %v5424_v61 = vmul.f32 -1.442695, %v428_v59  ;;  %6499 = vpow2.f32 %v5425_v60 }
 0x3ea   :  { %6501 = vpow2.f32 %v5424_v61 }
 0x3f2   :  { %v6500_v62 = vpop.eup %6499 }
 0x3f3   :  { %v437_v0 = vadd.f32 1.0, %v6500_v62 }
 0x3f4   :  { %v6502_v63 = vpop.eup %6501 }
 0x3f5   :  { %v436_v1 = vadd.f32 1.0, %v6502_v63  ;;  %6503 = vrcp.f32 %v437_v0 }
 0x3f7   :  { %6505 = vrcp.f32 %v436_v1 }
 0x3ff   :  { %v6504_v2 = vpop.eup %6503 }
 0x400   :  { %v463_v22 = vsub.f32 1.0, %v6504_v2  ;;  %v478_v29 = vmul.f32 %v6504_v2, %v347_v50 }
 0x401   :  { %v6506_v5 = vpop.eup %6505 }
 0x402   :  { %v462_v23 = vsub.f32 1.0, %v6506_v5  ;;  %v477_v27 = vmul.f32 %v6506_v5, %v474_v24 }
 0x456   :  { %v445_v3 = vpop.permute.xlu0 %444 }
 0x457   :  { %v449_v4 = vmul.f32 %v6504_v2, %v445_v3 }
 0x458   :  { %v443_v7 = vpop.permute.xlu1 %442 }
 0x459   :  { %v448_v11 = vmul.f32 %v6506_v5, %v443_v7  ;;  %454 = vrot.lane.b32.xlu0 %v449_v4, %s6815_s4 }
 0x45b   :  { %452 = vrot.lane.b32.xlu1 %v448_v11, %s6815_s4 }
 0x4cb   :  { %v455_v12 = vpop.permute.xlu0 %454 }
 0x4cc   :  { %v459_v14 = vadd.f32 %v455_v12, %v6999_v19 }
 0x4cd   :  { %v453_v15 = vpop.permute.xlu1 %452 }
 0x4ce   :  { %6507 = vtanh.f32 %v459_v14  ;;  %v458_v16 = vadd.f32 %v453_v15, %v7002_v21 }
 0x4d0   :  { %6509 = vtanh.f32 %v458_v16 }
 0x4d8   :  { %v6508_v17 = vpop.eup %6507 }
 0x4d9   :  { %468 = vrot.lane.b32.xlu0 %v6508_v17, %s6816_s5 }
 0x4da   :  { %v6510_v18 = vpop.eup %6509 }
 0x4db   :  { %466 = vrot.lane.b32.xlu1 %v6510_v18, %s6816_s5 }
 0x54b   :  { %v469_v20 = vpop.permute.xlu0 %468 }
 0x54c   :  { %v473_v26 = vmul.f32 %v469_v20, %v463_v22 }
 0x54d   :  { %v467_v25 = vpop.permute.xlu1 %466 }
 0x54e   :  { %v472_v28 = vmul.f32 %v467_v25, %v462_v23  ;;  %v7040_v31 = vadd.f32 %v478_v29, %v473_v26 }
 0x550   :  { %v7038_v30 = vadd.f32 %v477_v27, %v472_v28  ;;  %v620_v63 = vrot.slane %v7040_v31, 7 }
 0x552   :  { %v492_v32 = vrot.slane %v7038_v30, 1  ;;  %v619_v2 = vrot.slane %v7038_v30, 7 }
 0x554   :  { %v493_v33 = vsel %vm348_vm3, %v7040_v31, %v492_v32 }
 0x555   :  { %494 = vrot.lane.b32.xlu1 %v493_v33, %s6816_s5 }
 0x5c7   :  { %v495_v34 = vpop.permute.xlu1 %494 }
 0x5c8   :  { %5773 = vmatmul.mubr.msk.f32.vlgmr.msra.gmra.mrb[0].mxu1 %vm208_vm4, %v495_v34 }
 0x5c9   :  { %6251 = vmatpush3.bf16.msra.mxu1 %v6962_v6  ;;  %5794 = vmatprep.mubr.msk.f32.mxu1 %vm6813_vm2, %v6814_v10 }
 0x5ca   :  { %6252 = vmatprep.subr.bf16.mxu1 %v6812_v8 }
 0x5cd   :  { %6254 = vmatpush3.bf16.msra.mxu1 %v6971_v9 }
 0x5ce   :  { %6261 = vmatprep.subr.bf16.mxu1 %v6812_v8 }
 0x69b   :  { %v564_v35 = vpop.f32.mrb[0].mxu1 }
 0x69c   :  { %v565_v36 = vadd.f32 %v6991_v13, %v564_v35  ;;  %v5774_v37 = vpop.f32.mrb[1].mxu1 }
 0x69e   :  { %v569_v38 = vrot.slane %v565_v36, 6  ;;  %v570_v39 = vrot.slane %v565_v36, 7 }
 0x6a0   :  { %589 = vrot.lane.b32.xlu1 %v570_v39, %s6815_s4  ;;  %587 = vrot.lane.b32.xlu0 %v569_v38, %s6815_s4  ;;  %v573_v40 = vadd.f32 %v569_v38, %v7002_v21  ;;  %v574_v41 = vadd.f32 %v570_v39, %v6999_v19 }
 0x6a2   :  { %v5427_v42 = vmul.f32 -1.442695, %v573_v40  ;;  %v5428_v43 = vmul.f32 -1.442695, %v574_v41 }
 0x6a4   :  { %6511 = vpow2.f32 %v5427_v42 }
 0x6a5   :  { %6513 = vpow2.f32 %v5428_v43 }
 0x6ae   :  { %v6512_v44 = vpop.eup %6511 }
 0x6af   :  { %v6514_v46 = vpop.eup %6513  ;;  %v581_v47 = vadd.f32 1.0, %v6512_v44 }
 0x6b0   :  { %v582_v48 = vadd.f32 1.0, %v6514_v46 }
 0x6b1   :  { %6515 = vrcp.f32 %v581_v47 }
 0x6b2   :  { %6517 = vrcp.f32 %v582_v48 }
 0x6bb   :  { %v6516_v49 = vpop.eup %6515 }
 0x6bc   :  { %v6518_v50 = vpop.eup %6517  ;;  %v607_v1 = vsub.f32 1.0, %v6516_v49  ;;  %v623_v7 = vmul.f32 %v6516_v49, %v619_v2 }
 0x6bd   :  { %v608_v62 = vsub.f32 1.0, %v6518_v50  ;;  %v624_v3 = vmul.f32 %v6518_v50, %v620_v63 }
 0x712   :  { %v590_v52 = vpop.permute.xlu1 %589  ;;  %v588_v53 = vpop.permute.xlu0 %587 }
 0x713   :  { %v594_v54 = vmul.f32 %v6518_v50, %v590_v52  ;;  %v593_v55 = vmul.f32 %v6516_v49, %v588_v53 }
 0x715   :  { %599 = vrot.lane.b32.xlu1 %v594_v54, %s6815_s4  ;;  %597 = vrot.lane.b32.xlu0 %v593_v55, %s6815_s4 }
 0x787   :  { %v600_v56 = vpop.permute.xlu1 %599  ;;  %v598_v57 = vpop.permute.xlu0 %597 }
 0x788   :  { %v604_v58 = vadd.f32 %v600_v56, %v6999_v19  ;;  %v603_v59 = vadd.f32 %v598_v57, %v7002_v21 }
 0x78a   :  { %6519 = vtanh.f32 %v604_v58 }
 0x78b   :  { %6521 = vtanh.f32 %v603_v59 }
 0x794   :  { %v6520_v60 = vpop.eup %6519 }
 0x795   :  { %v6522_v61 = vpop.eup %6521  ;;  %613 = vrot.lane.b32.xlu1 %v6520_v60, %s6816_s5 }
 0x796   :  { %611 = vrot.lane.b32.xlu0 %v6522_v61, %s6816_s5 }
 0x807   :  { %v614_v0 = vpop.permute.xlu1 %613 }
 0x808   :  { %v618_v4 = vmul.f32 %v614_v0, %v608_v62  ;;  %v612_v5 = vpop.permute.xlu0 %611 }
 0x809   :  { %v617_v11 = vmul.f32 %v612_v5, %v607_v1 }
 0x80a   :  { %v7066_v12 = vadd.f32 %v624_v3, %v618_v4 }
 0x80b   :  { %v7068_v14 = vadd.f32 %v623_v7, %v617_v11 }
 0x80c   :  { %v639_v15 = vrot.slane %v7066_v12, 1  ;;  %v767_v50 = vrot.slane %v7066_v12, 7 }
 0x80d   :  { %v638_v16 = vrot.slane %v7068_v14, 2  ;;  %v766_v54 = vrot.slane %v7068_v14, 7 }
 0x80f   :  { %v640_v17 = vsel %vm348_vm3, %v639_v15, %v638_v16 }
 0x810   :  { %641 = vrot.lane.b32.xlu0 %v640_v17, %s6816_s5 }
 0x882   :  { %v642_v18 = vpop.permute.xlu0 %641 }
 0x883   :  { %5784 = vmatmul.mubr.msk.f32.vlgmr.msra.gmra.mrb[6].mxu0 %vm208_vm4, %v642_v18 }
 0x884   :  { %6257 = vmatpush3.bf16.msra.mxu0 %v6962_v6  ;;  %5805 = vmatprep.mubr.msk.f32.mxu0 %vm6813_vm2, %v6814_v10 }
 0x885   :  { %6258 = vmatprep.subr.bf16.mxu0 %v6812_v8 }
 0x888   :  { %6260 = vmatpush3.bf16.msra.mxu0 %v6971_v9 }
 0x889   :  { %6267 = vmatprep.subr.bf16.mxu0 %v6812_v8 }
 0x956   :  { %v711_v20 = vpop.f32.mrb[6].mxu0 }
 0x957   :  { %v712_v22 = vadd.f32 %v6991_v13, %v711_v20  ;;  %v5785_v23 = vpop.f32.mrb[7].mxu0 }
 0x959   :  { %v716_v24 = vrot.slane %v712_v22, 5  ;;  %v717_v25 = vrot.slane %v712_v22, 6 }
 0x95b   :  { %736 = vrot.lane.b32.xlu0 %v717_v25, %s6815_s4  ;;  %734 = vrot.lane.b32.xlu1 %v716_v24, %s6815_s4  ;;  %v720_v26 = vadd.f32 %v716_v24, %v7002_v21  ;;  %v721_v27 = vadd.f32 %v717_v25, %v6999_v19 }
 0x95d   :  { %v5430_v28 = vmul.f32 -1.442695, %v720_v26  ;;  %v5431_v29 = vmul.f32 -1.442695, %v721_v27 }
 0x95f   :  { %6523 = vpow2.f32 %v5430_v28 }
 0x960   :  { %6525 = vpow2.f32 %v5431_v29 }
 0x969   :  { %v6524_v32 = vpop.eup %6523 }
 0x96a   :  { %v6526_v33 = vpop.eup %6525  ;;  %v728_v34 = vadd.f32 1.0, %v6524_v32 }
 0x96b   :  { %v729_v35 = vadd.f32 1.0, %v6526_v33 }
 0x96c   :  { %6527 = vrcp.f32 %v728_v34 }
 0x96d   :  { %6529 = vrcp.f32 %v729_v35 }
 0x976   :  { %v6528_v36 = vpop.eup %6527 }
 0x977   :  { %v6530_v37 = vpop.eup %6529  ;;  %v754_v53 = vsub.f32 1.0, %v6528_v36  ;;  %v770_v58 = vmul.f32 %v6528_v36, %v766_v54 }
 0x978   :  { %v755_v49 = vsub.f32 1.0, %v6530_v37  ;;  %v771_v55 = vmul.f32 %v6530_v37, %v767_v50 }
 0x9cd   :  { %v737_v38 = vpop.permute.xlu0 %736  ;;  %v735_v39 = vpop.permute.xlu1 %734 }
 0x9ce   :  { %v741_v40 = vmul.f32 %v6530_v37, %v737_v38  ;;  %v740_v41 = vmul.f32 %v6528_v36, %v735_v39 }
 0x9d0   :  { %746 = vrot.lane.b32.xlu0 %v741_v40, %s6815_s4  ;;  %744 = vrot.lane.b32.xlu1 %v740_v41, %s6815_s4 }
 0xa42   :  { %v747_v42 = vpop.permute.xlu0 %746  ;;  %v745_v43 = vpop.permute.xlu1 %744 }
 0xa43   :  { %v751_v44 = vadd.f32 %v747_v42, %v6999_v19  ;;  %v750_v46 = vadd.f32 %v745_v43, %v7002_v21 }
 0xa45   :  { %6531 = vtanh.f32 %v751_v44 }
 0xa46   :  { %6533 = vtanh.f32 %v750_v46 }
 0xa4f   :  { %v6532_v47 = vpop.eup %6531 }
 0xa50   :  { %v6534_v48 = vpop.eup %6533  ;;  %760 = vrot.lane.b32.xlu0 %v6532_v47, %s6816_s5 }
 0xa51   :  { %758 = vrot.lane.b32.xlu1 %v6534_v48, %s6816_s5 }
 0xac2   :  { %v761_v52 = vpop.permute.xlu0 %760 }
 0xac3   :  { %v765_v56 = vmul.f32 %v761_v52, %v755_v49  ;;  %v759_v57 = vpop.permute.xlu1 %758 }
 0xac4   :  { %v764_v59 = vmul.f32 %v759_v57, %v754_v53 }
 0xac5   :  { %v7094_v60 = vadd.f32 %v771_v55, %v765_v56 }
 0xac6   :  { %v7096_v61 = vadd.f32 %v770_v58, %v764_v59 }
 0xac7   :  { %v786_v62 = vrot.slane %v7094_v60, 2  ;;  %v914_v39 = vrot.slane %v7094_v60, 7 }
 0xac8   :  { %v785_v63 = vrot.slane %v7096_v61, 3  ;;  %v913_v42 = vrot.slane %v7096_v61, 7 }
 0xaca   :  { %v787_v0 = vsel %vm348_vm3, %v786_v62, %v785_v63 }
 0xacb   :  { %788 = vrot.lane.b32.xlu1 %v787_v0, %s6816_s5 }
 0xb3d   :  { %v789_v1 = vpop.permute.xlu1 %788 }
 0xb3e   :  { %5795 = vmatmul.mubr.msk.f32.vlgmr.msra.gmra.mrb[2].mxu1 %vm208_vm4, %v789_v1 }
 0xb3f   :  { %6263 = vmatpush3.bf16.msra.mxu1 %v6962_v6  ;;  %5816 = vmatprep.mubr.msk.f32.mxu1 %vm6813_vm2, %v6814_v10 }
 0xb40   :  { %6264 = vmatprep.subr.bf16.mxu1 %v6812_v8 }
 0xb43   :  { %6266 = vmatpush3.bf16.msra.mxu1 %v6971_v9 }
 0xc11   :  { %v858_v2 = vpop.f32.mrb[2].mxu1 }
 0xc12   :  { %v859_v3 = vadd.f32 %v6991_v13, %v858_v2  ;;  %v5796_v4 = vpop.f32.mrb[3].mxu1 }
 0xc14   :  { %v863_v5 = vrot.slane %v859_v3, 4  ;;  %v864_v7 = vrot.slane %v859_v3, 5 }
 0xc16   :  { %883 = vrot.lane.b32.xlu1 %v864_v7, %s6815_s4  ;;  %881 = vrot.lane.b32.xlu0 %v863_v5, %s6815_s4  ;;  %v867_v11 = vadd.f32 %v863_v5, %v7002_v21  ;;  %v868_v15 = vadd.f32 %v864_v7, %v6999_v19 }
 0xc18   :  { %v5433_v16 = vmul.f32 -1.442695, %v867_v11  ;;  %v5434_v17 = vmul.f32 -1.442695, %v868_v15 }
 0xc1a   :  { %6535 = vpow2.f32 %v5433_v16 }
 0xc1b   :  { %6537 = vpow2.f32 %v5434_v17 }
 0xc24   :  { %v6536_v18 = vpop.eup %6535 }
 0xc25   :  { %v6538_v20 = vpop.eup %6537  ;;  %v875_v22 = vadd.f32 1.0, %v6536_v18 }
 0xc26   :  { %v876_v23 = vadd.f32 1.0, %v6538_v20 }
 0xc27   :  { %6539 = vrcp.f32 %v875_v22 }
 0xc28   :  { %6541 = vrcp.f32 %v876_v23 }
 0xc31   :  { %v6540_v24 = vpop.eup %6539 }
 0xc32   :  { %v6542_v25 = vpop.eup %6541  ;;  %v901_v41 = vsub.f32 1.0, %v6540_v24  ;;  %v917_v47 = vmul.f32 %v6540_v24, %v913_v42 }
 0xc33   :  { %v902_v38 = vsub.f32 1.0, %v6542_v25  ;;  %v918_v43 = vmul.f32 %v6542_v25, %v914_v39 }
 0xc88   :  { %v884_v26 = vpop.permute.xlu1 %883  ;;  %v882_v27 = vpop.permute.xlu0 %881 }
 0xc89   :  { %v888_v28 = vmul.f32 %v6542_v25, %v884_v26  ;;  %v887_v29 = vmul.f32 %v6540_v24, %v882_v27 }
 0xc8b   :  { %893 = vrot.lane.b32.xlu1 %v888_v28, %s6815_s4  ;;  %891 = vrot.lane.b32.xlu0 %v887_v29, %s6815_s4 }
 0xcfd   :  { %v894_v32 = vpop.permute.xlu1 %893  ;;  %v892_v33 = vpop.permute.xlu0 %891 }
 0xcfe   :  { %v898_v34 = vadd.f32 %v894_v32, %v6999_v19  ;;  %v897_v35 = vadd.f32 %v892_v33, %v7002_v21 }
 0xd00   :  { %6543 = vtanh.f32 %v898_v34 }
 0xd01   :  { %6545 = vtanh.f32 %v897_v35 }
 0xd0a   :  { %v6544_v36 = vpop.eup %6543 }
 0xd0b   :  { %v6546_v37 = vpop.eup %6545  ;;  %907 = vrot.lane.b32.xlu1 %v6544_v36, %s6816_s5 }
 0xd0c   :  { %905 = vrot.lane.b32.xlu0 %v6546_v37, %s6816_s5 }
 0xd7d   :  { %v908_v40 = vpop.permute.xlu1 %907 }
 0xd7e   :  { %v912_v44 = vmul.f32 %v908_v40, %v902_v38  ;;  %v906_v46 = vpop.permute.xlu0 %905 }
 0xd7f   :  { %v911_v48 = vmul.f32 %v906_v46, %v901_v41 }
 0xd80   :  { %v7121_v49 = vadd.f32 %v918_v43, %v912_v44 }
 0xd81   :  { %v7123_v50 = vadd.f32 %v917_v47, %v911_v48 }
 0xd82   :  { %v933_v52 = vrot.slane %v7121_v49, 3  ;;  %v1061_v27 = vrot.slane %v7121_v49, 7 }
 0xd83   :  { %v932_v53 = vrot.slane %v7123_v50, 4  ;;  %v1060_v32 = vrot.slane %v7123_v50, 7 }
 0xd85   :  { %v934_v54 = vsel %vm348_vm3, %v933_v52, %v932_v53 }
 0xd86   :  { %935 = vrot.lane.b32.xlu0 %v934_v54, %s6816_s5 }
 0xdf8   :  { %v936_v55 = vpop.permute.xlu0 %935 }
 0xdf9   :  { %5806 = vmatmul.mubr.msk.f32.vlgmr.msra.gmra.mrb[8].mxu0 %vm208_vm4, %v936_v55 }
 0xdfa   :  { %6269 = vmatpush3.bf16.msra.mxu0 %v6962_v6  ;;  %5827 = vmatprep.mubr.msk.f32.mxu0 %vm6813_vm2, %v6814_v10 }
 0xdfb   :  { %6270 = vmatprep.subr.bf16.mxu0 %v6812_v8 }
 0xdfe   :  { %6272 = vmatpush3.bf16.msra.mxu0 %v6971_v9 }
 0xdff   :  { %6281 = vmatprep.subr.bf16.mxu0 %v6812_v8 }
 0xecc   :  { %v1005_v56 = vpop.f32.mrb[8].mxu0 }
 0xecd   :  { %v1006_v57 = vadd.f32 %v6991_v13, %v1005_v56  ;;  %v5807_v58 = vpop.f32.mrb[9].mxu0 }
 0xecf   :  { %v1010_v59 = vrot.slane %v1006_v57, 3  ;;  %v1011_v62 = vrot.slane %v1006_v57, 4 }
 0xed1   :  { %1030 = vrot.lane.b32.xlu0 %v1011_v62, %s6815_s4  ;;  %1028 = vrot.lane.b32.xlu1 %v1010_v59, %s6815_s4  ;;  %v1014_v6 = vadd.f32 %v1010_v59, %v7002_v21  ;;  %v1015_v63 = vadd.f32 %v1011_v62, %v6999_v19 }
 0xed3   :  { %v5436_v0 = vmul.f32 -1.442695, %v1014_v6  ;;  %v5437_v1 = vmul.f32 -1.442695, %v1015_v63 }
 0xed5   :  { %6547 = vpow2.f32 %v5436_v0 }
 0xed6   :  { %6549 = vpow2.f32 %v5437_v1 }
 0xedf   :  { %v6548_v9 = vpop.eup %6547 }
 0xee0   :  { %v6550_v2 = vpop.eup %6549  ;;  %v1022_v3 = vadd.f32 1.0, %v6548_v9 }
 0xee1   :  { %v1023_v4 = vadd.f32 1.0, %v6550_v2 }
 0xee2   :  { %6551 = vrcp.f32 %v1022_v3 }
 0xee3   :  { %6553 = vrcp.f32 %v1023_v4 }
 0xeec   :  { %v6552_v5 = vpop.eup %6551 }
 0xeed   :  { %v6554_v7 = vpop.eup %6553  ;;  %v1048_v29 = vsub.f32 1.0, %v6552_v5  ;;  %v1064_v36 = vmul.f32 %v6552_v5, %v1060_v32 }
 0xeee   :  { %v1049_v26 = vsub.f32 1.0, %v6554_v7  ;;  %v1065_v33 = vmul.f32 %v6554_v7, %v1061_v27 }
 0xf43   :  { %v1031_v11 = vpop.permute.xlu0 %1030  ;;  %v1029_v15 = vpop.permute.xlu1 %1028 }
 0xf44   :  { %v1035_v16 = vmul.f32 %v6554_v7, %v1031_v11  ;;  %v1034_v17 = vmul.f32 %v6552_v5, %v1029_v15 }
 0xf46   :  { %1040 = vrot.lane.b32.xlu0 %v1035_v16, %s6815_s4  ;;  %1038 = vrot.lane.b32.xlu1 %v1034_v17, %s6815_s4 }
 0xfb8   :  { %v1041_v18 = vpop.permute.xlu0 %1040  ;;  %v1039_v20 = vpop.permute.xlu1 %1038 }
 0xfb9   :  { %v1045_v22 = vadd.f32 %v1041_v18, %v6999_v19  ;;  %v1044_v23 = vadd.f32 %v1039_v20, %v7002_v21 }
 0xfbb   :  { %6555 = vtanh.f32 %v1045_v22 }
 0xfbc   :  { %6557 = vtanh.f32 %v1044_v23 }
 0xfc5   :  { %v6556_v24 = vpop.eup %6555 }
 0xfc6   :  { %v6558_v25 = vpop.eup %6557  ;;  %1054 = vrot.lane.b32.xlu0 %v6556_v24, %s6816_s5 }
 0xfc7   :  { %1052 = vrot.lane.b32.xlu1 %v6558_v25, %s6816_s5 }
0x1038   :  { %v1055_v28 = vpop.permute.xlu0 %1054 }
0x1039   :  { %v1059_v34 = vmul.f32 %v1055_v28, %v1049_v26  ;;  %v1053_v35 = vpop.permute.xlu1 %1052 }
0x103a   :  { %v1058_v37 = vmul.f32 %v1053_v35, %v1048_v29 }
0x103b   :  { %v7149_v38 = vadd.f32 %v1065_v33, %v1059_v34 }
0x103c   :  { %v7151_v39 = vadd.f32 %v1064_v36, %v1058_v37 }
0x103d   :  { %v1080_v40 = vrot.slane %v7149_v38, 4  ;;  %v1208_v17 = vrot.slane %v7149_v38, 7 }
0x103e   :  { %v1079_v41 = vrot.slane %v7151_v39, 5  ;;  %v1207_v22 = vrot.slane %v7151_v39, 7 }
0x1040   :  { %v1081_v42 = vsel %vm348_vm3, %v1080_v40, %v1079_v41 }
0x1041   :  { %1082 = vrot.lane.b32.xlu1 %v1081_v42, %s6816_s5 }
0x10b3   :  { %v1083_v43 = vpop.permute.xlu1 %1082 }
0x10b4   :  { %5817 = vmatmul.mubr.msk.f32.vlgmr.msra.gmra.mrb[4].mxu1 %vm208_vm4, %v1083_v43 }
0x1187   :  { %v1152_v44 = vpop.f32.mrb[4].mxu1 }
0x1188   :  { %v1153_v46 = vadd.f32 %v6991_v13, %v1152_v44  ;;  %v5818_v47 = vpop.f32.mrb[5].mxu1 }
0x118a   :  { %v1157_v48 = vrot.slane %v1153_v46, 2  ;;  %v1158_v52 = vrot.slane %v1153_v46, 3 }
0x118c   :  { %1177 = vrot.lane.b32.xlu1 %v1158_v52, %s6815_s4  ;;  %1175 = vrot.lane.b32.xlu0 %v1157_v48, %s6815_s4  ;;  %v1161_v53 = vadd.f32 %v1157_v48, %v7002_v21  ;;  %v1162_v54 = vadd.f32 %v1158_v52, %v6999_v19 }
0x118e   :  { %v5439_v55 = vmul.f32 -1.442695, %v1161_v53  ;;  %v5440_v56 = vmul.f32 -1.442695, %v1162_v54 }
0x1190   :  { %6559 = vpow2.f32 %v5439_v55 }
0x1191   :  { %6561 = vpow2.f32 %v5440_v56 }
0x119a   :  { %v6560_v57 = vpop.eup %6559 }
0x119b   :  { %v6562_v58 = vpop.eup %6561  ;;  %v1169_v59 = vadd.f32 1.0, %v6560_v57 }
0x119c   :  { %v1170_v62 = vadd.f32 1.0, %v6562_v58 }
0x119d   :  { %6563 = vrcp.f32 %v1169_v59 }
0x119e   :  { %6565 = vrcp.f32 %v1170_v62 }
0x11a7   :  { %v6564_v6 = vpop.eup %6563 }
0x11a8   :  { %v6566_v63 = vpop.eup %6565  ;;  %v1195_v20 = vsub.f32 1.0, %v6564_v6  ;;  %v1211_v26 = vmul.f32 %v6564_v6, %v1207_v22 }
0x11a9   :  { %v1196_v16 = vsub.f32 1.0, %v6566_v63  ;;  %v1212_v23 = vmul.f32 %v6566_v63, %v1208_v17 }
0x11fe   :  { %v1178_v0 = vpop.permute.xlu1 %1177  ;;  %v1176_v1 = vpop.permute.xlu0 %1175 }
0x11ff   :  { %v1182_v9 = vmul.f32 %v6566_v63, %v1178_v0  ;;  %v1181_v2 = vmul.f32 %v6564_v6, %v1176_v1 }
0x1201   :  { %1187 = vrot.lane.b32.xlu1 %v1182_v9, %s6815_s4  ;;  %1185 = vrot.lane.b32.xlu0 %v1181_v2, %s6815_s4 }
0x1273   :  { %v1188_v3 = vpop.permute.xlu1 %1187  ;;  %v1186_v4 = vpop.permute.xlu0 %1185 }
0x1274   :  { %v1192_v5 = vadd.f32 %v1188_v3, %v6999_v19  ;;  %v1191_v7 = vadd.f32 %v1186_v4, %v7002_v21 }
0x1276   :  { %6567 = vtanh.f32 %v1192_v5 }
0x1277   :  { %6569 = vtanh.f32 %v1191_v7 }
0x1280   :  { %v6568_v11 = vpop.eup %6567 }
0x1281   :  { %v6570_v15 = vpop.eup %6569  ;;  %1201 = vrot.lane.b32.xlu1 %v6568_v11, %s6816_s5 }
0x1282   :  { %1199 = vrot.lane.b32.xlu0 %v6570_v15, %s6816_s5 }
0x12f3   :  { %v1202_v18 = vpop.permute.xlu1 %1201 }
0x12f4   :  { %v1206_v24 = vmul.f32 %v1202_v18, %v1196_v16  ;;  %v1200_v25 = vpop.permute.xlu0 %1199 }
0x12f5   :  { %v1205_v27 = vmul.f32 %v1200_v25, %v1195_v20 }
0x12f6   :  { %v7171_v28 = vadd.f32 %v1212_v23, %v1206_v24 }
0x12f7   :  { %v7173_v29 = vadd.f32 %v1211_v26, %v1205_v27 }
0x12f8   :  { %v1227_v32 = vrot.slane %v7171_v28, 5 }
0x12f9   :  { %v1226_v33 = vrot.slane %v7173_v29, 6  ;;  %v1354_v4 = vrot.slane %v7173_v29, 7 }
0x12fb   :  { %v1228_v34 = vsel %vm348_vm3, %v1227_v32, %v1226_v33 }
0x12fc   :  { %1229 = vrot.lane.b32.xlu0 %v1228_v34, %s6816_s5 }
0x136e   :  { %v1230_v35 = vpop.permute.xlu0 %1229 }
0x136f   :  { %5828 = vmatmul.mubr.msk.f32.vlgmr.msra.gmra.mrb[10].mxu0 %vm208_vm4, %v1230_v35 }
0x1370   :  { %5849 = vmatprep.mubr.msk.f32.mxu0 %vm6813_vm2, %v6814_v10 }
0x1442   :  { %v1299_v36 = vpop.f32.mrb[10].mxu0 }
0x1443   :  { %v1300_v37 = vadd.f32 %v6991_v13, %v1299_v36  ;;  %v5829_v40 = vpop.f32.mrb[11].mxu0 }
0x1445   :  { %v1304_v41 = vrot.slane %v1300_v37, 1  ;;  %v1305_v42 = vrot.slane %v1300_v37, 2 }
0x1447   :  { %1324 = vrot.lane.b32.xlu0 %v1305_v42, %s6815_s4  ;;  %1322 = vrot.lane.b32.xlu1 %v1304_v41, %s6815_s4  ;;  %v1308_v43 = vadd.f32 %v1304_v41, %v7002_v21  ;;  %v1309_v44 = vadd.f32 %v1305_v42, %v6999_v19 }
0x1449   :  { %v5442_v46 = vmul.f32 -1.442695, %v1308_v43  ;;  %v5443_v47 = vmul.f32 -1.442695, %v1309_v44 }
0x144b   :  { %6571 = vpow2.f32 %v5442_v46 }
0x144c   :  { %6573 = vpow2.f32 %v5443_v47 }
0x1455   :  { %v6572_v48 = vpop.eup %6571 }
0x1456   :  { %v6574_v52 = vpop.eup %6573  ;;  %v1316_v53 = vadd.f32 1.0, %v6572_v48  ;;  %v6817_v48 = vmov 1966171168  }
0x1457   :  { %v1317_v54 = vadd.f32 1.0, %v6574_v52  ;;  %v1572_v52 = vunpack.c.l.s4 %v6817_v48  ;;  %v7355_v48 = vld [vmem:[%s8168_s10] sm:$0xf] }
0x1458   :  { %6575 = vrcp.f32 %v1316_v53  ;;  %v1574_v53 = vlaneseq }
0x1459   :  { %6577 = vrcp.f32 %v1317_v54  ;;  %v1573_v54 = vunpack.c.0.s8 %v1572_v52 }
0x1462   :  { %v6576_v13 = vpop.eup %6575 }
0x1463   :  { %v6578_v55 = vpop.eup %6577  ;;  %v1342_v3 = vsub.f32 1.0, %v6576_v13  ;;  %v1358_v15 = vmul.f32 %v6576_v13, %v1354_v4  ;;  %v1628_v4 = vand.u32 127, %v1574_v53 }
0x14b9   :  { %v1325_v56 = vpop.permute.xlu0 %1324  ;;  %v1323_v57 = vpop.permute.xlu1 %1322 }
0x14ba   :  { %v1329_v58 = vmul.f32 %v6578_v55, %v1325_v56  ;;  %v1328_v59 = vmul.f32 %v6576_v13, %v1323_v57  ;;  %v1575_v13 = vshrl.u32 %v1574_v53, 7 }
0x14bc   :  { %1334 = vrot.lane.b32.xlu0 %v1329_v58, %s6815_s4  ;;  %1332 = vrot.lane.b32.xlu1 %v1328_v59, %s6815_s4 }
0x152e   :  { %v1335_v62 = vpop.permute.xlu0 %1334  ;;  %v1333_v6 = vpop.permute.xlu1 %1332 }
0x152f   :  { %v1339_v63 = vadd.f32 %v1335_v62, %v6999_v19  ;;  %v1338_v0 = vadd.f32 %v1333_v6, %v7002_v21  ;;  %v1460_v19 = vld [vmem:[%s8165_s7] sm:$0xff]  ;;  %v1461_v21 = vld [vmem:[%s8165_s7 + $0x8] sm:$0xff] }
0x1531   :  { %6579 = vtanh.f32 %v1339_v63  ;;  %v7298_v63 = vsub.s32 0, %v1575_v13 }
0x1532   :  { %6581 = vtanh.f32 %v1338_v0 }
0x153b   :  { %v6580_v1 = vpop.eup %6579 }
0x153c   :  { %v6582_v9 = vpop.eup %6581  ;;  %1348 = vrot.lane.b32.xlu0 %v6580_v1, %s6816_s5 }
0x153d   :  { %1346 = vrot.lane.b32.xlu1 %v6582_v9, %s6816_s5 }
0x1540   :  { %483 = vrot.lane.b32.xlu0 %v7038_v30, %s6816_s5  ;;  %v1463_v30 = vld [vmem:[%s8165_s7 + $0x18] sm:$0xff] }
0x1541   :  { %338 = vrot.lane.b32.xlu1 %v7014_v51, %s6816_s5  ;;  %v7219_v51 = vpack.c.bf16 %v1461_v21, %v1460_v19 }
0x1543   :  { %6283 = vmatpush3.bf16.msra.mxu0 %v7219_v51 }
0x1544   :  { %776 = vrot.lane.b32.xlu0 %v7096_v61, %s6816_s5  ;;  %6284 = vmatprep.subr.bf16.mxu0 %v6812_v8  ;;  %v1377_v61 = vld [vmem:[%s8166_s8 + $0x10] sm:$0xff] }
0x1545   :  { %629 = vrot.lane.b32.xlu1 %v7068_v14, %s6816_s5  ;;  %v1376_v14 = vld [vmem:[%s8166_s8 + $0x8] sm:$0xff] }
0x1548   :  { %1070 = vrot.lane.b32.xlu0 %v7151_v39, %s6816_s5  ;;  %v1355_v39 = vrot.slane %v7171_v28, 7 }
0x1549   :  { %923 = vrot.lane.b32.xlu1 %v7123_v50, %s6816_s5 }
0x154a   :  { %v1359_v5 = vmul.f32 %v6578_v55, %v1355_v39 }
0x154c   :  { %485 = vrot.lane.b32.xlu0 %v7040_v31, %s6816_s5 }
0x154d   :  { %1217 = vrot.lane.b32.xlu1 %v7173_v29, %s6816_s5 }
0x1550   :  { %778 = vrot.lane.b32.xlu0 %v7094_v60, %s6816_s5 }
0x1551   :  { %340 = vrot.lane.b32.xlu1 %v7011_v45, %s6816_s5  ;;  %v1462_v45 = vld [vmem:[%s8165_s7 + $0x10] sm:$0xff] }
0x1552   :  { %v7237_v31 = vpack.c.bf16 %v1463_v30, %v1462_v45  ;;  %v7308_v30 = vld [vmem:[#allocation9] ss:$0 sm:$0xff] }
0x1554   :  { %1072 = vrot.lane.b32.xlu0 %v7149_v38, %s6816_s5  ;;  %6286 = vmatpush3.bf16.msra.mxu0 %v7237_v31  ;;  %v1343_v38 = vsub.f32 1.0, %v6578_v55  ;;  %v7290_v55 = vsub.s32 %v1573_v54, %v1575_v13 }
0x1555   :  { %631 = vrot.lane.b32.xlu1 %v7066_v12, %s6816_s5  ;;  %v1375_v12 = vld [vmem:[%s8166_s8] sm:$0xff]  ;;  %5863 = vmatprep.subr.mxu0 %v6814_v10 }
0x1556   :  { %v6273_v60 = vpack.c.bf16 %v1376_v14, %v1375_v12 }
0x1558   :  { %6274 = vmatprep.subr.bf16.mxu1 %v6273_v60 }
0x1559   :  { %925 = vrot.lane.b32.xlu1 %v7121_v49, %s6816_s5  ;;  %v1378_v49 = vld [vmem:[%s8166_s8 + $0x18] sm:$0xff]  ;;  %6276 = vmatpush3.bf16.msra.mxu1 %v6273_v60 }
0x155a   :  { %v6277_v50 = vpack.c.bf16 %v1378_v49, %v1377_v61 }
0x155c   :  { %6278 = vmatprep.subr.bf16.mxu1 %v6277_v50 }
0x155d   :  { %1219 = vrot.lane.b32.xlu1 %v7171_v28, %s6816_s5  ;;  %6280 = vmatpush3.bf16.msra.mxu1 %v6277_v50 }
0x155e   :  { %6287 = vmatprep.subr.bf16.mxu1 %v6812_v8 }
0x15ae   :  { %v1349_v2 = vpop.permute.xlu0 %1348 }
0x15af   :  { %v1353_v7 = vmul.f32 %v1349_v2, %v1343_v38  ;;  %v1347_v11 = vpop.permute.xlu1 %1346 }
0x15b0   :  { %v1352_v16 = vmul.f32 %v1347_v11, %v1342_v3 }
0x15b1   :  { %v1361_v17 = vadd.f32 %v1359_v5, %v1353_v7  ;;  %v7314_v5 = vsub.s32 %v1628_v4, %v1575_v13  ;;  %v7388_v4 = vld [vmem:[%s8170_s12] ss:$0 sm:$0xff] }
0x15b2   :  { %v1360_v18 = vadd.f32 %v1358_v15, %v1352_v16  ;;  %v484_v20 = vpop.permute.xlu0 %483 }
0x15b3   :  { %v1485_v22 = vrot.slane %v1361_v17, 6  ;;  %490 = vst.msk [vmem:[#allocation2] sm:$0x2] %vm489_vm5, %v484_v20  ;;  %v339_v23 = vpop.permute.xlu1 %338  ;;  %v6818_v20 = vmov 0  }
0x15b4   :  { %v1484_v24 = vrot.slane %v1360_v18, 7  ;;  %345 = vst.msk [vmem:[#allocation2] sm:$0x1] %vm344_vm6, %v339_v23  ;;  %1364 = vrot.lane.b32.xlu0 %v1360_v18, %s6816_s5  ;;  %6486 = vset.pattern.permute.xlu1 %v6818_v20  ;;  %v7320_v23 = vsub.s32 1, %v1575_v13 }
0x15b5   :  { %6485 = vset.pattern.permute.xlu0 %v6818_v20 }
0x15b6   :  { %v777_v25 = vpop.permute.xlu0 %776  ;;  %v7260_v26 = vsel %vm348_vm3, %v1485_v22, %v1484_v24 }
0x15b7   :  { %783 = vst.msk [vmem:[#allocation2] sm:$0x8] %vm782_vm7, %v777_v25  ;;  %1487 = vrot.lane.b32.xlu1 %v7260_v26, %s6816_s5  ;;  %v630_v27 = vpop.permute.xlu1 %629 }
0x15b8   :  { %636 = vst.msk [vmem:[#allocation2] sm:$0x4] %vm635_vm8, %v630_v27  ;;  %1366 = vrot.lane.b32.xlu0 %v1361_v17, %s6816_s5 }
0x15ba   :  { %v1071_v28 = vpop.permute.xlu0 %1070 }
0x15bb   :  { %v924_v29 = vpop.permute.xlu1 %923  ;;  %1077 = vst.msk [vmem:[#allocation2] sm:$0x20] %vm1076_vm9, %v1071_v28 }
0x15bc   :  { %930 = vst.msk [vmem:[#allocation2] sm:$0x10] %vm929_vm10, %v924_v29 }
0x15be   :  { %v486_v32 = vpop.permute.xlu0 %485 }
0x15bf   :  { %491 = vst.msk [vmem:[#allocation2 + $0x8] sm:$0x2] %vm489_vm5, %v486_v32  ;;  %v1218_v33 = vpop.permute.xlu1 %1217  ;;  %v5447_v32 = vld [vmem:[%s8171_s13] ss:$0 sm:$0xff]  ;;  %vm1994_vm5 = vcmask 24576   ;;  %s2490_s13 = ssub.f32 1.0, %s2486_s20 }
0x15c0   :  { %1224 = vst.msk [vmem:[#allocation2] sm:$0x40] %vm1223_vm11, %v1218_v33  ;;  %v1466_v33 = vld [vmem:[%s8169_s11] sm:$0xff] }
0x15c2   :  { %v779_v34 = vpop.permute.xlu0 %778 }
0x15c3   :  { %784 = vst.msk [vmem:[#allocation2 + $0x8] sm:$0x8] %vm782_vm7, %v779_v34  ;;  %v341_v35 = vpop.permute.xlu1 %340  ;;  %v1467_v34 = vld [vmem:[%s8169_s11 + $0x8] sm:$0xff] }
0x15c4   :  { %346 = vst.msk [vmem:[#allocation2 + $0x8] sm:$0x1] %vm344_vm6, %v341_v35  ;;  %v7334_v35 = vpack.c.bf16 %v1467_v34, %v1466_v33  ;;  %v1472_v33 = vld [vmem:[%s8172_s14] sm:$0xff]  ;;  %v1473_v34 = vld [vmem:[%s8172_s14 + $0x8] sm:$0xff] }
0x15c6   :  { %v1073_v36 = vpop.permute.xlu0 %1072 }
0x15c7   :  { %1078 = vst.msk [vmem:[#allocation2 + $0x8] sm:$0x20] %vm1076_vm9, %v1073_v36  ;;  %v632_v37 = vpop.permute.xlu1 %631  ;;  %v6711_v36 = vld [vmem:[%s8159_s1] sm:$0xff] }
0x15c8   :  { %637 = vst.msk [vmem:[#allocation2 + $0x8] sm:$0x4] %vm635_vm8, %v632_v37  ;;  %v1758_v37 = vrot.slane %v6711_v36, 7  ;;  %v1474_v36 = vld [vmem:[%s8172_s14 + $0x10] sm:$0xff] }
0x15cb   :  { %v926_v40 = vpop.permute.xlu1 %925 }
0x15cc   :  { %931 = vst.msk [vmem:[#allocation2 + $0x8] sm:$0x10] %vm929_vm10, %v926_v40  ;;  %v6712_v40 = vld [vmem:[%s8159_s1 + $0x8] sm:$0xff]  ;;  %s2000_s1 = scvt.s32.f32 %s1999_s23 }
0x15cd   :  { %s2971_s23 = scalar_select %p2970_p3, 1, 0 }
0x15cf   :  { %v1220_v41 = vpop.permute.xlu1 %1219 }
0x15d0   :  { %1225 = vst.msk [vmem:[#allocation2 + $0x8] sm:$0x40] %vm1223_vm11, %v1220_v41  ;;  %v1759_v41 = vrot.slane %v6712_v40, 6  ;;  %v1475_v40 = vld [vmem:[%s8172_s14 + $0x18] sm:$0xff] }
0x15d2   :  { %v1760_v52 = vsel %vm348_vm3, %v1759_v41, %v1758_v37  ;;  %v7401_v37 = vpack.c.bf16 %v1473_v34, %v1472_v33  ;;  %v7407_v41 = vpack.c.bf16 %v1475_v40, %v1474_v36 }
0x1626   :  { %v1365_v42 = vpop.permute.xlu0 %1364 }
0x1627   :  { %1371 = vst.msk [vmem:[#allocation2] sm:$0x80] %vm1370_vm12, %v1365_v42  ;;  %v1468_v42 = vld [vmem:[%s8169_s11 + $0x10] sm:$0xff] }
0x1629   :  { %v1488_v43 = vpop.permute.xlu1 %1487 }
0x162a   :  { %v1367_v44 = vpop.permute.xlu0 %1366  ;;  %5850 = vmatmul.mubr.msk.f32.vlgmr.msra.gmra.mrb[12].mxu0 %vm208_vm4, %v1488_v43  ;;  %v1469_v43 = vld [vmem:[%s8169_s11 + $0x18] sm:$0xff]  ;;  %s2004_s11 = ssub.f32 1.0, %s2000_s1 }
0x162b   :  { %1372 = vst.msk [vmem:[#allocation2 + $0x8] sm:$0x80] %vm1370_vm12, %v1367_v44  ;;  %5865 = vmatprep.mubr.msk.f32.mxu0 %vm6813_vm2, %v6814_v10  ;;  %v7350_v44 = vpack.c.bf16 %v1469_v43, %v1468_v42  ;;  %5864 = vmatpush3.msk.msra.mxu0 %vm123_vm0, %v7355_v48  ;;  %v1476_v43 = vld [vmem:[%s8172_s14 + $0x20] sm:$0xff] }
0x162c   :  { %6293 = vmatprep.subr.bf16.mxu0 %v6812_v8 }
0x162e   :  { %v7280_v46 = vld [vmem:[#allocation2] sm:$0xff]  ;;  %5866 = vmatmul.mubr.msk.f32.vlgmr.msra.gmra.mrb[14].mxu0 %vm116_vm1, %v1760_v52 }
0x162f   :  { %5838 = vmatprep.mubr.msk.f32.mxu1 %vm208_vm4, %v7280_v46  ;;  %5886 = vmatprep.mubr.msk.f32.mxu0 %vm6813_vm2, %v6814_v10 }
0x1630   :  { %6295 = vmatpush3.bf16.msra.mxu0 %v7401_v37 }
0x1631   :  { %6296 = vmatprep.subr.bf16.mxu0 %v6812_v8 }
0x1632   :  { %v7284_v47 = vld [vmem:[#allocation2 + $0x8] sm:$0xff] }
0x1633   :  { %5839 = vmatmul.mubr.msk.f32.vlgmr.msra.gmra.mrb[6].mxu1 %vm208_vm4, %v7284_v47 }
0x1634   :  { %5860 = vmatprep.mubr.msk.f32.mxu1 %vm6813_vm2, %v6814_v10  ;;  %6289 = vmatpush3.bf16.msra.mxu1 %v7334_v35 }
0x1635   :  { %6290 = vmatprep.subr.bf16.mxu1 %v6812_v8  ;;  %6298 = vmatpush3.bf16.msra.mxu0 %v7407_v41 }
0x1636   :  { %6299 = vmatprep.subr.bf16.mxu0 %v6812_v8 }
0x1638   :  { %6292 = vmatpush3.bf16.msra.mxu1 %v7350_v44 }
0x1639   :  { %6305 = vmatprep.subr.bf16.mxu1 %v6812_v8 }
0x16fd   :  { %v7292_v56 = vpop.f32.mrb[12].mxu0 }
0x16fe   :  { %v1577_v57 = vrot.slane %v7292_v56, %v7290_v55  ;;  %v5851_v58 = vpop.f32.mrb[13].mxu0 }
0x1700   :  { %v1578_v59 = vcombine.high %v1577_v57, %v1577_v57  ;;  %v1585_v62 = vrot.slane %v1577_v57, %v7290_v55 }
0x1702   :  { %v1592_v6 = vrot.slane %v1578_v59, %v7290_v55  ;;  %v1596_v1 = vrot.slane %v1585_v62, %v7298_v63 }
0x1704   :  { %v1600_v0 = vrot.slane %v1592_v6, %v7298_v63 }
0x1706   :  { %v7302_v9 = vpop.f32.mrb[6].mxu1 }
0x1707   :  { %v7304_v19 = vpop.f32.mrb[7].mxu1  ;;  %v1604_v21 = vadd.f32 %v7302_v9, %v1600_v0 }
0x1708   :  { %v1603_v45 = vadd.f32 %v1596_v1, %v7304_v19 }
0x1709   :  { %6583 = vtanh.f32 %v1604_v21 }
0x170a   :  { %6585 = vtanh.f32 %v1603_v45 }
0x1713   :  { %v6584_v12 = vpop.eup %6583 }
0x1714   :  { %v6586_v14 = vpop.eup %6585  ;;  %v1614_v60 = vmul.f32 %v6584_v12, %v7308_v30 }
0x1715   :  { %v1613_v61 = vmul.f32 %v6586_v14, %v7308_v30 }
0x1716   :  { %v1618_v49 = vsel %vm208_vm4, %v1614_v60, 0.0 }
0x1717   :  { %1619 = vadd.xlane.f32.xlu1 %v1618_v49  ;;  %v1615_v50 = vsel %vm208_vm4, %v1613_v61, 0.0 }
0x1718   :  { %1616 = vadd.xlane.f32.xlu0 %v1615_v50 }
0x17a4   :  { %v1620_v38 = vpop.xlane.xlu1 %1619 }
0x17a5   :  { %v1623_v39 = vmul.f32 1.442695, %v1620_v38  ;;  %v1617_v2 = vpop.xlane.xlu0 %1616 }
0x17a6   :  { %v1621_v3 = vmul.f32 1.442695, %v1617_v2 }
0x17a7   :  { %6587 = vpow2.f32 %v1623_v39 }
0x17a8   :  { %6589 = vpow2.f32 %v1621_v3 }
0x17b1   :  { %v6588_v7 = vpop.eup %6587 }
0x17b2   :  { %v6590_v11 = vpop.eup %6589  ;;  %v1636_v15 = vrot.slane %v6588_v7, %v7314_v5 }
0x17b3   :  { %v1632_v16 = vrot.slane %v6590_v11, %v7314_v5 }
0x17b5   :  { %v1637_v17 = vsel %vm348_vm3, %v1636_v15, %v1632_v16 }
0x17b6   :  { %v1640_v18 = vsel %vm1639_vm13, %v1637_v17, 0.0 }
0x17b7   :  { %1641 = vadd.xlane.f32.xlu0 %v1640_v18 }
0x1844   :  { %v1642_v22 = vpop.xlane.xlu0 %1641 }
0x1845   :  { %6591 = vrcp.f32 %v1642_v22 }
0x184f   :  { %v6592_v24 = vpop.eup %6591 }
0x1850   :  { %v1652_v25 = vrot.slane %v6592_v24, %v7320_v23  ;;  %v1648_v27 = vrot.slane %v6592_v24, %v7298_v63 }
0x1852   :  { %v1656_v28 = vmul.f32 %v6588_v7, %v1652_v25  ;;  %v1655_v29 = vmul.f32 %v6590_v11, %v1648_v27 }
0x1854   :  { %1664 = vperm.xlu1 %6486, %v1656_v28   ;;  %1659 = vperm.xlu0 %6485, %v1655_v29  }
0x1858   :  { %1566 = vrot.lane.b32.xlu1 %v5447_v32, %s6819_s17  ;;  %1880 = vrot.lane.b32.xlu0 %v1760_v52, %s6815_s4  ;;  %v1477_v52 = vld [vmem:[%s8172_s14 + $0x28] sm:$0xff] }
0x18d3   :  { %v1665_v53 = vpop.permute.xlu1 %1664  ;;  %v1660_v54 = vpop.permute.xlu0 %1659 }
0x18d4   :  { %v1668_v13 = vmul.f32 %v1665_v53, %v7284_v47  ;;  %v1667_v57 = vmul.f32 %v1660_v54, %v7280_v46  ;;  %v7418_v53 = vpack.c.bf16 %v1477_v52, %v1476_v43  ;;  %v1478_v54 = vld [vmem:[%s8172_s14 + $0x30] sm:$0xff] }
0x18d6   :  { %v1676_v58 = vsel %vm208_vm4, %v1668_v13, 0.0  ;;  %v1669_v59 = vsel %vm208_vm4, %v1667_v57, 0.0  ;;  %6301 = vmatpush3.bf16.msra.mxu0 %v7418_v53  ;;  %v1479_v13 = vld [vmem:[%s8172_s14 + $0x38] sm:$0xff] }
0x18d7   :  { %v1677_v62 = vrot.slane %v1676_v58, 4  ;;  %v1670_v6 = vrot.slane %v1669_v59, 4  ;;  %v7371_v0 = vpop.permute.xlu1 %1566  ;;  %6302 = vmatprep.subr.bf16.mxu0 %v6812_v8  ;;  %v7429_v57 = vpack.c.bf16 %v1479_v13, %v1478_v54 }
0x18d8   :  { %v1569_v1 = vadd.f32 %v7371_v0, %v7292_v56  ;;  %v1832_v56 = vpop.f32.mrb[14].mxu0 }
0x18d9   :  { %v1678_v21 = vadd.f32 %v1677_v62, %v1676_v58  ;;  %v1671_v45 = vadd.f32 %v1670_v6, %v1669_v59  ;;  %v5867_v3 = vpop.f32.mrb[15].mxu0  ;;  %v7436_v58 = vld [vmem:[%s8172_s14 + $0x40] sm:$0xf] }
0x18da   :  { %1844 = vrot.lane.b32.xlu1 %v1569_v1, %s6816_s5  ;;  %6304 = vmatpush3.bf16.msra.mxu0 %v7429_v57 }
0x18db   :  { %v1679_v12 = vrot.slane %v1678_v21, 2  ;;  %v1672_v14 = vrot.slane %v1671_v45, 2  ;;  %5884 = vmatprep.subr.mxu0 %v6814_v10 }
0x18dd   :  { %v1680_v60 = vadd.f32 %v1679_v12, %v1678_v21  ;;  %v1673_v61 = vadd.f32 %v1672_v14, %v1671_v45  ;;  %v1881_v12 = vpop.permute.xlu0 %1880 }
0x18de   :  { %1854 = vrot.lane.b32.xlu1 %v1569_v1, %s6819_s17  ;;  %5885 = vmatpush3.msk.msra.mxu0 %vm123_vm0, %v7436_v58 }
0x18df   :  { %v1681_v49 = vrot.slane %v1680_v60, 1  ;;  %v1674_v50 = vrot.slane %v1673_v61, 1  ;;  %5911 = vmatprep.subr.mxu0 %v6814_v10 }
0x18e1   :  { %v1682_v38 = vadd.f32 %v1681_v49, %v1680_v60  ;;  %v1675_v39 = vadd.f32 %v1674_v50, %v1673_v61 }
0x18e3   :  { %v1685_v2 = vsel %vm348_vm3, %v1682_v38, %v1675_v39 }
0x18e4   :  { %5861 = vmatmul.mubr.msk.f32.vlgmr.msra.gmra.mrb[8].mxu1 %vm208_vm4, %v1685_v2 }
0x18e5   :  { %6307 = vmatpush3.bf16.msra.mxu1 %v7219_v51  ;;  %5897 = vmatprep.mubr.msk.f32.mxu1 %vm6813_vm2, %v6814_v10 }
0x18e6   :  { %6308 = vmatprep.subr.bf16.mxu1 %v6812_v8 }
0x18e9   :  { %6310 = vmatpush3.bf16.msra.mxu1 %v7237_v31 }
0x18ea   :  { %6311 = vmatprep.subr.bf16.mxu1 %v6812_v8 }
0x194c   :  { %v1845_v17 = vpop.permute.xlu1 %1844 }
0x1950   :  { %v1855_v27 = vpop.permute.xlu1 %1854 }
0x19b7   :  { %v1754_v7 = vpop.f32.mrb[8].mxu1 }
0x19b8   :  { %v1833_v11 = vadd.f32 %v1832_v56, %v1754_v7  ;;  %v5862_v15 = vpop.f32.mrb[9].mxu1  ;;  %v7477_v7 = vld [vmem:[%s8160_s2 + $0x8] sm:$0xff] }
0x19b9   :  { %v2005_v15 = vstv %s2004_s11 }
0x19ba   :  { %v1842_v16 = vadd.f32 %v7388_v4, %v1833_v11 }
0x19bc   :  { %v1847_v18 = vadd.f32 %v1845_v17, %v1842_v16 }
0x19be   :  { %v5453_v20 = vmul.f32 -1.442695, %v1847_v18  ;;  %v7484_v18 = vld [vmem:[%s8160_s2] sm:$0xff] }
0x19c0   :  { %6593 = vpow2.f32 %v5453_v20 }
0x19ca   :  { %v6594_v22 = vpop.eup %6593 }
0x19cb   :  { %v1851_v24 = vadd.f32 1.0, %v6594_v22  ;;  %v2001_v22 = vstv %s2000_s1  ;;  %s2972_s1 = scvt.s32.f32 %s2971_s23 }
0x19cd   :  { %6595 = vrcp.f32 %v1851_v24  ;;  %s2976_s11 = ssub.f32 1.0, %s2972_s1 }
0x19d7   :  { %v6596_v25 = vpop.eup %6595 }
0x19d8   :  { %v1857_v28 = vmul.f32 %v6596_v25, %v1855_v27  ;;  %v1864_v59 = vsub.f32 1.0, %v6596_v25  ;;  %v1871_v6 = vmul.f32 %v6596_v25, %v7260_v26  ;;  %v2003_v25 = vmul.f32 %v2001_v22, %v7477_v7 }
0x19da   :  { %1859 = vrot.lane.b32.xlu1 %v1857_v28, %s6815_s4 }
0x1a4c   :  { %v1860_v29 = vpop.permute.xlu1 %1859 }
0x1a4d   :  { %v1862_v32 = vadd.f32 %v1860_v29, %v1842_v16 }
0x1a4f   :  { %6597 = vtanh.f32 %v1862_v32  ;;  %v2002_v32 = vmul.f32 %v2001_v22, %v7484_v18 }
0x1a59   :  { %v6598_v42 = vpop.eup %6597 }
0x1a5a   :  { %1866 = vrot.lane.b32.xlu1 %v6598_v42, %s6816_s5 }
0x1acc   :  { %v1867_v62 = vpop.permute.xlu1 %1866 }
0x1acd   :  { %v1869_v1 = vmul.f32 %v1867_v62, %v1864_v59 }
0x1acf   :  { %v7442_v21 = vadd.f32 %v1871_v6, %v1869_v1 }
0x1ad1   :  { %1874 = vrot.lane.b32.xlu1 %v7442_v21, %s6816_s5 }
0x1ad5   :  { %1877 = vrot.lane.b32.xlu1 %v1685_v2, %s6819_s17  ;;  %v7470_v2 = vld [vmem:[%s8173_s15] ss:$0 sm:$0xff] }
0x1b43   :  { %v1875_v45 = vpop.permute.xlu1 %1874 }
0x1b44   :  { %5898 = vmatmul.mubr.msk.f32.vlgmr.msra.gmra.mrb[10].mxu1 %vm208_vm4, %v1875_v45 }
0x1b45   :  { %6313 = vmatpush3.bf16.msra.mxu1 %v7334_v35  ;;  %5908 = vmatprep.mubr.msk.f32.mxu1 %vm6813_vm2, %v6814_v10 }
0x1b46   :  { %6314 = vmatprep.subr.bf16.mxu1 %v6812_v8 }
0x1b47   :  { %v1878_v26 = vpop.permute.xlu1 %1877 }
0x1b48   :  { %v1883_v14 = vsel %vm208_vm4, %v1875_v45, %v1878_v26 }
0x1b49   :  { %v1885_v60 = vsel %vm1884_vm14, %v1883_v14, %v1881_v12  ;;  %6316 = vmatpush3.bf16.msra.mxu1 %v7350_v44 }
0x1b4a   :  { %5887 = vmatmul.mubr.msk.f32.vlgmr.msra.gmra.mrb[16].mxu0 %vm1892_vm15, %v1885_v60  ;;  %6317 = vmatprep.subr.bf16.mxu1 %v6812_v8 }
0x1b4b   :  { %5912 = vmatpush3.msk.msra.mxu0 %vm123_vm0, %v7355_v48  ;;  %5913 = vmatprep.mubr.msk.f32.mxu0 %vm6813_vm2, %v6814_v10 }
0x1b4c   :  { %6329 = vmatprep.subr.bf16.mxu0 %v6812_v8 }
0x1c17   :  { %v7462_v61 = vpop.f32.mrb[10].mxu1 }
0x1c18   :  { %v2093_v49 = vrot.slane %v7462_v61, %v7290_v55  ;;  %v5899_v50 = vpop.f32.mrb[11].mxu1 }
0x1c1a   :  { %v2094_v38 = vcombine.high %v2093_v49, %v2093_v49  ;;  %v2101_v39 = vrot.slane %v2093_v49, %v7290_v55 }
0x1c1c   :  { %v2108_v56 = vrot.slane %v2094_v38, %v7290_v55  ;;  %v2112_v3 = vrot.slane %v2101_v39, %v7298_v63 }
0x1c1d   :  { %v1965_v11 = vpop.f32.mrb[16].mxu0 }
0x1c1e   :  { %v2116_v16 = vrot.slane %v2108_v56, %v7298_v63  ;;  %v2119_v17 = vadd.f32 %v2112_v3, %v7304_v19  ;;  %v1966_v20 = vadd.f32 %v7470_v2, %v1965_v11  ;;  %v5888_v24 = vpop.f32.mrb[17].mxu0 }
0x1c20   :  { %v2120_v27 = vadd.f32 %v7302_v9, %v2116_v16  ;;  %6599 = vtanh.f32 %v2119_v17  ;;  %v1976_v28 = vrot.slane %v1966_v20, %v7290_v55  ;;  %v2006_v29 = vmul.f32 %v2005_v15, %v1966_v20 }
0x1c22   :  { %6601 = vtanh.f32 %v2120_v27  ;;  %v1977_v33 = vcombine.high %v1976_v28, %v1976_v28  ;;  %v1984_v34 = vrot.slane %v1976_v28, %v7290_v55  ;;  %v2008_v36 = vrot.slane %v2006_v29, 1 }
0x1c23   :  { %v2011_v43 = vadd.f32 %v2006_v29, %v2002_v32  ;;  %v2085_v27 = vadd.f32 %v7462_v61, %v7371_v0 }
0x1c24   :  { %v1991_v40 = vrot.slane %v1977_v33, %v7290_v55  ;;  %1995 = vst.msk [vmem:[%s8174_s16] sm:$0x1] %vm1994_vm5, %v1984_v34  ;;  %v2012_v42 = vadd.f32 %v2008_v36, %v2003_v25 }
0x1c26   :  { %1996 = vst.msk [vmem:[%s8174_s16 + $0x8] sm:$0x1] %vm1994_vm5, %v1991_v40  ;;  %v2267_v52 = vrot.slane %v2012_v42, 7 }
0x1c28   :  { %v7502_v54 = vsel %vm348_vm3, %v2267_v52, %v2011_v43 }
0x1c29   :  { %5914 = vmatmul.mubr.msk.f32.vlgmr.msra.gmra.mrb[18].mxu0 %vm116_vm1, %v7502_v54 }
0x1c2a   :  { %v6600_v13 = vpop.eup %6599  ;;  %6331 = vmatpush3.bf16.msra.mxu0 %v7219_v51  ;;  %5945 = vmatprep.mubr.msk.f32.mxu0 %vm6813_vm2, %v6814_v10 }
0x1c2b   :  { %v2123_v59 = vmul.f32 %v6600_v13, %v7308_v30  ;;  %6332 = vmatprep.subr.bf16.mxu0 %v6812_v8 }
0x1c2c   :  { %v6602_v62 = vpop.eup %6601 }
0x1c2d   :  { %v2125_v6 = vsel %vm208_vm4, %v2123_v59, 0.0  ;;  %v2124_v1 = vmul.f32 %v6602_v62, %v7308_v30 }
0x1c2e   :  { %2126 = vadd.xlane.f32.xlu1 %v2125_v6  ;;  %6334 = vmatpush3.bf16.msra.mxu0 %v7237_v31 }
0x1c2f   :  { %v2128_v45 = vsel %vm208_vm4, %v2124_v1, 0.0  ;;  %6335 = vmatprep.subr.bf16.mxu0 %v6812_v8 }
0x1c30   :  { %2129 = vadd.xlane.f32.xlu0 %v2128_v45 }
0x1cbb   :  { %v2127_v12 = vpop.xlane.xlu1 %2126 }
0x1cbc   :  { %v2131_v26 = vmul.f32 1.442695, %v2127_v12 }
0x1cbd   :  { %v2130_v14 = vpop.xlane.xlu0 %2129 }
0x1cbe   :  { %6603 = vpow2.f32 %v2131_v26  ;;  %v2133_v60 = vmul.f32 1.442695, %v2130_v14 }
0x1cc0   :  { %6605 = vpow2.f32 %v2133_v60 }
0x1cc8   :  { %v6604_v49 = vpop.eup %6603 }
0x1cc9   :  { %v2140_v38 = vrot.slane %v6604_v49, %v7314_v5 }
0x1cca   :  { %v6606_v50 = vpop.eup %6605 }
0x1ccb   :  { %v2144_v39 = vrot.slane %v6606_v50, %v7314_v5 }
0x1ccd   :  { %v2145_v56 = vsel %vm348_vm3, %v2144_v39, %v2140_v38 }
0x1cce   :  { %v2147_v3 = vsel %vm1639_vm13, %v2145_v56, 0.0 }
0x1ccf   :  { %2148 = vadd.xlane.f32.xlu0 %v2147_v3 }
0x1cfc   :  { %v2337_v11 = vpop.f32.mrb[18].mxu0 }
0x1cfd   :  { %v5915_v15 = vpop.f32.mrb[19].mxu0 }
0x1d5c   :  { %v2149_v16 = vpop.xlane.xlu0 %2148 }
0x1d5d   :  { %6607 = vrcp.f32 %v2149_v16 }
0x1d67   :  { %v6608_v17 = vpop.eup %6607 }
0x1d68   :  { %v2159_v20 = vrot.slane %v6608_v17, %v7320_v23  ;;  %v2155_v22 = vrot.slane %v6608_v17, %v7298_v63 }
0x1d6a   :  { %v2163_v24 = vmul.f32 %v6606_v50, %v2159_v20  ;;  %v2162_v25 = vmul.f32 %v6604_v49, %v2155_v22 }
0x1d6c   :  { %2171 = vperm.xlu0 %6485, %v2163_v24   ;;  %2166 = vperm.xlu1 %6486, %v2162_v25  }
0x1d70   :  { %2343 = vrot.lane.b32.xlu1 %v2085_v27, %s6816_s5 }
0x1d74   :  { %2353 = vrot.lane.b32.xlu1 %v2085_v27, %s6819_s17 }
0x1deb   :  { %v2172_v28 = vpop.permute.xlu0 %2171  ;;  %v2167_v29 = vpop.permute.xlu1 %2166 }
0x1dec   :  { %v2175_v32 = vmul.f32 %v2172_v28, %v7284_v47  ;;  %v2174_v33 = vmul.f32 %v2167_v29, %v7280_v46 }
0x1dee   :  { %v2183_v34 = vsel %vm208_vm4, %v2175_v32, 0.0  ;;  %v2176_v36 = vsel %vm208_vm4, %v2174_v33, 0.0 }
0x1def   :  { %v2184_v40 = vrot.slane %v2183_v34, 4  ;;  %v2177_v42 = vrot.slane %v2176_v36, 4  ;;  %v2344_v38 = vpop.permute.xlu1 %2343 }
0x1df1   :  { %v2185_v43 = vadd.f32 %v2184_v40, %v2183_v34  ;;  %v2178_v52 = vadd.f32 %v2177_v42, %v2176_v36 }
0x1df3   :  { %v2186_v13 = vrot.slane %v2185_v43, 2  ;;  %v2179_v61 = vrot.slane %v2178_v52, 2  ;;  %v2354_v17 = vpop.permute.xlu1 %2353 }
0x1df5   :  { %v2187_v59 = vadd.f32 %v2186_v13, %v2185_v43  ;;  %v2180_v62 = vadd.f32 %v2179_v61, %v2178_v52 }
0x1df7   :  { %v2188_v6 = vrot.slane %v2187_v59, 1  ;;  %v2181_v1 = vrot.slane %v2180_v62, 1 }
0x1df9   :  { %v2189_v45 = vadd.f32 %v2188_v6, %v2187_v59  ;;  %v2182_v12 = vadd.f32 %v2181_v1, %v2180_v62  ;;  %v2491_v6 = vstv %s2490_s13 }
0x1dfb   :  { %v2192_v26 = vsel %vm348_vm3, %v2189_v45, %v2182_v12 }
0x1dfc   :  { %5909 = vmatmul.mubr.msk.f32.vlgmr.msra.gmra.mrb[12].mxu1 %vm208_vm4, %v2192_v26 }
0x1dfd   :  { %6319 = vmatpush3.bf16.msra.mxu1 %v7401_v37  ;;  %5934 = vmatprep.mubr.msk.f32.mxu1 %vm6813_vm2, %v6814_v10 }
0x1dfe   :  { %6320 = vmatprep.subr.bf16.mxu1 %v6812_v8 }
0x1e01   :  { %6322 = vmatpush3.bf16.msra.mxu1 %v7407_v41 }
0x1e02   :  { %6323 = vmatprep.subr.bf16.mxu1 %v6812_v8 }
0x1e05   :  { %6325 = vmatpush3.bf16.msra.mxu1 %v7418_v53 }
0x1e06   :  { %6326 = vmatprep.subr.bf16.mxu1 %v6812_v8 }
0x1e09   :  { %6328 = vmatpush3.bf16.msra.mxu1 %v7429_v57 }
0x1e0a   :  { %5932 = vmatprep.subr.mxu1 %v6814_v10 }
0x1e0d   :  { %5933 = vmatpush3.msk.msra.mxu1 %vm123_vm0, %v7436_v58 }
0x1e0e   :  { %5959 = vmatprep.subr.mxu1 %v6814_v10 }
0x1ecf   :  { %v2261_v14 = vpop.f32.mrb[12].mxu1 }
0x1ed0   :  { %v2338_v60 = vadd.f32 %v2337_v11, %v2261_v14  ;;  %v5910_v49 = vpop.f32.mrb[13].mxu1  ;;  %v2487_v14 = vstv %s2486_s20  ;;  %s5504_s20 = sld [smem:[#allocation3 + $0x6]] }
0x1ed1   :  { %v2488_v49 = vmul.f32 %v2487_v14, %v7484_v18 }
0x1ed2   :  { %v2341_v50 = vadd.f32 %v7388_v4, %v2338_v60 }
0x1ed4   :  { %v2346_v39 = vadd.f32 %v2344_v38, %v2341_v50 }
0x1ed6   :  { %v5461_v56 = vmul.f32 -1.442695, %v2346_v39  ;;  %p4922_p7 = scmp.gt.s32.totalorder %s5504_s20, 0 }
0x1ed8   :  { %6609 = vpow2.f32 %v5461_v56  ;;  %s4923_s13 = scalar_select %p4922_p7, 1, 0 }
0x1eda   :  { %s4924_s24 = scvt.s32.f32 %s4923_s13 }
0x1edc   :  { %s4928_s21 = ssub.f32 1.0, %s4924_s24 }
0x1ee2   :  { %v6610_v3 = vpop.eup %6609 }
0x1ee3   :  { %v2350_v15 = vadd.f32 1.0, %v6610_v3  ;;  %v2489_v3 = vmul.f32 %v2487_v14, %v7477_v7 }
0x1ee5   :  { %6611 = vrcp.f32 %v2350_v15 }
0x1eef   :  { %v6612_v16 = vpop.eup %6611 }
0x1ef0   :  { %v2356_v20 = vmul.f32 %v6612_v16, %v2354_v17  ;;  %v2363_v11 = vsub.f32 1.0, %v6612_v16  ;;  %v2369_v28 = vmul.f32 %v6612_v16, %v7442_v21 }
0x1ef2   :  { %2358 = vrot.lane.b32.xlu0 %v2356_v20, %s6815_s4 }
0x1f64   :  { %v2359_v22 = vpop.permute.xlu0 %2358 }
0x1f65   :  { %v2361_v24 = vadd.f32 %v2359_v22, %v2341_v50 }
0x1f67   :  { %6613 = vtanh.f32 %v2361_v24 }
0x1f71   :  { %v6614_v25 = vpop.eup %6613 }
0x1f72   :  { %2365 = vrot.lane.b32.xlu1 %v6614_v25, %s6816_s5 }
0x1f76   :  { %2375 = vrot.lane.b32.xlu1 %v2192_v26, %s6819_s17 }
0x1fe4   :  { %v2366_v27 = vpop.permute.xlu1 %2365 }
0x1fe5   :  { %v2368_v29 = vmul.f32 %v2366_v27, %v2363_v11 }
0x1fe7   :  { %v7550_v32 = vadd.f32 %v2369_v28, %v2368_v29 }
0x1fe8   :  { %v2376_v34 = vpop.permute.xlu1 %2375 }
0x1fe9   :  { %2372 = vrot.lane.b32.xlu0 %v7550_v32, %s6816_s5 }
0x1fed   :  { %2378 = vrot.lane.b32.xlu0 %v7502_v54, %s6815_s4 }
0x205b   :  { %v2373_v33 = vpop.permute.xlu0 %2372 }
0x205c   :  { %5946 = vmatmul.mubr.msk.f32.vlgmr.msra.gmra.mrb[20].mxu0 %vm208_vm4, %v2373_v33  ;;  %v2381_v21 = vsel %vm208_vm4, %v2373_v33, %v2376_v34 }
0x205d   :  { %6337 = vmatpush3.bf16.msra.mxu0 %v7334_v35  ;;  %5956 = vmatprep.mubr.msk.f32.mxu0 %vm6813_vm2, %v6814_v10 }
0x205e   :  { %6338 = vmatprep.subr.bf16.mxu0 %v6812_v8 }
0x205f   :  { %v2379_v36 = vpop.permute.xlu0 %2378 }
0x2060   :  { %v2382_v40 = vsel %vm1884_vm14, %v2381_v21, %v2379_v36 }
0x2061   :  { %5935 = vmatmul.mubr.msk.f32.vlgmr.msra.gmra.mrb[14].mxu1 %vm1892_vm15, %v2382_v40  ;;  %6340 = vmatpush3.bf16.msra.mxu0 %v7350_v44 }
0x2062   :  { %5960 = vmatpush3.msk.msra.mxu1 %vm123_vm0, %v7355_v48  ;;  %5961 = vmatprep.mubr.msk.f32.mxu1 %vm6813_vm2, %v6814_v10 }
0x2063   :  { %6341 = vmatprep.subr.bf16.mxu0 %v6812_v8  ;;  %6353 = vmatprep.subr.bf16.mxu1 %v6812_v8 }
0x212f   :  { %v7571_v54 = vpop.f32.mrb[20].mxu0 }
0x2130   :  { %v2579_v42 = vrot.slane %v7571_v54, %v7290_v55  ;;  %v5947_v43 = vpop.f32.mrb[21].mxu0 }
0x2132   :  { %v2580_v52 = vcombine.high %v2579_v42, %v2579_v42  ;;  %v2587_v13 = vrot.slane %v2579_v42, %v7290_v55 }
0x2134   :  { %v2594_v61 = vrot.slane %v2580_v52, %v7290_v55  ;;  %v2598_v59 = vrot.slane %v2587_v13, %v7298_v63  ;;  %v2452_v62 = vpop.f32.mrb[14].mxu1 }
0x2135   :  { %v2453_v1 = vadd.f32 %v7470_v2, %v2452_v62  ;;  %v5936_v45 = vpop.f32.mrb[15].mxu1 }
0x2136   :  { %v2602_v12 = vrot.slane %v2594_v61, %v7298_v63  ;;  %v2605_v26 = vadd.f32 %v2598_v59, %v7304_v19 }
0x2137   :  { %v2463_v60 = vrot.slane %v2453_v1, %v7290_v55  ;;  %v2492_v50 = vmul.f32 %v2491_v6, %v2453_v1 }
0x2138   :  { %v2606_v38 = vadd.f32 %v7302_v9, %v2602_v12  ;;  %6615 = vtanh.f32 %v2605_v26 }
0x2139   :  { %v2464_v39 = vcombine.high %v2463_v60, %v2463_v60  ;;  %v2471_v56 = vrot.slane %v2463_v60, %v7290_v55  ;;  %v2494_v15 = vrot.slane %v2492_v50, 7  ;;  %v2498_v20 = vadd.f32 %v2492_v50, %v2489_v3 }
0x213a   :  { %6617 = vtanh.f32 %v2606_v38 }
0x213b   :  { %v2478_v16 = vrot.slane %v2464_v39, %v7290_v55  ;;  %2481 = vst.msk [vmem:[%s8174_s16 + $0x1] sm:$0x1] %vm1994_vm5, %v2471_v56  ;;  %v2497_v17 = vadd.f32 %v2494_v15, %v2488_v49  ;;  %v2571_v49 = vadd.f32 %v7571_v54, %v7371_v0 }
0x213d   :  { %2482 = vst.msk [vmem:[%s8174_s16 + $0x9] sm:$0x1] %vm1994_vm5, %v2478_v16  ;;  %v2753_v22 = vrot.slane %v2497_v17, 1 }
0x213f   :  { %v7596_v24 = vsel %vm348_vm3, %v2498_v20, %v2753_v22 }
0x2140   :  { %5962 = vmatmul.mubr.msk.f32.vlgmr.msra.gmra.mrb[16].mxu1 %vm116_vm1, %v7596_v24 }
0x2141   :  { %6355 = vmatpush3.bf16.msra.mxu1 %v7219_v51  ;;  %5993 = vmatprep.mubr.msk.f32.mxu1 %vm6813_vm2, %v6814_v10 }
0x2142   :  { %v6616_v25 = vpop.eup %6615  ;;  %6356 = vmatprep.subr.bf16.mxu1 %v6812_v8 }
0x2143   :  { %v2609_v11 = vmul.f32 %v6616_v25, %v7308_v30 }
0x2144   :  { %v6618_v27 = vpop.eup %6617 }
0x2145   :  { %v2611_v28 = vsel %vm208_vm4, %v2609_v11, 0.0  ;;  %v2610_v29 = vmul.f32 %v6618_v27, %v7308_v30  ;;  %6358 = vmatpush3.bf16.msra.mxu1 %v7237_v31 }
0x2146   :  { %2612 = vadd.xlane.f32.xlu1 %v2611_v28  ;;  %6359 = vmatprep.subr.bf16.mxu1 %v6812_v8 }
0x2147   :  { %v2614_v33 = vsel %vm208_vm4, %v2610_v29, 0.0 }
0x2148   :  { %2615 = vadd.xlane.f32.xlu0 %v2614_v33 }
0x21d3   :  { %v2613_v34 = vpop.xlane.xlu1 %2612 }
0x21d4   :  { %v2617_v21 = vmul.f32 1.442695, %v2613_v34 }
0x21d5   :  { %v2616_v36 = vpop.xlane.xlu0 %2615 }
0x21d6   :  { %6619 = vpow2.f32 %v2617_v21  ;;  %v2619_v40 = vmul.f32 1.442695, %v2616_v36 }
0x21d8   :  { %6621 = vpow2.f32 %v2619_v40 }
0x21e0   :  { %v6620_v42 = vpop.eup %6619 }
0x21e1   :  { %v2626_v52 = vrot.slane %v6620_v42, %v7314_v5 }
0x21e2   :  { %v6622_v43 = vpop.eup %6621 }
0x21e3   :  { %v2630_v13 = vrot.slane %v6622_v43, %v7314_v5 }
0x21e5   :  { %v2631_v61 = vsel %vm348_vm3, %v2630_v13, %v2626_v52 }
0x21e6   :  { %v2633_v59 = vsel %vm1639_vm13, %v2631_v61, 0.0 }
0x21e7   :  { %2634 = vadd.xlane.f32.xlu0 %v2633_v59 }
0x2213   :  { %v2823_v62 = vpop.f32.mrb[16].mxu1 }
0x2214   :  { %v5963_v6 = vpop.f32.mrb[17].mxu1 }
0x2274   :  { %v2635_v1 = vpop.xlane.xlu0 %2634 }
0x2275   :  { %6623 = vrcp.f32 %v2635_v1 }
0x227f   :  { %v6624_v45 = vpop.eup %6623 }
0x2280   :  { %v2645_v12 = vrot.slane %v6624_v45, %v7320_v23  ;;  %v2641_v26 = vrot.slane %v6624_v45, %v7298_v63 }
0x2282   :  { %v2649_v14 = vmul.f32 %v6622_v43, %v2645_v12  ;;  %v2648_v60 = vmul.f32 %v6620_v42, %v2641_v26 }
0x2284   :  { %2657 = vperm.xlu0 %6485, %v2649_v14   ;;  %2652 = vperm.xlu1 %6486, %v2648_v60  }
0x2288   :  { %2829 = vrot.lane.b32.xlu1 %v2571_v49, %s6816_s5 }
0x228c   :  { %2839 = vrot.lane.b32.xlu1 %v2571_v49, %s6819_s17 }
0x2303   :  { %v2658_v50 = vpop.permute.xlu0 %2657  ;;  %v2653_v38 = vpop.permute.xlu1 %2652 }
0x2304   :  { %v2661_v39 = vmul.f32 %v2658_v50, %v7284_v47  ;;  %v2660_v56 = vmul.f32 %v2653_v38, %v7280_v46 }
0x2306   :  { %v2669_v3 = vsel %vm208_vm4, %v2661_v39, 0.0  ;;  %v2662_v15 = vsel %vm208_vm4, %v2660_v56, 0.0 }
0x2307   :  { %v2670_v16 = vrot.slane %v2669_v3, 4  ;;  %v2663_v17 = vrot.slane %v2662_v15, 4  ;;  %v2830_v42 = vpop.permute.xlu1 %2829 }
0x2309   :  { %v2671_v20 = vadd.f32 %v2670_v16, %v2669_v3  ;;  %v2664_v22 = vadd.f32 %v2663_v17, %v2662_v15 }
0x230b   :  { %v2672_v25 = vrot.slane %v2671_v20, 2  ;;  %v2665_v54 = vrot.slane %v2664_v22, 2  ;;  %v2840_v6 = vpop.permute.xlu1 %2839 }
0x230d   :  { %v2673_v11 = vadd.f32 %v2672_v25, %v2671_v20  ;;  %v2666_v27 = vadd.f32 %v2665_v54, %v2664_v22  ;;  %v2973_v54 = vstv %s2972_s1 }
0x230f   :  { %v2674_v28 = vrot.slane %v2673_v11, 1  ;;  %v2667_v29 = vrot.slane %v2666_v27, 1 }
0x2311   :  { %v2675_v33 = vadd.f32 %v2674_v28, %v2673_v11  ;;  %v2668_v34 = vadd.f32 %v2667_v29, %v2666_v27  ;;  %v2977_v11 = vstv %s2976_s11 }
0x2313   :  { %v2678_v47 = vsel %vm348_vm3, %v2675_v33, %v2668_v34 }
0x2314   :  { %5957 = vmatmul.mubr.msk.f32.vlgmr.msra.gmra.mrb[22].mxu0 %vm208_vm4, %v2678_v47 }
0x2315   :  { %6343 = vmatpush3.bf16.msra.mxu0 %v7401_v37  ;;  %5982 = vmatprep.mubr.msk.f32.mxu0 %vm6813_vm2, %v6814_v10 }
0x2316   :  { %6344 = vmatprep.subr.bf16.mxu0 %v6812_v8 }
0x2319   :  { %6346 = vmatpush3.bf16.msra.mxu0 %v7407_v41 }
0x231a   :  { %6347 = vmatprep.subr.bf16.mxu0 %v6812_v8 }
0x231d   :  { %6349 = vmatpush3.bf16.msra.mxu0 %v7418_v53 }
0x231e   :  { %6350 = vmatprep.subr.bf16.mxu0 %v6812_v8 }
0x2321   :  { %6352 = vmatpush3.bf16.msra.mxu0 %v7429_v57 }
0x2322   :  { %5980 = vmatprep.subr.mxu0 %v6814_v10 }
0x2325   :  { %5981 = vmatpush3.msk.msra.mxu0 %vm123_vm0, %v7436_v58 }
0x2326   :  { %6007 = vmatprep.subr.mxu0 %v6814_v10 }
0x23e7   :  { %v2747_v46 = vpop.f32.mrb[22].mxu0 }
0x23e8   :  { %v2824_v21 = vadd.f32 %v2823_v62, %v2747_v46  ;;  %v5958_v36 = vpop.f32.mrb[23].mxu0  ;;  %v2975_v46 = vmul.f32 %v2973_v54, %v7477_v7 }
0x23ea   :  { %v2827_v40 = vadd.f32 %v7388_v4, %v2824_v21 }
0x23ec   :  { %v2832_v43 = vadd.f32 %v2830_v42, %v2827_v40 }
0x23ee   :  { %v5469_v52 = vmul.f32 -1.442695, %v2832_v43 }
0x23f0   :  { %6625 = vpow2.f32 %v5469_v52 }
0x23fa   :  { %v6626_v13 = vpop.eup %6625 }
0x23fb   :  { %v2836_v61 = vadd.f32 1.0, %v6626_v13 }
0x23fd   :  { %6627 = vrcp.f32 %v2836_v61 }
0x2407   :  { %v6628_v59 = vpop.eup %6627 }
0x2408   :  { %v2842_v1 = vmul.f32 %v6628_v59, %v2840_v6  ;;  %v2849_v62 = vsub.f32 1.0, %v6628_v59  ;;  %v2855_v60 = vmul.f32 %v6628_v59, %v7550_v32 }
0x240a   :  { %2844 = vrot.lane.b32.xlu0 %v2842_v1, %s6815_s4 }
0x247c   :  { %v2845_v45 = vpop.permute.xlu0 %2844 }
0x247d   :  { %v2847_v12 = vadd.f32 %v2845_v45, %v2827_v40 }
0x247f   :  { %6629 = vtanh.f32 %v2847_v12 }
0x2489   :  { %v6630_v26 = vpop.eup %6629 }
0x248a   :  { %2851 = vrot.lane.b32.xlu1 %v6630_v26, %s6816_s5 }
0x248e   :  { %2861 = vrot.lane.b32.xlu1 %v2678_v47, %s6819_s17  ;;  %v2974_v47 = vmul.f32 %v2973_v54, %v7484_v18 }
0x24fc   :  { %v2852_v14 = vpop.permute.xlu1 %2851 }
0x24fd   :  { %v2854_v49 = vmul.f32 %v2852_v14, %v2849_v62 }
0x24ff   :  { %v7644_v50 = vadd.f32 %v2855_v60, %v2854_v49 }
0x2500   :  { %v2862_v39 = vpop.permute.xlu1 %2861 }
0x2501   :  { %2858 = vrot.lane.b32.xlu0 %v7644_v50, %s6816_s5 }
0x2505   :  { %2864 = vrot.lane.b32.xlu0 %v7596_v24, %s6815_s4 }
0x2573   :  { %v2859_v38 = vpop.permute.xlu0 %2858 }
0x2574   :  { %5994 = vmatmul.mubr.msk.f32.vlgmr.msra.gmra.mrb[18].mxu1 %vm208_vm4, %v2859_v38  ;;  %v2867_v32 = vsel %vm208_vm4, %v2859_v38, %v2862_v39 }
0x2575   :  { %6361 = vmatpush3.bf16.msra.mxu1 %v7334_v35  ;;  %6004 = vmatprep.mubr.msk.f32.mxu1 %vm6813_vm2, %v6814_v10 }
0x2576   :  { %6362 = vmatprep.subr.bf16.mxu1 %v6812_v8 }
0x2577   :  { %v2865_v56 = vpop.permute.xlu0 %2864 }
0x2578   :  { %v2868_v3 = vsel %vm1884_vm14, %v2867_v32, %v2865_v56 }
0x2579   :  { %5983 = vmatmul.mubr.msk.f32.vlgmr.msra.gmra.mrb[24].mxu0 %vm1892_vm15, %v2868_v3  ;;  %6364 = vmatpush3.bf16.msra.mxu1 %v7350_v44 }
0x257a   :  { %6008 = vmatpush3.msk.msra.mxu0 %vm123_vm0, %v7355_v48  ;;  %6009 = vmatprep.mubr.msk.f32.mxu0 %vm6813_vm2, %v6814_v10 }
0x257b   :  { %6365 = vmatprep.subr.bf16.mxu1 %v6812_v8  ;;  %6377 = vmatprep.subr.bf16.mxu0 %v6812_v8 }
0x2647   :  { %v7665_v24 = vpop.f32.mrb[18].mxu1 }
0x2648   :  { %v3066_v15 = vrot.slane %v7665_v24, %v7290_v55  ;;  %v5995_v16 = vpop.f32.mrb[19].mxu1 }
0x264a   :  { %v3067_v17 = vcombine.high %v3066_v15, %v3066_v15  ;;  %v3074_v48 = vrot.slane %v3066_v15, %v7290_v55 }
0x264c   :  { %v3081_v20 = vrot.slane %v3067_v17, %v7290_v55  ;;  %v3085_v22 = vrot.slane %v3074_v48, %v7298_v63  ;;  %v2938_v25 = vpop.f32.mrb[24].mxu0 }
0x264d   :  { %v2939_v27 = vadd.f32 %v7470_v2, %v2938_v25  ;;  %v5984_v28 = vpop.f32.mrb[25].mxu0 }
0x264e   :  { %v3089_v29 = vrot.slane %v3081_v20, %v7298_v63  ;;  %v3092_v33 = vadd.f32 %v3085_v22, %v7304_v19 }
0x264f   :  { %v2949_v34 = vrot.slane %v2939_v27, %v7290_v55  ;;  %v2978_v21 = vmul.f32 %v2977_v11, %v2939_v27 }
0x2650   :  { %v3093_v36 = vadd.f32 %v7302_v9, %v3089_v29  ;;  %6631 = vtanh.f32 %v3092_v33  ;;  %v3058_v33 = vadd.f32 %v7665_v24, %v7371_v0 }
0x2651   :  { %v2950_v40 = vcombine.high %v2949_v34, %v2949_v34  ;;  %v2957_v42 = vrot.slane %v2949_v34, %v7290_v55  ;;  %v2980_v43 = vrot.slane %v2978_v21, 6  ;;  %v2981_v52 = vrot.slane %v2978_v21, 7 }
0x2652   :  { %6633 = vtanh.f32 %v3093_v36  ;;  %v7717_v36 = vld [vmem:[#allocation2] sm:$0xff] }
0x2653   :  { %v2964_v13 = vrot.slane %v2950_v40, %v7290_v55  ;;  %2967 = vst.msk [vmem:[%s8174_s16 + $0x2] sm:$0x1] %vm1994_vm5, %v2957_v42  ;;  %v2984_v61 = vadd.f32 %v2980_v43, %v2974_v47  ;;  %v2985_v59 = vadd.f32 %v2981_v52, %v2975_v46  ;;  %v7714_v46 = vld [vmem:[#allocation2 + $0x8] sm:$0xff] }
0x2655   :  { %2968 = vst.msk [vmem:[%s8174_s16 + $0xa] sm:$0x1] %vm1994_vm5, %v2964_v13  ;;  %v3240_v6 = vrot.slane %v2984_v61, 2  ;;  %v3241_v1 = vrot.slane %v2985_v59, 1 }
0x2657   :  { %v7690_v45 = vsel %vm348_vm3, %v3241_v1, %v3240_v6 }
0x2658   :  { %6010 = vmatmul.mubr.msk.f32.vlgmr.msra.gmra.mrb[26].mxu0 %vm116_vm1, %v7690_v45 }
0x2659   :  { %6379 = vmatpush3.bf16.msra.mxu0 %v7219_v51  ;;  %6041 = vmatprep.mubr.msk.f32.mxu0 %vm6813_vm2, %v6814_v10 }
0x265a   :  { %v6632_v12 = vpop.eup %6631  ;;  %6380 = vmatprep.subr.bf16.mxu0 %v6812_v8 }
0x265b   :  { %v3096_v26 = vmul.f32 %v6632_v12, %v7308_v30 }
0x265c   :  { %v6634_v62 = vpop.eup %6633 }
0x265d   :  { %v3098_v14 = vsel %vm208_vm4, %v3096_v26, 0.0  ;;  %v3097_v60 = vmul.f32 %v6634_v62, %v7308_v30  ;;  %6382 = vmatpush3.bf16.msra.mxu0 %v7237_v31 }
0x265e   :  { %3099 = vadd.xlane.f32.xlu1 %v3098_v14  ;;  %6383 = vmatprep.subr.bf16.mxu0 %v6812_v8 }
0x265f   :  { %v3101_v49 = vsel %vm208_vm4, %v3097_v60, 0.0 }
0x2660   :  { %3102 = vadd.xlane.f32.xlu0 %v3101_v49 }
0x26eb   :  { %v3100_v38 = vpop.xlane.xlu1 %3099 }
0x26ec   :  { %v3104_v39 = vmul.f32 1.442695, %v3100_v38 }
0x26ed   :  { %v3103_v32 = vpop.xlane.xlu0 %3102 }
0x26ee   :  { %6635 = vpow2.f32 %v3104_v39  ;;  %v3106_v56 = vmul.f32 1.442695, %v3103_v32 }
0x26f0   :  { %6637 = vpow2.f32 %v3106_v56 }
0x26f8   :  { %v6636_v3 = vpop.eup %6635 }
0x26f9   :  { %v3113_v16 = vrot.slane %v6636_v3, %v7314_v5 }
0x26fa   :  { %v6638_v15 = vpop.eup %6637 }
0x26fb   :  { %v3117_v30 = vrot.slane %v6638_v15, %v7314_v5 }
0x26fd   :  { %v3118_v17 = vsel %vm348_vm3, %v3117_v30, %v3113_v16 }
0x26fe   :  { %v3120_v48 = vsel %vm1639_vm13, %v3118_v17, 0.0 }
0x26ff   :  { %3121 = vadd.xlane.f32.xlu0 %v3120_v48 }
0x272b   :  { %v3311_v20 = vpop.f32.mrb[26].mxu0 }
0x272c   :  { %v6011_v22 = vpop.f32.mrb[27].mxu0 }
0x278c   :  { %v3122_v25 = vpop.xlane.xlu0 %3121 }
0x278d   :  { %6639 = vrcp.f32 %v3122_v25 }
0x2797   :  { %v6640_v54 = vpop.eup %6639 }
0x2798   :  { %v3132_v11 = vrot.slane %v6640_v54, %v7320_v23  ;;  %v3128_v27 = vrot.slane %v6640_v54, %v7298_v63 }
0x279a   :  { %v3136_v28 = vmul.f32 %v6638_v15, %v3132_v11  ;;  %v3135_v29 = vmul.f32 %v6636_v3, %v3128_v27 }
0x279c   :  { %3144 = vperm.xlu0 %6485, %v3136_v28   ;;  %3139 = vperm.xlu1 %6486, %v3135_v29  }
0x27a0   :  { %3317 = vrot.lane.b32.xlu1 %v3058_v33, %s6816_s5 }
0x27a4   :  { %3327 = vrot.lane.b32.xlu1 %v3058_v33, %s6819_s17 }
0x281b   :  { %v3145_v34 = vpop.permute.xlu0 %3144  ;;  %v3140_v47 = vpop.permute.xlu1 %3139 }
0x281c   :  { %v3148_v21 = vmul.f32 %v7714_v46, %v3145_v34  ;;  %v3147_v40 = vmul.f32 %v7717_v36, %v3140_v47 }
0x281e   :  { %v3156_v42 = vsel %vm208_vm4, %v3148_v21, 0.0  ;;  %v3149_v43 = vsel %vm208_vm4, %v3147_v40, 0.0 }
0x281f   :  { %v3157_v52 = vrot.slane %v3156_v42, 4  ;;  %v3150_v24 = vrot.slane %v3149_v43, 4  ;;  %v3318_v3 = vpop.permute.xlu1 %3317 }
0x2821   :  { %v3158_v13 = vadd.f32 %v3157_v52, %v3156_v42  ;;  %v3151_v61 = vadd.f32 %v3150_v24, %v3149_v43 }
0x2823   :  { %v3159_v59 = vrot.slane %v3158_v13, 2  ;;  %v3152_v6 = vrot.slane %v3151_v61, 2  ;;  %v3328_v22 = vpop.permute.xlu1 %3327 }
0x2825   :  { %v3160_v1 = vadd.f32 %v3159_v59, %v3158_v13  ;;  %v3153_v12 = vadd.f32 %v3152_v6, %v3151_v61  ;;  %v3461_v6 = vstv %s3460_s26 }
0x2827   :  { %v3161_v26 = vrot.slane %v3160_v1, 1  ;;  %v3154_v62 = vrot.slane %v3153_v12, 1 }
0x2829   :  { %v3162_v14 = vadd.f32 %v3161_v26, %v3160_v1  ;;  %v3155_v60 = vadd.f32 %v3154_v62, %v3153_v12 }
0x282b   :  { %v3165_v49 = vsel %vm348_vm3, %v3162_v14, %v3155_v60 }
0x282c   :  { %6005 = vmatmul.mubr.msk.f32.vlgmr.msra.gmra.mrb[20].mxu1 %vm208_vm4, %v3165_v49 }
0x282d   :  { %6367 = vmatpush3.bf16.msra.mxu1 %v7401_v37  ;;  %6030 = vmatprep.mubr.msk.f32.mxu1 %vm6813_vm2, %v6814_v10 }
0x282e   :  { %6368 = vmatprep.subr.bf16.mxu1 %v6812_v8 }
0x2831   :  { %6370 = vmatpush3.bf16.msra.mxu1 %v7407_v41 }
0x2832   :  { %6371 = vmatprep.subr.bf16.mxu1 %v6812_v8 }
0x2835   :  { %6373 = vmatpush3.bf16.msra.mxu1 %v7418_v53 }
0x2836   :  { %6374 = vmatprep.subr.bf16.mxu1 %v6812_v8 }
0x2839   :  { %6376 = vmatpush3.bf16.msra.mxu1 %v7429_v57 }
0x283a   :  { %6028 = vmatprep.subr.mxu1 %v6814_v10 }
0x283d   :  { %6029 = vmatpush3.msk.msra.mxu1 %vm123_vm0, %v7436_v58 }
0x283e   :  { %6055 = vmatprep.subr.mxu1 %v6814_v10 }
0x28ff   :  { %v3234_v38 = vpop.f32.mrb[20].mxu1 }
0x2900   :  { %v3312_v39 = vadd.f32 %v3311_v20, %v3234_v38  ;;  %v6006_v32 = vpop.f32.mrb[21].mxu1  ;;  %v3463_v38 = vmul.f32 %v3461_v6, %v7477_v7 }
0x2902   :  { %v3315_v56 = vadd.f32 %v7388_v4, %v3312_v39 }
0x2904   :  { %v3320_v15 = vadd.f32 %v3318_v3, %v3315_v56 }
0x2906   :  { %v5477_v16 = vmul.f32 -1.442695, %v3320_v15 }
0x2908   :  { %6641 = vpow2.f32 %v5477_v16 }
0x2912   :  { %v6642_v30 = vpop.eup %6641 }
0x2913   :  { %v3324_v17 = vadd.f32 1.0, %v6642_v30 }
0x2915   :  { %6643 = vrcp.f32 %v3324_v17 }
0x291f   :  { %v6644_v48 = vpop.eup %6643 }
0x2920   :  { %v3330_v25 = vmul.f32 %v6644_v48, %v3328_v22  ;;  %v3337_v4 = vsub.f32 1.0, %v6644_v48  ;;  %v3343_v27 = vmul.f32 %v6644_v48, %v7644_v50 }
0x2922   :  { %3332 = vrot.lane.b32.xlu0 %v3330_v25, %s6815_s4  ;;  %v7801_v25 = vld [vmem:[#allocation9] ss:$0 sm:$0xff] }
0x2994   :  { %v3333_v58 = vpop.permute.xlu0 %3332 }
0x2995   :  { %v3335_v54 = vadd.f32 %v3333_v58, %v3315_v56 }
0x2997   :  { %6645 = vtanh.f32 %v3335_v54 }
0x29a1   :  { %v6646_v11 = vpop.eup %6645 }
0x29a2   :  { %3339 = vrot.lane.b32.xlu1 %v6646_v11, %s6816_s5 }
0x29a6   :  { %3349 = vrot.lane.b32.xlu1 %v3165_v49, %s6819_s17  ;;  %v3462_v49 = vmul.f32 %v3461_v6, %v7484_v18 }
0x2a14   :  { %v3340_v20 = vpop.permute.xlu1 %3339 }
0x2a15   :  { %v3342_v28 = vmul.f32 %v3340_v20, %v3337_v4 }
0x2a17   :  { %v7742_v29 = vadd.f32 %v3343_v27, %v3342_v28 }
0x2a18   :  { %v3350_v34 = vpop.permute.xlu1 %3349 }
0x2a19   :  { %3346 = vrot.lane.b32.xlu0 %v7742_v29, %s6816_s5 }
0x2a1d   :  { %3352 = vrot.lane.b32.xlu0 %v7690_v45, %s6815_s4  ;;  %v7760_v45 = vld [vmem:[%s8168_s10] sm:$0xf]  ;;  %s3464_s10 = ssub.f32 1.0, %s3460_s26 }
0x2a1e   :  { %s4440_s26 = ssub.f32 1.0, %s4436_s6 }
0x2a1f   :  { %v3465_v1 = vstv %s3464_s10 }
0x2a8b   :  { %v3347_v33 = vpop.permute.xlu0 %3346 }
0x2a8c   :  { %6042 = vmatmul.mubr.msk.f32.vlgmr.msra.gmra.mrb[28].mxu0 %vm208_vm4, %v3347_v33  ;;  %v3355_v50 = vsel %vm208_vm4, %v3347_v33, %v3350_v34 }
0x2a8d   :  { %6385 = vmatpush3.bf16.msra.mxu0 %v7334_v35  ;;  %6052 = vmatprep.mubr.msk.f32.mxu0 %vm6813_vm2, %v6814_v10 }
0x2a8e   :  { %6386 = vmatprep.subr.bf16.mxu0 %v6812_v8 }
0x2a8f   :  { %v3353_v47 = vpop.permute.xlu0 %3352 }
0x2a90   :  { %v3356_v21 = vsel %vm1884_vm14, %v3355_v50, %v3353_v47 }
0x2a91   :  { %6031 = vmatmul.mubr.msk.f32.vlgmr.msra.gmra.mrb[22].mxu1 %vm1892_vm15, %v3356_v21  ;;  %6388 = vmatpush3.bf16.msra.mxu0 %v7350_v44 }
0x2a92   :  { %6056 = vmatpush3.msk.msra.mxu1 %vm123_vm0, %v7760_v45  ;;  %6057 = vmatprep.mubr.msk.f32.mxu1 %vm6813_vm2, %v6814_v10 }
0x2a93   :  { %6389 = vmatprep.subr.bf16.mxu0 %v6812_v8  ;;  %6401 = vmatprep.subr.bf16.mxu1 %v6812_v8 }
0x2b5f   :  { %v7768_v40 = vpop.f32.mrb[28].mxu0 }
0x2b60   :  { %v3554_v42 = vrot.slane %v7768_v40, %v7290_v55  ;;  %v6043_v43 = vpop.f32.mrb[29].mxu0 }
0x2b62   :  { %v3555_v52 = vcombine.high %v3554_v42, %v3554_v42  ;;  %v3562_v24 = vrot.slane %v3554_v42, %v7290_v55 }
0x2b64   :  { %v3569_v13 = vrot.slane %v3555_v52, %v7290_v55  ;;  %v3573_v61 = vrot.slane %v3562_v24, %v7298_v63  ;;  %v3426_v59 = vpop.f32.mrb[22].mxu1 }
0x2b65   :  { %v3427_v12 = vadd.f32 %v7470_v2, %v3426_v59  ;;  %v6032_v26 = vpop.f32.mrb[23].mxu1 }
0x2b66   :  { %v3577_v62 = vrot.slane %v3569_v13, %v7298_v63  ;;  %v3580_v14 = vadd.f32 %v3573_v61, %v7304_v19 }
0x2b67   :  { %v3437_v60 = vrot.slane %v3427_v12, %v7290_v55  ;;  %v3466_v39 = vmul.f32 %v3465_v1, %v3427_v12 }
0x2b68   :  { %v3581_v32 = vadd.f32 %v7302_v9, %v3577_v62  ;;  %6647 = vtanh.f32 %v3580_v14  ;;  %v3546_v62 = vadd.f32 %v7768_v40, %v7371_v0 }
0x2b69   :  { %v3438_v56 = vcombine.high %v3437_v60, %v3437_v60  ;;  %v3445_v3 = vrot.slane %v3437_v60, %v7290_v55  ;;  %v3468_v15 = vrot.slane %v3466_v39, 5  ;;  %v3469_v2 = vrot.slane %v3466_v39, 6 }
0x2b6a   :  { %6649 = vtanh.f32 %v3581_v32 }
0x2b6b   :  { %v3452_v16 = vrot.slane %v3438_v56, %v7290_v55  ;;  %3455 = vst.msk [vmem:[%s8174_s16 + $0x3] sm:$0x1] %vm1994_vm5, %v3445_v3  ;;  %v3472_v18 = vadd.f32 %v3468_v15, %v3462_v49  ;;  %v3473_v30 = vadd.f32 %v3469_v2, %v3463_v38 }
0x2b6d   :  { %3456 = vst.msk [vmem:[%s8174_s16 + $0xb] sm:$0x1] %vm1994_vm5, %v3452_v16  ;;  %v3728_v7 = vrot.slane %v3472_v18, 3  ;;  %v3729_v17 = vrot.slane %v3473_v30, 2 }
0x2b6f   :  { %v7793_v48 = vsel %vm348_vm3, %v3729_v17, %v3728_v7 }
0x2b70   :  { %6058 = vmatmul.mubr.msk.f32.vlgmr.msra.gmra.mrb[24].mxu1 %vm116_vm1, %v7793_v48 }
0x2b71   :  { %6403 = vmatpush3.bf16.msra.mxu1 %v7219_v51  ;;  %6089 = vmatprep.mubr.msk.f32.mxu1 %vm6813_vm2, %v6814_v10 }
0x2b72   :  { %v6648_v22 = vpop.eup %6647  ;;  %6404 = vmatprep.subr.bf16.mxu1 %v6812_v8 }
0x2b73   :  { %v3584_v58 = vmul.f32 %v7801_v25, %v6648_v22 }
0x2b74   :  { %v6650_v54 = vpop.eup %6649 }
0x2b75   :  { %v3586_v11 = vsel %vm208_vm4, %v3584_v58, 0.0  ;;  %v3585_v4 = vmul.f32 %v7801_v25, %v6650_v54  ;;  %6406 = vmatpush3.bf16.msra.mxu1 %v7237_v31 }
0x2b76   :  { %3587 = vadd.xlane.f32.xlu1 %v3586_v11  ;;  %6407 = vmatprep.subr.bf16.mxu1 %v6812_v8  ;;  %v7838_v11 = vld [vmem:[%s8172_s14 + $0x40] sm:$0xf] }
0x2b77   :  { %v3589_v20 = vsel %vm208_vm4, %v3585_v4, 0.0 }
0x2b78   :  { %3590 = vadd.xlane.f32.xlu0 %v3589_v20 }
0x2c03   :  { %v3588_v27 = vpop.xlane.xlu1 %3587 }
0x2c04   :  { %v3592_v28 = vmul.f32 1.442695, %v3588_v27 }
0x2c05   :  { %v3591_v33 = vpop.xlane.xlu0 %3590 }
0x2c06   :  { %6651 = vpow2.f32 %v3592_v28  ;;  %v3594_v34 = vmul.f32 1.442695, %v3591_v33  ;;  %v7846_v28 = vld [vmem:[%s8170_s12] ss:$0 sm:$0xff]  ;;  %s5488_s12 = sld [smem:[#allocation3 + $0x4]] }
0x2c08   :  { %6653 = vpow2.f32 %v3594_v34 }
0x2c0c   :  { %p3946_p5 = scmp.gt.s32.totalorder %s5488_s12, 0 }
0x2c0e   :  { %s3947_s14 = scalar_select %p3946_p5, 1, 0 }
0x2c10   :  { %v6652_v50 = vpop.eup %6651  ;;  %s3948_s30 = scvt.s32.f32 %s3947_s14 }
0x2c11   :  { %v3601_v21 = vrot.slane %v6652_v50, %v7314_v5 }
0x2c12   :  { %v6654_v47 = vpop.eup %6653  ;;  %s3952_s22 = ssub.f32 1.0, %s3948_s30 }
0x2c13   :  { %v3605_v42 = vrot.slane %v6654_v47, %v7314_v5 }
0x2c15   :  { %v3606_v43 = vsel %vm348_vm3, %v3605_v42, %v3601_v21 }
0x2c16   :  { %v3608_v52 = vsel %vm1639_vm13, %v3606_v43, 0.0 }
0x2c17   :  { %3609 = vadd.xlane.f32.xlu0 %v3608_v52 }
0x2c43   :  { %v3799_v24 = vpop.f32.mrb[24].mxu1 }
0x2c44   :  { %v6059_v13 = vpop.f32.mrb[25].mxu1 }
0x2ca4   :  { %v3610_v61 = vpop.xlane.xlu0 %3609 }
0x2ca5   :  { %6655 = vrcp.f32 %v3610_v61 }
0x2caf   :  { %v6656_v59 = vpop.eup %6655 }
0x2cb0   :  { %v3620_v6 = vrot.slane %v6656_v59, %v7320_v23  ;;  %v3616_v1 = vrot.slane %v6656_v59, %v7298_v63 }
0x2cb2   :  { %v3624_v12 = vmul.f32 %v6654_v47, %v3620_v6  ;;  %v3623_v26 = vmul.f32 %v6652_v50, %v3616_v1 }
0x2cb4   :  { %3632 = vperm.xlu0 %6485, %v3624_v12   ;;  %3627 = vperm.xlu1 %6486, %v3623_v26  }
0x2cb8   :  { %3805 = vrot.lane.b32.xlu1 %v3546_v62, %s6816_s5 }
0x2cbc   :  { %3815 = vrot.lane.b32.xlu1 %v3546_v62, %s6819_s17 }
0x2d33   :  { %v3633_v14 = vpop.permute.xlu0 %3632  ;;  %v3628_v60 = vpop.permute.xlu1 %3627 }
0x2d34   :  { %v3636_v49 = vmul.f32 %v7714_v46, %v3633_v14  ;;  %v3635_v38 = vmul.f32 %v7717_v36, %v3628_v60 }
0x2d36   :  { %v3644_v39 = vsel %vm208_vm4, %v3636_v49, 0.0  ;;  %v3637_v32 = vsel %vm208_vm4, %v3635_v38, 0.0 }
0x2d37   :  { %v3645_v56 = vrot.slane %v3644_v39, 4  ;;  %v3638_v3 = vrot.slane %v3637_v32, 4  ;;  %v3806_v34 = vpop.permute.xlu1 %3805 }
0x2d39   :  { %v3646_v15 = vadd.f32 %v3645_v56, %v3644_v39  ;;  %v3639_v2 = vadd.f32 %v3638_v3, %v3637_v32 }
0x2d3b   :  { %v3647_v16 = vrot.slane %v3646_v15, 2  ;;  %v3640_v40 = vrot.slane %v3639_v2, 2  ;;  %v3816_v52 = vpop.permute.xlu1 %3815 }
0x2d3d   :  { %v3648_v18 = vadd.f32 %v3647_v16, %v3646_v15  ;;  %v3641_v30 = vadd.f32 %v3640_v40, %v3639_v2  ;;  %v3949_v40 = vstv %s3948_s30 }
0x2d3f   :  { %v3649_v7 = vrot.slane %v3648_v18, 1  ;;  %v3642_v17 = vrot.slane %v3641_v30, 1 }
0x2d41   :  { %v3650_v22 = vadd.f32 %v3649_v7, %v3648_v18  ;;  %v3643_v58 = vadd.f32 %v3642_v17, %v3641_v30  ;;  %v3953_v18 = vstv %s3952_s22  ;;  %v7884_v30 = vld [vmem:[%s8173_s15] ss:$0 sm:$0xff] }
0x2d43   :  { %v3653_v54 = vsel %vm348_vm3, %v3650_v22, %v3643_v58 }
0x2d44   :  { %6053 = vmatmul.mubr.msk.f32.vlgmr.msra.gmra.mrb[30].mxu0 %vm208_vm4, %v3653_v54 }
0x2d45   :  { %6391 = vmatpush3.bf16.msra.mxu0 %v7401_v37  ;;  %6078 = vmatprep.mubr.msk.f32.mxu0 %vm6813_vm2, %v6814_v10 }
0x2d46   :  { %6392 = vmatprep.subr.bf16.mxu0 %v6812_v8 }
0x2d49   :  { %6394 = vmatpush3.bf16.msra.mxu0 %v7407_v41 }
0x2d4a   :  { %6395 = vmatprep.subr.bf16.mxu0 %v6812_v8 }
0x2d4d   :  { %6397 = vmatpush3.bf16.msra.mxu0 %v7418_v53 }
0x2d4e   :  { %6398 = vmatprep.subr.bf16.mxu0 %v6812_v8 }
0x2d51   :  { %6400 = vmatpush3.bf16.msra.mxu0 %v7429_v57 }
0x2d52   :  { %6076 = vmatprep.subr.mxu0 %v6814_v10 }
0x2d55   :  { %6077 = vmatpush3.msk.msra.mxu0 %vm123_vm0, %v7838_v11 }
0x2d56   :  { %6103 = vmatprep.subr.mxu0 %v6814_v10 }
0x2e17   :  { %v3722_v4 = vpop.f32.mrb[30].mxu0 }
0x2e18   :  { %v3800_v20 = vadd.f32 %v3799_v24, %v3722_v4  ;;  %v6054_v27 = vpop.f32.mrb[31].mxu0  ;;  %v7893_v4 = vld [vmem:[%s8160_s2] sm:$0xff] }
0x2e19   :  { %v7899_v27 = vld [vmem:[%s8160_s2 + $0x8] sm:$0xff] }
0x2e1a   :  { %v3803_v33 = vadd.f32 %v7846_v28, %v3800_v20  ;;  %v3950_v20 = vmul.f32 %v7893_v4, %v3949_v40 }
0x2e1c   :  { %v3808_v50 = vadd.f32 %v3806_v34, %v3803_v33 }
0x2e1e   :  { %v5485_v47 = vmul.f32 -1.442695, %v3808_v50 }
0x2e20   :  { %6657 = vpow2.f32 %v5485_v47 }
0x2e2a   :  { %v6658_v21 = vpop.eup %6657 }
0x2e2b   :  { %v3812_v42 = vadd.f32 1.0, %v6658_v21 }
0x2e2d   :  { %6659 = vrcp.f32 %v3812_v42 }
0x2e37   :  { %v6660_v43 = vpop.eup %6659 }
0x2e38   :  { %v3818_v13 = vmul.f32 %v6660_v43, %v3816_v52  ;;  %v3825_v6 = vsub.f32 1.0, %v6660_v43  ;;  %v3831_v12 = vmul.f32 %v6660_v43, %v7742_v29 }
0x2e3a   :  { %3820 = vrot.lane.b32.xlu0 %v3818_v13, %s6815_s4 }
0x2eac   :  { %v3821_v24 = vpop.permute.xlu0 %3820 }
0x2ead   :  { %v3823_v61 = vadd.f32 %v3821_v24, %v3803_v33  ;;  %v3951_v33 = vmul.f32 %v7899_v27, %v3949_v40 }
0x2eaf   :  { %6661 = vtanh.f32 %v3823_v61 }
0x2eb9   :  { %v6662_v59 = vpop.eup %6661 }
0x2eba   :  { %3827 = vrot.lane.b32.xlu1 %v6662_v59, %s6816_s5 }
0x2ebe   :  { %3837 = vrot.lane.b32.xlu1 %v3653_v54, %s6819_s17 }
0x2f2c   :  { %v3828_v1 = vpop.permute.xlu1 %3827 }
0x2f2d   :  { %v3830_v26 = vmul.f32 %v3828_v1, %v3825_v6 }
0x2f2f   :  { %v7853_v62 = vadd.f32 %v3831_v12, %v3830_v26 }
0x2f30   :  { %v3838_v60 = vpop.permute.xlu1 %3837 }
0x2f31   :  { %3834 = vrot.lane.b32.xlu0 %v7853_v62, %s6816_s5 }
0x2f35   :  { %3840 = vrot.lane.b32.xlu0 %v7793_v48, %s6815_s4 }
0x2fa3   :  { %v3835_v14 = vpop.permute.xlu0 %3834 }
0x2fa4   :  { %6090 = vmatmul.mubr.msk.f32.vlgmr.msra.gmra.mrb[26].mxu1 %vm208_vm4, %v3835_v14  ;;  %v3843_v29 = vsel %vm208_vm4, %v3835_v14, %v3838_v60 }
0x2fa5   :  { %6409 = vmatpush3.bf16.msra.mxu1 %v7334_v35  ;;  %6100 = vmatprep.mubr.msk.f32.mxu1 %vm6813_vm2, %v6814_v10 }
0x2fa6   :  { %6410 = vmatprep.subr.bf16.mxu1 %v6812_v8 }
0x2fa7   :  { %v3841_v49 = vpop.permute.xlu0 %3840 }
0x2fa8   :  { %v3844_v38 = vsel %vm1884_vm14, %v3843_v29, %v3841_v49 }
0x2fa9   :  { %6079 = vmatmul.mubr.msk.f32.vlgmr.msra.gmra.mrb[32].mxu0 %vm1892_vm15, %v3844_v38  ;;  %6412 = vmatpush3.bf16.msra.mxu1 %v7350_v44 }
0x2faa   :  { %6104 = vmatpush3.msk.msra.mxu0 %vm123_vm0, %v7760_v45  ;;  %6105 = vmatprep.mubr.msk.f32.mxu0 %vm6813_vm2, %v6814_v10 }
0x2fab   :  { %6413 = vmatprep.subr.bf16.mxu1 %v6812_v8  ;;  %6425 = vmatprep.subr.bf16.mxu0 %v6812_v8 }
0x3077   :  { %v7874_v48 = vpop.f32.mrb[26].mxu1 }
0x3078   :  { %v4042_v39 = vrot.slane %v7874_v48, %v7290_v55  ;;  %v6091_v32 = vpop.f32.mrb[27].mxu1 }
0x307a   :  { %v4043_v56 = vcombine.high %v4042_v39, %v4042_v39  ;;  %v4050_v3 = vrot.slane %v4042_v39, %v7290_v55 }
0x307c   :  { %v4057_v15 = vrot.slane %v4043_v56, %v7290_v55  ;;  %v4061_v2 = vrot.slane %v4050_v3, %v7298_v63  ;;  %v3914_v16 = vpop.f32.mrb[32].mxu0 }
0x307d   :  { %v3915_v7 = vadd.f32 %v7884_v30, %v3914_v16  ;;  %v6080_v17 = vpop.f32.mrb[33].mxu0 }
0x307e   :  { %v4065_v22 = vrot.slane %v4057_v15, %v7298_v63  ;;  %v4068_v58 = vadd.f32 %v4061_v2, %v7304_v19 }
0x307f   :  { %v3925_v54 = vrot.slane %v3915_v7, %v7290_v55  ;;  %v3954_v34 = vmul.f32 %v3953_v18, %v3915_v7 }
0x3080   :  { %v4069_v50 = vadd.f32 %v7302_v9, %v4065_v22  ;;  %6663 = vtanh.f32 %v4068_v58 }
0x3081   :  { %v3926_v47 = vcombine.high %v3925_v54, %v3925_v54  ;;  %v3933_v21 = vrot.slane %v3925_v54, %v7290_v55  ;;  %v3956_v42 = vrot.slane %v3954_v34, 4  ;;  %v3957_v43 = vrot.slane %v3954_v34, 5 }
0x3082   :  { %6665 = vtanh.f32 %v4069_v50  ;;  %v4034_v34 = vadd.f32 %v7874_v48, %v7371_v0 }
0x3083   :  { %v3940_v52 = vrot.slane %v3926_v47, %v7290_v55  ;;  %3943 = vst.msk [vmem:[%s8174_s16 + $0x4] sm:$0x1] %vm1994_vm5, %v3933_v21  ;;  %v3960_v13 = vadd.f32 %v3956_v42, %v3950_v20  ;;  %v3961_v24 = vadd.f32 %v3957_v43, %v3951_v33 }
0x3085   :  { %3944 = vst.msk [vmem:[%s8174_s16 + $0xc] sm:$0x1] %vm1994_vm5, %v3940_v52  ;;  %v4216_v61 = vrot.slane %v3960_v13, 4  ;;  %v4217_v59 = vrot.slane %v3961_v24, 3 }
0x3087   :  { %v7914_v6 = vsel %vm348_vm3, %v4217_v59, %v4216_v61 }
0x3088   :  { %6106 = vmatmul.mubr.msk.f32.vlgmr.msra.gmra.mrb[34].mxu0 %vm116_vm1, %v7914_v6 }
0x3089   :  { %6427 = vmatpush3.bf16.msra.mxu0 %v7219_v51  ;;  %6137 = vmatprep.mubr.msk.f32.mxu0 %vm6813_vm2, %v6814_v10 }
0x308a   :  { %v6664_v1 = vpop.eup %6663  ;;  %6428 = vmatprep.subr.bf16.mxu0 %v6812_v8 }
0x308b   :  { %v4072_v12 = vmul.f32 %v7801_v25, %v6664_v1 }
0x308c   :  { %v6666_v26 = vpop.eup %6665 }
0x308d   :  { %v4074_v14 = vsel %vm208_vm4, %v4072_v12, 0.0  ;;  %v4073_v60 = vmul.f32 %v7801_v25, %v6666_v26  ;;  %6430 = vmatpush3.bf16.msra.mxu0 %v7237_v31 }
0x308e   :  { %4075 = vadd.xlane.f32.xlu1 %v4074_v14  ;;  %6431 = vmatprep.subr.bf16.mxu0 %v6812_v8 }
0x308f   :  { %v4077_v29 = vsel %vm208_vm4, %v4073_v60, 0.0 }
0x3090   :  { %4078 = vadd.xlane.f32.xlu0 %v4077_v29 }
0x311b   :  { %v4076_v49 = vpop.xlane.xlu1 %4075 }
0x311c   :  { %v4080_v38 = vmul.f32 1.442695, %v4076_v49 }
0x311d   :  { %v4079_v39 = vpop.xlane.xlu0 %4078 }
0x311e   :  { %6667 = vpow2.f32 %v4080_v38  ;;  %v4082_v32 = vmul.f32 1.442695, %v4079_v39 }
0x3120   :  { %6669 = vpow2.f32 %v4082_v32 }
0x3128   :  { %v6668_v56 = vpop.eup %6667 }
0x3129   :  { %v4089_v15 = vrot.slane %v6668_v56, %v7314_v5 }
0x312a   :  { %v6670_v3 = vpop.eup %6669 }
0x312b   :  { %v4093_v2 = vrot.slane %v6670_v3, %v7314_v5 }
0x312d   :  { %v4094_v16 = vsel %vm348_vm3, %v4093_v2, %v4089_v15 }
0x312e   :  { %v4096_v40 = vsel %vm1639_vm13, %v4094_v16, 0.0 }
0x312f   :  { %4097 = vadd.xlane.f32.xlu0 %v4096_v40 }
0x315b   :  { %v4287_v18 = vpop.f32.mrb[34].mxu0 }
0x315c   :  { %v6107_v7 = vpop.f32.mrb[35].mxu0 }
0x31bc   :  { %v4098_v17 = vpop.xlane.xlu0 %4097 }
0x31bd   :  { %6671 = vrcp.f32 %v4098_v17 }
0x31c7   :  { %v6672_v22 = vpop.eup %6671 }
0x31c8   :  { %v4108_v58 = vrot.slane %v6672_v22, %v7320_v23  ;;  %v4104_v54 = vrot.slane %v6672_v22, %v7298_v63 }
0x31ca   :  { %v4112_v20 = vmul.f32 %v6670_v3, %v4108_v58  ;;  %v4111_v33 = vmul.f32 %v6668_v56, %v4104_v54 }
0x31cc   :  { %4120 = vperm.xlu0 %6485, %v4112_v20   ;;  %4115 = vperm.xlu1 %6486, %v4111_v33  }
0x31d0   :  { %4293 = vrot.lane.b32.xlu1 %v4034_v34, %s6816_s5 }
0x31d4   :  { %4303 = vrot.lane.b32.xlu1 %v4034_v34, %s6819_s17 }
0x324b   :  { %v4121_v50 = vpop.permute.xlu0 %4120  ;;  %v4116_v47 = vpop.permute.xlu1 %4115 }
0x324c   :  { %v4124_v21 = vmul.f32 %v7714_v46, %v4121_v50  ;;  %v4123_v42 = vmul.f32 %v7717_v36, %v4116_v47 }
0x324e   :  { %v4132_v43 = vsel %vm208_vm4, %v4124_v21, 0.0  ;;  %v4125_v52 = vsel %vm208_vm4, %v4123_v42, 0.0 }
0x324f   :  { %v4133_v13 = vrot.slane %v4132_v43, 4  ;;  %v4126_v24 = vrot.slane %v4125_v52, 4  ;;  %v4294_v15 = vpop.permute.xlu1 %4293 }
0x3251   :  { %v4134_v61 = vadd.f32 %v4133_v13, %v4132_v43  ;;  %v4127_v59 = vadd.f32 %v4126_v24, %v4125_v52 }
0x3253   :  { %v4135_v1 = vrot.slane %v4134_v61, 2  ;;  %v4128_v48 = vrot.slane %v4127_v59, 2  ;;  %v4304_v22 = vpop.permute.xlu1 %4303 }
0x3255   :  { %v4136_v12 = vadd.f32 %v4135_v1, %v4134_v61  ;;  %v4129_v26 = vadd.f32 %v4128_v48, %v4127_v59 }
0x3257   :  { %v4137_v14 = vrot.slane %v4136_v12, 1  ;;  %v4130_v60 = vrot.slane %v4129_v26, 1 }
0x3259   :  { %v4138_v29 = vadd.f32 %v4137_v14, %v4136_v12  ;;  %v4131_v49 = vadd.f32 %v4130_v60, %v4129_v26  ;;  %v4437_v14 = vstv %s4436_s6  ;;  %v4441_v60 = vstv %s4440_s26 }
0x325b   :  { %v4141_v38 = vsel %vm348_vm3, %v4138_v29, %v4131_v49 }
0x325c   :  { %6101 = vmatmul.mubr.msk.f32.vlgmr.msra.gmra.mrb[28].mxu1 %vm208_vm4, %v4141_v38 }
0x325d   :  { %6415 = vmatpush3.bf16.msra.mxu1 %v7401_v37  ;;  %6126 = vmatprep.mubr.msk.f32.mxu1 %vm6813_vm2, %v6814_v10 }
0x325e   :  { %6416 = vmatprep.subr.bf16.mxu1 %v6812_v8 }
0x3261   :  { %6418 = vmatpush3.bf16.msra.mxu1 %v7407_v41 }
0x3262   :  { %6419 = vmatprep.subr.bf16.mxu1 %v6812_v8 }
0x3265   :  { %6421 = vmatpush3.bf16.msra.mxu1 %v7418_v53 }
0x3266   :  { %6422 = vmatprep.subr.bf16.mxu1 %v6812_v8 }
0x3269   :  { %6424 = vmatpush3.bf16.msra.mxu1 %v7429_v57 }
0x326a   :  { %6124 = vmatprep.subr.mxu1 %v6814_v10 }
0x326d   :  { %6125 = vmatpush3.msk.msra.mxu1 %vm123_vm0, %v7838_v11 }
0x326e   :  { %6151 = vmatprep.subr.mxu1 %v6814_v10 }
0x332f   :  { %v4210_v39 = vpop.f32.mrb[28].mxu1 }
0x3330   :  { %v4288_v32 = vadd.f32 %v4287_v18, %v4210_v39  ;;  %v6102_v56 = vpop.f32.mrb[29].mxu1 }
0x3331   :  { %v4438_v56 = vmul.f32 %v7893_v4, %v4437_v14 }
0x3332   :  { %v4291_v3 = vadd.f32 %v7846_v28, %v4288_v32 }
0x3334   :  { %v4296_v2 = vadd.f32 %v4294_v15, %v4291_v3 }
0x3336   :  { %v5493_v16 = vmul.f32 -1.442695, %v4296_v2 }
0x3338   :  { %6673 = vpow2.f32 %v5493_v16 }
0x3342   :  { %v6674_v40 = vpop.eup %6673 }
0x3343   :  { %v4300_v7 = vadd.f32 1.0, %v6674_v40 }
0x3345   :  { %6675 = vrcp.f32 %v4300_v7 }
0x334f   :  { %v6676_v17 = vpop.eup %6675 }
0x3350   :  { %v4306_v58 = vmul.f32 %v6676_v17, %v4304_v22  ;;  %v4313_v18 = vsub.f32 1.0, %v6676_v17  ;;  %v4319_v50 = vmul.f32 %v6676_v17, %v7853_v62 }
0x3352   :  { %4308 = vrot.lane.b32.xlu0 %v4306_v58, %s6815_s4 }
0x33c4   :  { %v4309_v54 = vpop.permute.xlu0 %4308 }
0x33c5   :  { %v4311_v20 = vadd.f32 %v4309_v54, %v4291_v3  ;;  %v4439_v3 = vmul.f32 %v7899_v27, %v4437_v14 }
0x33c7   :  { %6677 = vtanh.f32 %v4311_v20 }
0x33d1   :  { %v6678_v33 = vpop.eup %6677 }
0x33d2   :  { %4315 = vrot.lane.b32.xlu1 %v6678_v33, %s6816_s5 }
0x33d6   :  { %4325 = vrot.lane.b32.xlu1 %v4141_v38, %s6819_s17 }
0x3444   :  { %v4316_v34 = vpop.permute.xlu1 %4315 }
0x3445   :  { %v4318_v47 = vmul.f32 %v4316_v34, %v4313_v18 }
0x3447   :  { %v7962_v21 = vadd.f32 %v4319_v50, %v4318_v47 }
0x3448   :  { %v4326_v43 = vpop.permute.xlu1 %4325 }
0x3449   :  { %4322 = vrot.lane.b32.xlu0 %v7962_v21, %s6816_s5 }
0x344d   :  { %4328 = vrot.lane.b32.xlu0 %v7914_v6, %s6815_s4 }
0x34bb   :  { %v4323_v42 = vpop.permute.xlu0 %4322 }
0x34bc   :  { %6138 = vmatmul.mubr.msk.f32.vlgmr.msra.gmra.mrb[36].mxu0 %vm208_vm4, %v4323_v42  ;;  %v4331_v62 = vsel %vm208_vm4, %v4323_v42, %v4326_v43 }
0x34bd   :  { %6433 = vmatpush3.bf16.msra.mxu0 %v7334_v35  ;;  %6148 = vmatprep.mubr.msk.f32.mxu0 %vm6813_vm2, %v6814_v10 }
0x34be   :  { %6434 = vmatprep.subr.bf16.mxu0 %v6812_v8 }
0x34bf   :  { %v4329_v52 = vpop.permute.xlu0 %4328 }
0x34c0   :  { %v4332_v13 = vsel %vm1884_vm14, %v4331_v62, %v4329_v52 }
0x34c1   :  { %6127 = vmatmul.mubr.msk.f32.vlgmr.msra.gmra.mrb[30].mxu1 %vm1892_vm15, %v4332_v13  ;;  %6436 = vmatpush3.bf16.msra.mxu0 %v7350_v44 }
0x34c2   :  { %6152 = vmatpush3.msk.msra.mxu1 %vm123_vm0, %v7760_v45  ;;  %6153 = vmatprep.mubr.msk.f32.mxu1 %vm6813_vm2, %v6814_v10 }
0x34c3   :  { %6437 = vmatprep.subr.bf16.mxu0 %v6812_v8  ;;  %6449 = vmatprep.subr.bf16.mxu1 %v6812_v8 }
0x358f   :  { %v7983_v6 = vpop.f32.mrb[36].mxu0 }
0x3590   :  { %v4530_v24 = vrot.slane %v7983_v6, %v7290_v55  ;;  %v6139_v61 = vpop.f32.mrb[37].mxu0 }
0x3592   :  { %v4531_v59 = vcombine.high %v4530_v24, %v4530_v24  ;;  %v4538_v1 = vrot.slane %v4530_v24, %v7290_v55 }
0x3594   :  { %v4545_v48 = vrot.slane %v4531_v59, %v7290_v55  ;;  %v4549_v12 = vrot.slane %v4538_v1, %v7298_v63  ;;  %v4402_v26 = vpop.f32.mrb[30].mxu1 }
0x3595   :  { %v4403_v29 = vadd.f32 %v7884_v30, %v4402_v26  ;;  %v6128_v49 = vpop.f32.mrb[31].mxu1 }
0x3596   :  { %v4553_v38 = vrot.slane %v4545_v48, %v7298_v63  ;;  %v4556_v39 = vadd.f32 %v4549_v12, %v7304_v19 }
0x3597   :  { %v4413_v32 = vrot.slane %v4403_v29, %v7290_v55  ;;  %v4442_v15 = vmul.f32 %v4441_v60, %v4403_v29 }
0x3598   :  { %v4557_v2 = vadd.f32 %v7302_v9, %v4553_v38  ;;  %6679 = vtanh.f32 %v4556_v39 }
0x3599   :  { %v4414_v16 = vcombine.high %v4413_v32, %v4413_v32  ;;  %v4421_v40 = vrot.slane %v4413_v32, %v7290_v55  ;;  %v4444_v7 = vrot.slane %v4442_v15, 3  ;;  %v4445_v17 = vrot.slane %v4442_v15, 4 }
0x359a   :  { %6681 = vtanh.f32 %v4557_v2 }
0x359b   :  { %v4428_v22 = vrot.slane %v4414_v16, %v7290_v55  ;;  %4431 = vst.msk [vmem:[%s8174_s16 + $0x5] sm:$0x1] %vm1994_vm5, %v4421_v40  ;;  %v4448_v58 = vadd.f32 %v4444_v7, %v4438_v56  ;;  %v4449_v54 = vadd.f32 %v4445_v17, %v4439_v3  ;;  %v4522_v56 = vadd.f32 %v7983_v6, %v7371_v0 }
0x359d   :  { %4432 = vst.msk [vmem:[%s8174_s16 + $0xd] sm:$0x1] %vm1994_vm5, %v4428_v22  ;;  %v4704_v20 = vrot.slane %v4448_v58, 5  ;;  %v4705_v33 = vrot.slane %v4449_v54, 4 }
0x359f   :  { %v8008_v18 = vsel %vm348_vm3, %v4705_v33, %v4704_v20 }
0x35a0   :  { %6154 = vmatmul.mubr.msk.f32.vlgmr.msra.gmra.mrb[32].mxu1 %vm116_vm1, %v8008_v18 }
0x35a1   :  { %6451 = vmatpush3.bf16.msra.mxu1 %v7219_v51  ;;  %6185 = vmatprep.mubr.msk.f32.mxu1 %vm6813_vm2, %v6814_v10 }
0x35a2   :  { %v6680_v34 = vpop.eup %6679  ;;  %6452 = vmatprep.subr.bf16.mxu1 %v6812_v8 }
0x35a3   :  { %v4560_v50 = vmul.f32 %v7801_v25, %v6680_v34 }
0x35a4   :  { %v6682_v47 = vpop.eup %6681 }
0x35a5   :  { %v4562_v42 = vsel %vm208_vm4, %v4560_v50, 0.0  ;;  %v4561_v43 = vmul.f32 %v7801_v25, %v6682_v47  ;;  %6454 = vmatpush3.bf16.msra.mxu1 %v7237_v31 }
0x35a6   :  { %4563 = vadd.xlane.f32.xlu1 %v4562_v42  ;;  %6455 = vmatprep.subr.bf16.mxu1 %v6812_v8 }
0x35a7   :  { %v4565_v51 = vsel %vm208_vm4, %v4561_v43, 0.0 }
0x35a8   :  { %4566 = vadd.xlane.f32.xlu0 %v4565_v51 }
0x3633   :  { %v4564_v62 = vpop.xlane.xlu1 %4563 }
0x3634   :  { %v4568_v52 = vmul.f32 1.442695, %v4564_v62 }
0x3635   :  { %v4567_v13 = vpop.xlane.xlu0 %4566 }
0x3636   :  { %6683 = vpow2.f32 %v4568_v52  ;;  %v4570_v24 = vmul.f32 1.442695, %v4567_v13 }
0x3638   :  { %6685 = vpow2.f32 %v4570_v24 }
0x3640   :  { %v6684_v61 = vpop.eup %6683 }
0x3641   :  { %v4577_v1 = vrot.slane %v6684_v61, %v7314_v5 }
0x3642   :  { %v6686_v59 = vpop.eup %6685 }
0x3643   :  { %v4581_v48 = vrot.slane %v6686_v59, %v7314_v5 }
0x3645   :  { %v4582_v31 = vsel %vm348_vm3, %v4581_v48, %v4577_v1 }
0x3646   :  { %v4584_v12 = vsel %vm1639_vm13, %v4582_v31, 0.0 }
0x3647   :  { %4585 = vadd.xlane.f32.xlu0 %v4584_v12 }
0x3673   :  { %v4775_v26 = vpop.f32.mrb[32].mxu1 }
0x3674   :  { %v6155_v14 = vpop.f32.mrb[33].mxu1 }
0x36d4   :  { %v4586_v60 = vpop.xlane.xlu0 %4585 }
0x36d5   :  { %6687 = vrcp.f32 %v4586_v60 }
0x36df   :  { %v6688_v29 = vpop.eup %6687 }
0x36e0   :  { %v4596_v49 = vrot.slane %v6688_v29, %v7320_v23  ;;  %v4592_v38 = vrot.slane %v6688_v29, %v7298_v63 }
0x36e2   :  { %v4600_v39 = vmul.f32 %v6686_v59, %v4596_v49  ;;  %v4599_v32 = vmul.f32 %v6684_v61, %v4592_v38 }
0x36e4   :  { %4608 = vperm.xlu0 %6485, %v4600_v39   ;;  %4603 = vperm.xlu1 %6486, %v4599_v32  }
0x36e8   :  { %4781 = vrot.lane.b32.xlu1 %v4522_v56, %s6816_s5 }
0x36ec   :  { %4791 = vrot.lane.b32.xlu1 %v4522_v56, %s6819_s17 }
0x3763   :  { %v4609_v3 = vpop.permute.xlu0 %4608  ;;  %v4604_v15 = vpop.permute.xlu1 %4603 }
0x3764   :  { %v4612_v2 = vmul.f32 %v7714_v46, %v4609_v3  ;;  %v4611_v16 = vmul.f32 %v7717_v36, %v4604_v15 }
0x3766   :  { %v4620_v40 = vsel %vm208_vm4, %v4612_v2, 0.0  ;;  %v4613_v7 = vsel %vm208_vm4, %v4611_v16, 0.0 }
0x3767   :  { %v4621_v17 = vrot.slane %v4620_v40, 4  ;;  %v4614_v22 = vrot.slane %v4613_v7, 4  ;;  %v4782_v13 = vpop.permute.xlu1 %4781 }
0x3769   :  { %v4622_v58 = vadd.f32 %v4621_v17, %v4620_v40  ;;  %v4615_v54 = vadd.f32 %v4614_v22, %v4613_v7  ;;  %v4925_v22 = vstv %s4924_s24 }
0x376b   :  { %v4623_v20 = vrot.slane %v4622_v58, 2  ;;  %v4616_v6 = vrot.slane %v4615_v54, 2  ;;  %v4792_v31 = vpop.permute.xlu1 %4791 }
0x376d   :  { %v4624_v33 = vadd.f32 %v4623_v20, %v4622_v58  ;;  %v4617_v34 = vadd.f32 %v4616_v6, %v4615_v54  ;;  %v4929_v58 = vstv %s4928_s21 }
0x376f   :  { %v4625_v50 = vrot.slane %v4624_v33, 1  ;;  %v4618_v47 = vrot.slane %v4617_v34, 1 }
0x3771   :  { %v4626_v42 = vadd.f32 %v4625_v50, %v4624_v33  ;;  %v4619_v43 = vadd.f32 %v4618_v47, %v4617_v34  ;;  %v4926_v50 = vmul.f32 %v7893_v4, %v4925_v22  ;;  %v4927_v47 = vmul.f32 %v7899_v27, %v4925_v22 }
0x3773   :  { %v4629_v46 = vsel %vm348_vm3, %v4626_v42, %v4619_v43 }
0x3774   :  { %6149 = vmatmul.mubr.msk.f32.vlgmr.msra.gmra.mrb[38].mxu0 %vm208_vm4, %v4629_v46 }
0x3775   :  { %6439 = vmatpush3.bf16.msra.mxu0 %v7401_v37  ;;  %6174 = vmatprep.mubr.msk.f32.mxu0 %vm6813_vm2, %v6814_v10 }
0x3776   :  { %6440 = vmatprep.subr.bf16.mxu0 %v6812_v8 }
0x3779   :  { %6442 = vmatpush3.bf16.msra.mxu0 %v7407_v41 }
0x377a   :  { %6443 = vmatprep.subr.bf16.mxu0 %v6812_v8 }
0x377d   :  { %6445 = vmatpush3.bf16.msra.mxu0 %v7418_v53 }
0x377e   :  { %6446 = vmatprep.subr.bf16.mxu0 %v6812_v8 }
0x3781   :  { %6448 = vmatpush3.bf16.msra.mxu0 %v7429_v57 }
0x3782   :  { %6172 = vmatprep.subr.mxu0 %v6814_v10 }
0x3785   :  { %6173 = vmatpush3.msk.msra.mxu0 %vm123_vm0, %v7838_v11 }
0x3786   :  { %6199 = vmatprep.subr.mxu0 %v6814_v10 }
0x3847   :  { %v4698_v36 = vpop.f32.mrb[38].mxu0 }
0x3848   :  { %v4776_v51 = vadd.f32 %v4775_v26, %v4698_v36  ;;  %v6150_v62 = vpop.f32.mrb[39].mxu0 }
0x384a   :  { %v4779_v52 = vadd.f32 %v7846_v28, %v4776_v51 }
0x384c   :  { %v4784_v24 = vadd.f32 %v4782_v13, %v4779_v52 }
0x384e   :  { %v5501_v61 = vmul.f32 -1.442695, %v4784_v24 }
0x3850   :  { %6689 = vpow2.f32 %v5501_v61 }
0x385a   :  { %v6690_v59 = vpop.eup %6689 }
0x385b   :  { %v4788_v1 = vadd.f32 1.0, %v6690_v59 }
0x385d   :  { %6691 = vrcp.f32 %v4788_v1 }
0x3867   :  { %v6692_v48 = vpop.eup %6691 }
0x3868   :  { %v4794_v12 = vmul.f32 %v6692_v48, %v4792_v31  ;;  %v4801_v26 = vsub.f32 1.0, %v6692_v48  ;;  %v4807_v38 = vmul.f32 %v6692_v48, %v7962_v21 }
0x386a   :  { %4796 = vrot.lane.b32.xlu0 %v4794_v12, %s6815_s4 }
0x38dc   :  { %v4797_v14 = vpop.permute.xlu0 %4796 }
0x38dd   :  { %v4799_v60 = vadd.f32 %v4797_v14, %v4779_v52 }
0x38df   :  { %6693 = vtanh.f32 %v4799_v60 }
0x38e9   :  { %v6694_v29 = vpop.eup %6693 }
0x38ea   :  { %4803 = vrot.lane.b32.xlu1 %v6694_v29, %s6816_s5 }
0x38ee   :  { %4813 = vrot.lane.b32.xlu1 %v4629_v46, %s6819_s17 }
0x395c   :  { %v4804_v49 = vpop.permute.xlu1 %4803 }
0x395d   :  { %v4806_v39 = vmul.f32 %v4804_v49, %v4801_v26 }
0x395f   :  { %v8056_v32 = vadd.f32 %v4807_v38, %v4806_v39 }
0x3960   :  { %v4814_v3 = vpop.permute.xlu1 %4813 }
0x3961   :  { %4810 = vrot.lane.b32.xlu0 %v8056_v32, %s6816_s5 }
0x3965   :  { %4816 = vrot.lane.b32.xlu0 %v8008_v18, %s6815_s4 }
0x39d3   :  { %v4811_v56 = vpop.permute.xlu0 %4810 }
0x39d4   :  { %6186 = vmatmul.mubr.msk.f32.vlgmr.msra.gmra.mrb[34].mxu1 %vm208_vm4, %v4811_v56  ;;  %v4819_v21 = vsel %vm208_vm4, %v4811_v56, %v4814_v3 }
0x39d5   :  { %6457 = vmatpush3.bf16.msra.mxu1 %v7334_v35  ;;  %6196 = vmatprep.mubr.msk.f32.mxu1 %vm6813_vm2, %v6814_v10 }
0x39d6   :  { %6458 = vmatprep.subr.bf16.mxu1 %v6812_v8 }
0x39d7   :  { %v4817_v15 = vpop.permute.xlu0 %4816 }
0x39d8   :  { %v4820_v2 = vsel %vm1884_vm14, %v4819_v21, %v4817_v15 }
0x39d9   :  { %6175 = vmatmul.mubr.msk.f32.vlgmr.msra.gmra.mrb[40].mxu0 %vm1892_vm15, %v4820_v2  ;;  %6460 = vmatpush3.bf16.msra.mxu1 %v7350_v44 }
0x39da   :  { %6200 = vmatpush3.msk.msra.mxu0 %vm123_vm0, %v7760_v45  ;;  %6201 = vmatprep.mubr.msk.f32.mxu0 %vm6813_vm2, %v6814_v10 }
0x39db   :  { %6461 = vmatprep.subr.bf16.mxu1 %v6812_v8 }
0x3aa7   :  { %v8076_v35 = vpop.f32.mrb[34].mxu1 }
0x3aa8   :  { %v5018_v18 = vrot.slane %v8076_v35, %v7290_v55  ;;  %v6187_v16 = vpop.f32.mrb[35].mxu1 }
0x3aaa   :  { %v5019_v44 = vcombine.high %v5018_v18, %v5018_v18  ;;  %v5026_v40 = vrot.slane %v5018_v18, %v7290_v55 }
0x3aac   :  { %v5033_v45 = vrot.slane %v5019_v44, %v7290_v55  ;;  %v5037_v7 = vrot.slane %v5026_v40, %v7298_v63  ;;  %v4890_v17 = vpop.f32.mrb[40].mxu0 }
0x3aad   :  { %v4891_v54 = vadd.f32 %v7884_v30, %v4890_v17  ;;  %v6176_v20 = vpop.f32.mrb[41].mxu0  ;;  %v6722_v17 = vld [vmem:[#allocation2 + $0x8] sm:$0xff] }
0x3aae   :  { %v5041_v6 = vrot.slane %v5033_v45, %v7298_v63  ;;  %v5044_v33 = vadd.f32 %v5037_v7, %v7304_v19 }
0x3aaf   :  { %v4901_v34 = vrot.slane %v4891_v54, %v7290_v55  ;;  %v4930_v42 = vmul.f32 %v4929_v58, %v4891_v54  ;;  %v6723_v58 = vld [vmem:[#allocation2] sm:$0xff] }
0x3ab0   :  { %v5045_v43 = vadd.f32 %v7302_v9, %v5041_v6  ;;  %6695 = vtanh.f32 %v5044_v33 }
0x3ab1   :  { %v4902_v46 = vcombine.high %v4901_v34, %v4901_v34  ;;  %v4909_v36 = vrot.slane %v4901_v34, %v7290_v55  ;;  %v4932_v51 = vrot.slane %v4930_v42, 2  ;;  %v4933_v62 = vrot.slane %v4930_v42, 3 }
0x3ab2   :  { %6697 = vtanh.f32 %v5045_v43 }
0x3ab3   :  { %v4916_v52 = vrot.slane %v4902_v46, %v7290_v55  ;;  %4919 = vst.msk [vmem:[%s8174_s16 + $0x6] sm:$0x1] %vm1994_vm5, %v4909_v36  ;;  %v4936_v19 = vadd.f32 %v4932_v51, %v4926_v50  ;;  %v4937_v4 = vadd.f32 %v4933_v62, %v4927_v47 }
0x3ab5   :  { %4920 = vst.msk [vmem:[%s8174_s16 + $0xe] sm:$0x1] %vm1994_vm5, %v4916_v52  ;;  %v5192_v9 = vrot.slane %v4936_v19, 6  ;;  %v5193_v27 = vrot.slane %v4937_v4, 5 }
0x3ab7   :  { %v8101_v13 = vsel %vm348_vm3, %v5193_v27, %v5192_v9 }
0x3ab8   :  { %6202 = vmatmul.mubr.msk.f32.vlgmr.msra.gmra.mrb[42].mxu0 %vm116_vm1, %v8101_v13 }
0x3aba   :  { %v6696_v24 = vpop.eup %6695 }
0x3abb   :  { %v5048_v61 = vmul.f32 %v7801_v25, %v6696_v24 }
0x3abc   :  { %v6698_v59 = vpop.eup %6697 }
0x3abd   :  { %v5050_v1 = vsel %vm208_vm4, %v5048_v61, 0.0  ;;  %v5049_v48 = vmul.f32 %v7801_v25, %v6698_v59 }
0x3abe   :  { %5051 = vadd.xlane.f32.xlu1 %v5050_v1 }
0x3abf   :  { %v5053_v31 = vsel %vm208_vm4, %v5049_v48, 0.0 }
0x3ac0   :  { %5054 = vadd.xlane.f32.xlu0 %v5053_v31 }
0x3b4b   :  { %v5052_v12 = vpop.xlane.xlu1 %5051 }
0x3b4c   :  { %v5056_v14 = vmul.f32 1.442695, %v5052_v12 }
0x3b4d   :  { %v5055_v60 = vpop.xlane.xlu0 %5054 }
0x3b4e   :  { %6699 = vpow2.f32 %v5056_v14  ;;  %v5058_v29 = vmul.f32 1.442695, %v5055_v60 }
0x3b50   :  { %6701 = vpow2.f32 %v5058_v29 }
0x3b58   :  { %v6700_v26 = vpop.eup %6699 }
0x3b59   :  { %v5065_v38 = vrot.slane %v6700_v26, %v7314_v5 }
0x3b5a   :  { %v6702_v49 = vpop.eup %6701 }
0x3b5b   :  { %v5069_v39 = vrot.slane %v6702_v49, %v7314_v5  ;;  %v5010_v5 = vadd.f32 %v8076_v35, %v7371_v0 }
0x3b5d   :  { %v5070_v56 = vsel %vm348_vm3, %v5069_v39, %v5065_v38 }
0x3b5e   :  { %v5072_v25 = vsel %vm1639_vm13, %v5070_v56, 0.0 }
0x3b5f   :  { %5073 = vadd.xlane.f32.xlu0 %v5072_v25 }
0x3b8b   :  { %v5263_v3 = vpop.f32.mrb[42].mxu0 }
0x3b8c   :  { %v6203_v21 = vpop.f32.mrb[43].mxu0 }
0x3bec   :  { %v5074_v15 = vpop.xlane.xlu0 %5073 }
0x3bed   :  { %6703 = vrcp.f32 %v5074_v15 }
0x3bf7   :  { %v6704_v2 = vpop.eup %6703 }
0x3bf8   :  { %v5084_v18 = vrot.slane %v6704_v2, %v7320_v23  ;;  %v5080_v16 = vrot.slane %v6704_v2, %v7298_v63 }
0x3bfa   :  { %v5088_v44 = vmul.f32 %v6702_v49, %v5084_v18  ;;  %v5087_v40 = vmul.f32 %v6700_v26, %v5080_v16 }
0x3bfc   :  { %5096 = vperm.xlu0 %6485, %v5088_v44   ;;  %5091 = vperm.xlu1 %6486, %v5087_v40  }
0x3c00   :  { %5269 = vrot.lane.b32.xlu1 %v5010_v5, %s6816_s5 }
0x3c04   :  { %5279 = vrot.lane.b32.xlu1 %v5010_v5, %s6819_s17 }
0x3c7b   :  { %v5097_v45 = vpop.permute.xlu0 %5096  ;;  %v5092_v7 = vpop.permute.xlu1 %5091 }
0x3c7c   :  { %v5100_v22 = vmul.f32 %v6722_v17, %v5097_v45  ;;  %v5099_v54 = vmul.f32 %v6723_v58, %v5092_v7 }
0x3c7e   :  { %v5108_v23 = vsel %vm208_vm4, %v5100_v22, 0.0  ;;  %v5101_v63 = vsel %vm208_vm4, %v5099_v54, 0.0 }
0x3c7f   :  { %v5109_v20 = vrot.slane %v5108_v23, 4  ;;  %v5102_v6 = vrot.slane %v5101_v63, 4  ;;  %v5270_v4 = vpop.permute.xlu1 %5269 }
0x3c81   :  { %v5110_v33 = vadd.f32 %v5109_v20, %v5108_v23  ;;  %v5103_v34 = vadd.f32 %v5102_v6, %v5101_v63 }
0x3c83   :  { %v5111_v50 = vrot.slane %v5110_v33, 2  ;;  %v5104_v0 = vrot.slane %v5103_v34, 2  ;;  %v5280_v24 = vpop.permute.xlu1 %5279 }
0x3c85   :  { %v5112_v35 = vadd.f32 %v5111_v50, %v5110_v33  ;;  %v5105_v47 = vadd.f32 %v5104_v0, %v5103_v34 }
0x3c87   :  { %v5113_v42 = vrot.slane %v5112_v35, 1  ;;  %v5106_v43 = vrot.slane %v5105_v47, 1 }
0x3c89   :  { %v5114_v46 = vadd.f32 %v5113_v42, %v5112_v35  ;;  %v5107_v36 = vadd.f32 %v5106_v43, %v5105_v47 }
0x3c8b   :  { %v5117_v51 = vsel %vm348_vm3, %v5114_v46, %v5107_v36 }
0x3c8c   :  { %6197 = vmatmul.mubr.msk.f32.vlgmr.msra.gmra.mrb[36].mxu1 %vm208_vm4, %v5117_v51 }
0x3c8d   :  { %6463 = vmatpush3.bf16.msra.mxu1 %v7401_v37  ;;  %6222 = vmatprep.mubr.msk.f32.mxu1 %vm6813_vm2, %v6814_v10 }
0x3c8e   :  { %6464 = vmatprep.subr.bf16.mxu1 %v6812_v8 }
0x3c91   :  { %6466 = vmatpush3.bf16.msra.mxu1 %v7407_v41 }
0x3c92   :  { %6467 = vmatprep.subr.bf16.mxu1 %v6812_v8 }
0x3c95   :  { %6469 = vmatpush3.bf16.msra.mxu1 %v7418_v53 }
0x3c96   :  { %6470 = vmatprep.subr.bf16.mxu1 %v6812_v8 }
0x3c99   :  { %6472 = vmatpush3.bf16.msra.mxu1 %v7429_v57 }
0x3c9a   :  { %6220 = vmatprep.subr.mxu1 %v6814_v10 }
0x3c9d   :  { %6221 = vmatpush3.msk.msra.mxu1 %vm123_vm0, %v7838_v11 }
0x3d5f   :  { %v5186_v37 = vpop.f32.mrb[36].mxu1 }
0x3d60   :  { %v5264_v62 = vadd.f32 %v5263_v3, %v5186_v37  ;;  %v6198_v52 = vpop.f32.mrb[37].mxu1 }
0x3d62   :  { %v5267_v19 = vadd.f32 %v7846_v28, %v5264_v62 }
0x3d64   :  { %v5272_v41 = vadd.f32 %v5270_v4, %v5267_v19 }
0x3d66   :  { %v5509_v9 = vmul.f32 -1.442695, %v5272_v41 }
0x3d68   :  { %6705 = vpow2.f32 %v5509_v9 }
0x3d72   :  { %v6706_v27 = vpop.eup %6705 }
0x3d73   :  { %v5276_v53 = vadd.f32 1.0, %v6706_v27 }
0x3d75   :  { %6707 = vrcp.f32 %v5276_v53 }
0x3d7f   :  { %v6708_v8 = vpop.eup %6707 }
0x3d80   :  { %v5282_v57 = vmul.f32 %v6708_v8, %v5280_v24  ;;  %v5289_v28 = vsub.f32 1.0, %v6708_v8  ;;  %v5295_v1 = vmul.f32 %v6708_v8, %v8056_v32 }
0x3d82   :  { %5284 = vrot.lane.b32.xlu0 %v5282_v57, %s6815_s4 }
0x3df4   :  { %v5285_v10 = vpop.permute.xlu0 %5284 }
0x3df5   :  { %v5287_v61 = vadd.f32 %v5285_v10, %v5267_v19 }
0x3df7   :  { %6709 = vtanh.f32 %v5287_v61 }
0x3e01   :  { %v6710_v11 = vpop.eup %6709 }
0x3e02   :  { %5291 = vrot.lane.b32.xlu1 %v6710_v11, %s6816_s5 }
0x3e06   :  { %5301 = vrot.lane.b32.xlu1 %v5117_v51, %s6819_s17 }
0x3e74   :  { %v5292_v59 = vpop.permute.xlu1 %5291 }
0x3e75   :  { %v5294_v48 = vmul.f32 %v5292_v59, %v5289_v28 }
0x3e77   :  { %v5296_v31 = vadd.f32 %v5295_v1, %v5294_v48 }
0x3e78   :  { %v5302_v14 = vpop.permute.xlu1 %5301 }
0x3e79   :  { %5298 = vrot.lane.b32.xlu0 %v5296_v31, %s6816_s5 }
0x3e7d   :  { %5304 = vrot.lane.b32.xlu0 %v8101_v13, %s6815_s4 }
0x3eeb   :  { %v5299_v12 = vpop.permute.xlu0 %5298 }
0x3eec   :  { %v5307_v60 = vsel %vm208_vm4, %v5299_v12, %v5302_v14 }
0x3eef   :  { %v5305_v29 = vpop.permute.xlu0 %5304 }
0x3ef0   :  { %v5308_v26 = vsel %vm1884_vm14, %v5307_v60, %v5305_v29 }
0x3ef1   :  { %6223 = vmatmul.mubr.msk.f32.vlgmr.msra.gmra.mrb[38].mxu1 %vm1892_vm15, %v5308_v26 }
0x3fc4   :  { %v5378_v49 = vpop.f32.mrb[38].mxu1 }
0x3fc5   :  { %v5379_v38 = vadd.f32 %v7884_v30, %v5378_v49  ;;  %v6224_v32 = vpop.f32.mrb[39].mxu1 }
0x3fc7   :  { %v5389_v39 = vrot.slane %v5379_v38, %v7290_v55 }
0x3fc9   :  { %v5390_v56 = vcombine.high %v5389_v39, %v5389_v39  ;;  %v5397_v25 = vrot.slane %v5389_v39, %v7290_v55 }
0x3fcb   :  { %v5404_v13 = vrot.slane %v5390_v56, %v7290_v55  ;;  %5407 = vst.msk [vmem:[%s8174_s16 + $0x7] sm:$0x1] %vm1994_vm5, %v5397_v25 }
0x3fcd   :  { %5408 = vst.msk [vmem:[%s8174_s16 + $0xf] sm:$0x1] %vm1994_vm5, %v5404_v13 }
0x3fce   :  { %5413 = vsyncpa [#allocation4], 1 }
0x3fcf   :  { %5414 = vsyncpa [#allocation8], 1 }
0x3fd0   :  { %5415 = vsyncpa [#allocation5], 1 }

</bundles_post_ra>
